<compile_context>
chip_gen: v5e
topology: v5e:2x2
jax: 0.10.0
libtpu: 0.0.40
codegen_flags: <defaults>
</compile_context>

<pallas_src>
import jax
import jax.numpy as jnp
from jax import lax
from jax.experimental import pallas as pl
from jax.experimental.pallas import tpu as pltpu

LANE = 128
SUBLANE = 8
BATCH_TILE = 16          # batch rows per grid step (bf16 sublane tile)
K_TILE_BF16 = 16         # minimal contraction-dim padding for bf16 operands
_PROJ_ROWS = 512         # target rows per hoisted-projection matmul chunk

_MXU_DTYPE = jnp.bfloat16     # MXU operand dtype (accumulation stays f32)
_SEQ_DTYPE = jnp.bfloat16     # inter-layer sequence scratch dtype
_GATES_DTYPE = jnp.bfloat16   # precomputed-gates scratch dtype


def _round_up(x, m):
    return (x + m - 1) // m * m


def _pad_hidden(h):
    # Gate width used for storage/contraction: lane-aligned when H >= 128,
    # sublane-aligned (compact layout) otherwise.
    return _round_up(h, LANE) if h >= LANE else _round_up(h, SUBLANE)


# ---------------------------------------------------------------------------
# Fused kernel factory
# ---------------------------------------------------------------------------
def _make_fused_kernel(num_layers, T, BT, HS, GP):
    """T: seq len, BT: batch tile, HS: padded per-gate width, GP: padded 4*HS."""

    def kernel(*refs):
        # refs layout:
        #   [0]              x        (T, BT, Dp)            bf16
        #   [1 + 3l .. ]     per layer: wih (Din, GP) bf16, whh (HS, GP) bf16,
        #                               bias (1, GP) f32
        #   [1+3L], [2+3L]   fc_w (HS, OUTP) f32, fc_b (1, OUTP) f32
        #   [3+3L]           out      (BT, OUTP)             f32
        #   [4+3L], [5+3L]   seq ping-pong scratch (T, BT, HS) bf16
        #   [6+3L]           gates scratch (T, BT, GP)        bf16
        x_ref = refs[0]
        layer_refs = [refs[1 + 3 * l: 4 + 3 * l] for l in range(num_layers)]
        fcw_ref = refs[1 + 3 * num_layers]
        fcb_ref = refs[2 + 3 * num_layers]
        out_ref = refs[3 + 3 * num_layers]
        seq_scratch = (refs[4 + 3 * num_layers], refs[5 + 3 * num_layers])
        gates_ref = refs[6 + 3 * num_layers]

        # Lane mask selecting the g-block [2*HS, 3*HS) — hoisted, reused by
        # every layer / unrolled step (JAX does not CSE broadcasts).
        lane = lax.broadcasted_iota(jnp.int32, (BT, GP), 1)
        g_mask = jnp.logical_and(lane >= 2 * HS, lane < 3 * HS)

        h_last = None
        for layer in range(num_layers):
            wih_ref, whh_ref, b_ref = layer_refs[layer]
            src_ref = x_ref if layer == 0 else seq_scratch[(layer - 1) % 2]
            dst_ref = None if layer == num_layers - 1 else seq_scratch[layer % 2]
            din = src_ref.shape[-1]

            # (1) Hoisted input projection: x @ W_ih + bias, chunked over T so
            #     operands/results never exceed ~512 live rows.
            t_chunk = max(1, min(T, _PROJ_ROWS // BT))
            for t0 in range(0, T, t_chunk):
                tc = min(t_chunk, T - t0)
                xb = src_ref[t0:t0 + tc]                          # (tc, BT, din) bf16
                gx = jnp.dot(xb.reshape(tc * BT, din), wih_ref[...],
                             preferred_element_type=jnp.float32)  # (tc*BT, GP) f32
                gates_ref[t0:t0 + tc] = (
                    (gx + b_ref[...]).reshape(tc, BT, GP).astype(_GATES_DTYPE))

            # (2) Serial recurrence: one 128-lane h @ W_hh per step; gate math
            #     stays f32.  Activations on the full vreg, g-block via mask.
            def step(t, carry, whh_ref=whh_ref, dst_ref=dst_ref):
                h, c = carry                                      # (BT, HS) f32
                z = gates_ref[t].astype(jnp.float32) + jnp.dot(
                    h.astype(_MXU_DTYPE), whh_ref[...],
                    preferred_element_type=jnp.float32)           # (BT, GP) f32
                zact = jnp.where(g_mask, jnp.tanh(z), jax.nn.sigmoid(z))
                i_g = zact[:, 0 * HS:1 * HS]
                f_g = zact[:, 1 * HS:2 * HS]
                g_g = zact[:, 2 * HS:3 * HS]
                o_g = zact[:, 3 * HS:4 * HS]
                c_new = f_g * c + i_g * g_g
                h_new = o_g * jnp.tanh(c_new)
                if dst_ref is not None:
                    dst_ref[t] = h_new.astype(_SEQ_DTYPE)
                return (h_new, c_new)

            h0 = jnp.zeros((BT, HS), jnp.float32)
            c0 = jnp.zeros((BT, HS), jnp.float32)
            h_last, _ = lax.fori_loop(0, T, step, (h0, c0),
                                      unroll=(True if T <= 32 else 8))

        # (3) Final FC fused in; lane-padded (BT, 128) output (unmasked vst).
        out_ref[...] = (jnp.dot(h_last, fcw_ref[...],
                                preferred_element_type=jnp.float32)
                        + fcb_ref[...])

    return kernel


# ---------------------------------------------------------------------------
# Python wrapper
# ---------------------------------------------------------------------------
@jax.jit
def lstm_forward(x, params):
    """x: (B, T, input_size) float32 -> (B, 1) float32."""
    B, T, D = x.shape
    layers = params["layers"]
    num_layers = len(layers)
    Dp = layers[0][0].shape[0]          # padded input dim of layer 0
    HS = layers[0][1].shape[0]          # padded per-gate / hidden width
    GP = layers[0][1].shape[1]          # padded total gate lanes (4*HS -> 128k)
    OUTP = params["fc_w_t"].shape[1]    # padded FC output lanes

    BT = BATCH_TILE
    Bp = _round_up(B, BT)
    grid = (Bp // BT,)

    # time-major, bf16, pad batch to the batch tile and features to the K-tile
    seq = jnp.transpose(x, (1, 0, 2)).astype(_MXU_DTYPE)           # (T, B, D)
    seq = jnp.pad(seq, ((0, 0), (0, Bp - B), (0, Dp - D)))          # (T, Bp, Dp)

    flat_w = []
    for (wih_t, whh_t, bias) in layers:
        flat_w += [wih_t, whh_t, bias]
    flat_w += [params["fc_w_t"], params["fc_b"]]

    kernel = _make_fused_kernel(num_layers, T, BT, HS, GP)

    in_specs = [pl.BlockSpec((T, BT, Dp), lambda b: (0, b, 0))]     # x: batch tile
    in_specs += [pl.BlockSpec(w.shape, lambda b: (0, 0)) for w in flat_w]
    out_specs = pl.BlockSpec((BT, OUTP), lambda b: (b, 0))

    # VMEM budget from the actual resident footprint (+ double buffering
    # + headroom), clamped to ~90% of physical VMEM.
    x_blk = T * BT * Dp * 2
    w_bytes = sum(int(w.size) * w.dtype.itemsize for w in flat_w)
    out_blk = BT * OUTP * 4
    scratch_bytes = 2 * T * BT * HS * 2 + T * BT * GP * 2
    needed = 2 * (x_blk + w_bytes + out_blk) + scratch_bytes + (8 << 20)
    try:
        phys_vmem = int(pltpu.get_tpu_info().vmem_capacity_bytes)
    except Exception:
        phys_vmem = 64 << 20            # conservative (v7x per-TC)
    vmem_limit = int(min(max(needed, 32 << 20), int(phys_vmem * 0.9)))

    out_pad = pl.pallas_call(
        kernel,
        out_shape=jax.ShapeDtypeStruct((Bp, OUTP), jnp.float32),
        grid=grid,
        in_specs=in_specs,
        out_specs=out_specs,
        scratch_shapes=[
            pltpu.VMEM((T, BT, HS), _SEQ_DTYPE),       # inter-layer seq, ping
            pltpu.VMEM((T, BT, HS), _SEQ_DTYPE),       # inter-layer seq, pong
            pltpu.VMEM((T, BT, GP), _GATES_DTYPE),     # precomputed gates
        ],
        compiler_params=pltpu.CompilerParams(
            dimension_semantics=("parallel",),
            vmem_limit_bytes=vmem_limit,
        ),
    )(seq, *flat_w)

    return out_pad[:B, :1]


# ---------------------------------------------------------------------------
# Parameter init (PyTorch shapes & uniform(-1/sqrt(H), 1/sqrt(H))), then
# transpose + zero-pad to the compact lane-aligned layouts.
# ---------------------------------------------------------------------------
def _pad_gate_weight(w_t, H, HS, GP, d_in, d_in_p):
    # w_t: (d_in, 4H) with gate column blocks [i|f|g|o]; pad each gate block
    # H -> HS, input rows d_in -> d_in_p, then total columns 4*HS -> GP.
    w4 = w_t.reshape(d_in, 4, H)
    w4 = jnp.pad(w4, ((0, d_in_p - d_in), (0, 0), (0, HS - H)))
    w = w4.reshape(d_in_p, 4 * HS)
    return jnp.pad(w, ((0, 0), (0, GP - 4 * HS)))


def _pad_gate_bias(b, H, HS, GP):
    b4 = jnp.pad(b.reshape(4, H), ((0, 0), (0, HS - H))).reshape(1, 4 * HS)
    return jnp.pad(b4, ((0, 0), (0, GP - 4 * HS)))


def init_params(key, input_size, hidden_size, num_layers):
    H = hidden_size
    HS = _pad_hidden(H)                       # per-gate width (32 for H=32)
    GP = _round_up(4 * HS, LANE)              # total gate lanes (128 for H=32)
    Dp = _round_up(input_size, K_TILE_BF16)   # contraction-dim pad only
    bound = 1.0 / (H ** 0.5)

    layers = []
    for layer in range(num_layers):
        d_in = input_size if layer == 0 else H
        d_in_p = Dp if layer == 0 else HS
        key, k1, k2, k3, k4 = jax.random.split(key, 5)
        w_ih = jax.random.uniform(k1, (4 * H, d_in), jnp.float32, -bound, bound)
        w_hh = jax.random.uniform(k2, (4 * H, H), jnp.float32, -bound, bound)
        b_ih = jax.random.uniform(k3, (4 * H,), jnp.float32, -bound, bound)
        b_hh = jax.random.uniform(k4, (4 * H,), jnp.float32, -bound, bound)

        wih_t = _pad_gate_weight(w_ih.T, H, HS, GP, d_in, d_in_p).astype(_MXU_DTYPE)
        whh_t = _pad_gate_weight(w_hh.T, H, HS, GP, H, HS).astype(_MXU_DTYPE)
        bias = _pad_gate_bias(b_ih + b_hh, H, HS, GP)              # (1, GP) f32
        layers.append((wih_t, whh_t, bias))

    key, k5, k6 = jax.random.split(key, 3)
    fc_w = jax.random.uniform(k5, (1, H), jnp.float32, -bound, bound)
    fc_b = jax.random.uniform(k6, (1,), jnp.float32, -bound, bound)
    fc_w_t = jnp.zeros((HS, LANE), jnp.float32).at[:H, 0].set(fc_w[0])  # (HS,128)
    fc_b_p = jnp.zeros((1, LANE), jnp.float32).at[0, 0].set(fc_b[0])    # (1,128)

    return {"layers": tuple(layers), "fc_w_t": fc_w_t, "fc_b": fc_b_p}


# ---------------------------------------------------------------------------
# Main
# ---------------------------------------------------------------------------
if __name__ == "__main__":
    input_size = 4
    hidden_size = 32
    num_layers = 2
    batch = 2
    seq_len = 8

    key = jax.random.PRNGKey(0)
    key, xkey, pkey = jax.random.split(key, 3)

    x = jax.random.normal(xkey, (batch, seq_len, input_size), jnp.float32)
    params = init_params(pkey, input_size, hidden_size, num_layers)

    out = lstm_forward(x, params)
    out = jax.block_until_ready(out)
    assert out.shape == (batch, 1), out.shape
    assert out.dtype == jnp.float32, out.dtype
    print("KERNEL_OK")
</pallas_src>

<mosaic_0001>
module attributes {stable_mosaic.version = 11 : i64} {
  func.func @kernel(%arg0: i32, %arg1: memref<8x16x16xbf16, #tpu.memory_space<vmem>>, %arg2: memref<16x128xbf16, #tpu.memory_space<vmem>>, %arg3: memref<32x128xbf16, #tpu.memory_space<vmem>>, %arg4: memref<1x128xf32, #tpu.memory_space<vmem>>, %arg5: memref<32x128xbf16, #tpu.memory_space<vmem>>, %arg6: memref<32x128xbf16, #tpu.memory_space<vmem>>, %arg7: memref<1x128xf32, #tpu.memory_space<vmem>>, %arg8: memref<32x128xf32, #tpu.memory_space<vmem>>, %arg9: memref<1x128xf32, #tpu.memory_space<vmem>>, %arg10: memref<16x128xf32, #tpu.memory_space<vmem>>, %arg11: memref<8x16x32xbf16, #tpu.memory_space<vmem>>, %arg12: memref<8x16x32xbf16, #tpu.memory_space<vmem>>, %arg13: memref<8x16x128xbf16, #tpu.memory_space<vmem>>) attributes {dimension_semantics = [#tpu.dimension_semantics<parallel>], iteration_bounds = array<i64: 1>, scalar_prefetch = 0 : i64, scratch_operands = 3 : i64, tpu.core_type = #tpu.core_type<tc>, window_params = [{transform_indices = @transform_0, window_bounds = array<i64: 8, 16, 16>}, {pipeline_mode = #tpu.pipeline_mode<synchronous>, transform_indices = @transform_1, window_bounds = array<i64: 16, 128>}, {pipeline_mode = #tpu.pipeline_mode<synchronous>, transform_indices = @transform_2, window_bounds = array<i64: 32, 128>}, {pipeline_mode = #tpu.pipeline_mode<synchronous>, transform_indices = @transform_3, window_bounds = array<i64: 1, 128>}, {pipeline_mode = #tpu.pipeline_mode<synchronous>, transform_indices = @transform_4, window_bounds = array<i64: 32, 128>}, {pipeline_mode = #tpu.pipeline_mode<synchronous>, transform_indices = @transform_5, window_bounds = array<i64: 32, 128>}, {pipeline_mode = #tpu.pipeline_mode<synchronous>, transform_indices = @transform_6, window_bounds = array<i64: 1, 128>}, {pipeline_mode = #tpu.pipeline_mode<synchronous>, transform_indices = @transform_7, window_bounds = array<i64: 32, 128>}, {pipeline_mode = #tpu.pipeline_mode<synchronous>, transform_indices = @transform_8, window_bounds = array<i64: 1, 128>}, {transform_indices = @transform_9, window_bounds = array<i64: 16, 128>}]} {
    %0 = tpu.iota {dimensions = array<i32: 1>} : vector<16x128xi32>
    %c64_i32 = arith.constant 64 : i32
    %1 = vector.broadcast %c64_i32 : i32 to vector<16x128xi32>
    %2 = arith.cmpi sge, %0, %1 : vector<16x128xi32>
    %c96_i32 = arith.constant 96 : i32
    %3 = vector.broadcast %c96_i32 : i32 to vector<16x128xi32>
    %4 = arith.cmpi slt, %0, %3 : vector<16x128xi32>
    %5 = arith.andi %2, %4 : vector<16x128xi1>
    %c0 = arith.constant 0 : index
    %c0_0 = arith.constant 0 : index
    %c0_1 = arith.constant 0 : index
    %6 = vector.load %arg1[%c0, %c0_0, %c0_1] : memref<8x16x16xbf16, #tpu.memory_space<vmem>>, vector<8x16x16xbf16>
    %7 = vector.shape_cast %6 : vector<8x16x16xbf16> to vector<128x16xbf16>
    %c0_2 = arith.constant 0 : index
    %c0_3 = arith.constant 0 : index
    %8 = vector.load %arg2[%c0_2, %c0_3] : memref<16x128xbf16, #tpu.memory_space<vmem>>, vector<16x128xbf16>
    %cst = arith.constant dense<0.000000e+00> : vector<128x128xf32>
    %9 = tpu.matmul %7, %8, %cst {dimension_numbers = #tpu.dot_dimension_numbers<[1], [0], [0], [1], [0, 0, 1, 1], [], []>} : vector<128x16xbf16>, vector<16x128xbf16>, vector<128x128xf32> -> vector<128x128xf32>
    %c0_4 = arith.constant 0 : index
    %c0_5 = arith.constant 0 : index
    %10 = vector.load %arg4[%c0_4, %c0_5] : memref<1x128xf32, #tpu.memory_space<vmem>>, vector<1x128xf32>
    %11 = vector.broadcast %10 : vector<1x128xf32> to vector<128x128xf32>
    %12 = arith.addf %9, %11 : vector<128x128xf32>
    %13 = vector.shape_cast %12 : vector<128x128xf32> to vector<8x16x128xf32>
    %14 = arith.truncf %13 : vector<8x16x128xf32> to vector<8x16x128xbf16>
    %c0_6 = arith.constant 0 : index
    %c0_7 = arith.constant 0 : index
    %c0_8 = arith.constant 0 : index
    %15 = vector.load %arg13[%c0_6, %c0_7, %c0_8] : memref<8x16x128xbf16, #tpu.memory_space<vmem>>, vector<8x16x128xbf16>
    tpu.vector_store %arg13[%c0_6, %c0_7, %c0_8], %14 {strides = array<i32>} : memref<8x16x128xbf16, #tpu.memory_space<vmem>>, vector<8x16x128xbf16>,
    %cst_9 = arith.constant 0.000000e+00 : f32
    %16 = vector.broadcast %cst_9 : f32 to vector<16x32xf32>
    %cst_10 = arith.constant 0.000000e+00 : f32
    %17 = vector.broadcast %cst_10 : f32 to vector<16x32xf32>
    %c0_i32 = arith.constant 0 : i32
    %18 = arith.index_cast %c0_i32 : i32 to index
    %c0_11 = arith.constant 0 : index
    %c0_12 = arith.constant 0 : index
    %19 = vector.load %arg13[%18, %c0_11, %c0_12] : memref<8x16x128xbf16, #tpu.memory_space<vmem>>, vector<1x16x128xbf16>
    %20 = vector.shape_cast %19 : vector<1x16x128xbf16> to vector<16x128xbf16>
    %21 = arith.extf %20 : vector<16x128xbf16> to vector<16x128xf32>
    %22 = arith.truncf %16 : vector<16x32xf32> to vector<16x32xbf16>
    %c0_13 = arith.constant 0 : index
    %c0_14 = arith.constant 0 : index
    %23 = vector.load %arg3[%c0_13, %c0_14] : memref<32x128xbf16, #tpu.memory_space<vmem>>, vector<32x128xbf16>
    %cst_15 = arith.constant dense<0.000000e+00> : vector<16x128xf32>
    %24 = tpu.matmul %22, %23, %cst_15 {dimension_numbers = #tpu.dot_dimension_numbers<[1], [0], [0], [1], [0, 0, 1, 1], [], []>} : vector<16x32xbf16>, vector<32x128xbf16>, vector<16x128xf32> -> vector<16x128xf32>
    %25 = arith.addf %21, %24 : vector<16x128xf32>
    %26 = math.tanh %25 : vector<16x128xf32>
    %27 = arith.negf %25 : vector<16x128xf32>
    %28 = math.exp %27 : vector<16x128xf32>
    %cst_16 = arith.constant 1.000000e+00 : f32
    %29 = vector.broadcast %cst_16 : f32 to vector<16x128xf32>
    %30 = arith.addf %29, %28 : vector<16x128xf32>
    %31 = arith.divf %29, %30 : vector<16x128xf32>
    %32 = arith.select %5, %26, %31 : vector<16x128xi1>, vector<16x128xf32>
    %33 = vector.extract_strided_slice %32 {offsets = [0, 0], sizes = [16, 32], strides = [1, 1]} : vector<16x128xf32> to vector<16x32xf32>
    %34 = vector.extract_strided_slice %32 {offsets = [0, 32], sizes = [16, 32], strides = [1, 1]} : vector<16x128xf32> to vector<16x32xf32>
    %35 = vector.extract_strided_slice %32 {offsets = [0, 64], sizes = [16, 32], strides = [1, 1]} : vector<16x128xf32> to vector<16x32xf32>
    %36 = vector.extract_strided_slice %32 {offsets = [0, 96], sizes = [16, 32], strides = [1, 1]} : vector<16x128xf32> to vector<16x32xf32>
    %37 = arith.mulf %34, %17 : vector<16x32xf32>
    %38 = arith.mulf %33, %35 : vector<16x32xf32>
    %39 = arith.addf %37, %38 : vector<16x32xf32>
    %40 = math.tanh %39 : vector<16x32xf32>
    %41 = arith.mulf %36, %40 : vector<16x32xf32>
    %42 = arith.truncf %41 : vector<16x32xf32> to vector<16x32xbf16>
    %43 = arith.index_cast %c0_i32 : i32 to index
    %c0_17 = arith.constant 0 : index
    %c0_18 = arith.constant 0 : index
    %44 = vector.load %arg11[%43, %c0_17, %c0_18] : memref<8x16x32xbf16, #tpu.memory_space<vmem>>, vector<1x16x32xbf16>
    %45 = vector.shape_cast %44 : vector<1x16x32xbf16> to vector<16x32xbf16>
    %46 = vector.shape_cast %42 : vector<16x32xbf16> to vector<1x16x32xbf16>
    tpu.vector_store %arg11[%43, %c0_17, %c0_18], %46 {strides = array<i32>} : memref<8x16x32xbf16, #tpu.memory_space<vmem>>, vector<1x16x32xbf16>,
    %c1_i32 = arith.constant 1 : i32
    %47 = arith.index_cast %c1_i32 : i32 to index
    %c0_19 = arith.constant 0 : index
    %c0_20 = arith.constant 0 : index
    %48 = vector.load %arg13[%47, %c0_19, %c0_20] : memref<8x16x128xbf16, #tpu.memory_space<vmem>>, vector<1x16x128xbf16>
    %49 = vector.shape_cast %48 : vector<1x16x128xbf16> to vector<16x128xbf16>
    %50 = arith.extf %49 : vector<16x128xbf16> to vector<16x128xf32>
    %51 = arith.truncf %41 : vector<16x32xf32> to vector<16x32xbf16>
    %c0_21 = arith.constant 0 : index
    %c0_22 = arith.constant 0 : index
    %52 = vector.load %arg3[%c0_21, %c0_22] : memref<32x128xbf16, #tpu.memory_space<vmem>>, vector<32x128xbf16>
    %cst_23 = arith.constant dense<0.000000e+00> : vector<16x128xf32>
    %53 = tpu.matmul %51, %52, %cst_23 {dimension_numbers = #tpu.dot_dimension_numbers<[1], [0], [0], [1], [0, 0, 1, 1], [], []>} : vector<16x32xbf16>, vector<32x128xbf16>, vector<16x128xf32> -> vector<16x128xf32>
    %54 = arith.addf %50, %53 : vector<16x128xf32>
    %55 = math.tanh %54 : vector<16x128xf32>
    %56 = arith.negf %54 : vector<16x128xf32>
    %57 = math.exp %56 : vector<16x128xf32>
    %cst_24 = arith.constant 1.000000e+00 : f32
    %58 = vector.broadcast %cst_24 : f32 to vector<16x128xf32>
    %59 = arith.addf %58, %57 : vector<16x128xf32>
    %60 = arith.divf %58, %59 : vector<16x128xf32>
    %61 = arith.select %5, %55, %60 : vector<16x128xi1>, vector<16x128xf32>
    %62 = vector.extract_strided_slice %61 {offsets = [0, 0], sizes = [16, 32], strides = [1, 1]} : vector<16x128xf32> to vector<16x32xf32>
    %63 = vector.extract_strided_slice %61 {offsets = [0, 32], sizes = [16, 32], strides = [1, 1]} : vector<16x128xf32> to vector<16x32xf32>
    %64 = vector.extract_strided_slice %61 {offsets = [0, 64], sizes = [16, 32], strides = [1, 1]} : vector<16x128xf32> to vector<16x32xf32>
    %65 = vector.extract_strided_slice %61 {offsets = [0, 96], sizes = [16, 32], strides = [1, 1]} : vector<16x128xf32> to vector<16x32xf32>
    %66 = arith.mulf %63, %39 : vector<16x32xf32>
    %67 = arith.mulf %62, %64 : vector<16x32xf32>
    %68 = arith.addf %66, %67 : vector<16x32xf32>
    %69 = math.tanh %68 : vector<16x32xf32>
    %70 = arith.mulf %65, %69 : vector<16x32xf32>
    %71 = arith.truncf %70 : vector<16x32xf32> to vector<16x32xbf16>
    %72 = arith.index_cast %c1_i32 : i32 to index
    %c0_25 = arith.constant 0 : index
    %c0_26 = arith.constant 0 : index
    %73 = vector.load %arg11[%72, %c0_25, %c0_26] : memref<8x16x32xbf16, #tpu.memory_space<vmem>>, vector<1x16x32xbf16>
    %74 = vector.shape_cast %73 : vector<1x16x32xbf16> to vector<16x32xbf16>
    %75 = vector.shape_cast %71 : vector<16x32xbf16> to vector<1x16x32xbf16>
    tpu.vector_store %arg11[%72, %c0_25, %c0_26], %75 {strides = array<i32>} : memref<8x16x32xbf16, #tpu.memory_space<vmem>>, vector<1x16x32xbf16>,
    %c2_i32 = arith.constant 2 : i32
    %76 = arith.index_cast %c2_i32 : i32 to index
    %c0_27 = arith.constant 0 : index
    %c0_28 = arith.constant 0 : index
    %77 = vector.load %arg13[%76, %c0_27, %c0_28] : memref<8x16x128xbf16, #tpu.memory_space<vmem>>, vector<1x16x128xbf16>
    %78 = vector.shape_cast %77 : vector<1x16x128xbf16> to vector<16x128xbf16>
    %79 = arith.extf %78 : vector<16x128xbf16> to vector<16x128xf32>
    %80 = arith.truncf %70 : vector<16x32xf32> to vector<16x32xbf16>
    %c0_29 = arith.constant 0 : index
    %c0_30 = arith.constant 0 : index
    %81 = vector.load %arg3[%c0_29, %c0_30] : memref<32x128xbf16, #tpu.memory_space<vmem>>, vector<32x128xbf16>
    %cst_31 = arith.constant dense<0.000000e+00> : vector<16x128xf32>
    %82 = tpu.matmul %80, %81, %cst_31 {dimension_numbers = #tpu.dot_dimension_numbers<[1], [0], [0], [1], [0, 0, 1, 1], [], []>} : vector<16x32xbf16>, vector<32x128xbf16>, vector<16x128xf32> -> vector<16x128xf32>
    %83 = arith.addf %79, %82 : vector<16x128xf32>
    %84 = math.tanh %83 : vector<16x128xf32>
    %85 = arith.negf %83 : vector<16x128xf32>
    %86 = math.exp %85 : vector<16x128xf32>
    %cst_32 = arith.constant 1.000000e+00 : f32
    %87 = vector.broadcast %cst_32 : f32 to vector<16x128xf32>
    %88 = arith.addf %87, %86 : vector<16x128xf32>
    %89 = arith.divf %87, %88 : vector<16x128xf32>
    %90 = arith.select %5, %84, %89 : vector<16x128xi1>, vector<16x128xf32>
    %91 = vector.extract_strided_slice %90 {offsets = [0, 0], sizes = [16, 32], strides = [1, 1]} : vector<16x128xf32> to vector<16x32xf32>
    %92 = vector.extract_strided_slice %90 {offsets = [0, 32], sizes = [16, 32], strides = [1, 1]} : vector<16x128xf32> to vector<16x32xf32>
    %93 = vector.extract_strided_slice %90 {offsets = [0, 64], sizes = [16, 32], strides = [1, 1]} : vector<16x128xf32> to vector<16x32xf32>
    %94 = vector.extract_strided_slice %90 {offsets = [0, 96], sizes = [16, 32], strides = [1, 1]} : vector<16x128xf32> to vector<16x32xf32>
    %95 = arith.mulf %92, %68 : vector<16x32xf32>
    %96 = arith.mulf %91, %93 : vector<16x32xf32>
    %97 = arith.addf %95, %96 : vector<16x32xf32>
    %98 = math.tanh %97 : vector<16x32xf32>
    %99 = arith.mulf %94, %98 : vector<16x32xf32>
    %100 = arith.truncf %99 : vector<16x32xf32> to vector<16x32xbf16>
    %101 = arith.index_cast %c2_i32 : i32 to index
    %c0_33 = arith.constant 0 : index
    %c0_34 = arith.constant 0 : index
    %102 = vector.load %arg11[%101, %c0_33, %c0_34] : memref<8x16x32xbf16, #tpu.memory_space<vmem>>, vector<1x16x32xbf16>
    %103 = vector.shape_cast %102 : vector<1x16x32xbf16> to vector<16x32xbf16>
    %104 = vector.shape_cast %100 : vector<16x32xbf16> to vector<1x16x32xbf16>
    tpu.vector_store %arg11[%101, %c0_33, %c0_34], %104 {strides = array<i32>} : memref<8x16x32xbf16, #tpu.memory_space<vmem>>, vector<1x16x32xbf16>,
    %c3_i32 = arith.constant 3 : i32
    %105 = arith.index_cast %c3_i32 : i32 to index
    %c0_35 = arith.constant 0 : index
    %c0_36 = arith.constant 0 : index
    %106 = vector.load %arg13[%105, %c0_35, %c0_36] : memref<8x16x128xbf16, #tpu.memory_space<vmem>>, vector<1x16x128xbf16>
    %107 = vector.shape_cast %106 : vector<1x16x128xbf16> to vector<16x128xbf16>
    %108 = arith.extf %107 : vector<16x128xbf16> to vector<16x128xf32>
    %109 = arith.truncf %99 : vector<16x32xf32> to vector<16x32xbf16>
    %c0_37 = arith.constant 0 : index
    %c0_38 = arith.constant 0 : index
    %110 = vector.load %arg3[%c0_37, %c0_38] : memref<32x128xbf16, #tpu.memory_space<vmem>>, vector<32x128xbf16>
    %cst_39 = arith.constant dense<0.000000e+00> : vector<16x128xf32>
    %111 = tpu.matmul %109, %110, %cst_39 {dimension_numbers = #tpu.dot_dimension_numbers<[1], [0], [0], [1], [0, 0, 1, 1], [], []>} : vector<16x32xbf16>, vector<32x128xbf16>, vector<16x128xf32> -> vector<16x128xf32>
    %112 = arith.addf %108, %111 : vector<16x128xf32>
    %113 = math.tanh %112 : vector<16x128xf32>
    %114 = arith.negf %112 : vector<16x128xf32>
    %115 = math.exp %114 : vector<16x128xf32>
    %cst_40 = arith.constant 1.000000e+00 : f32
    %116 = vector.broadcast %cst_40 : f32 to vector<16x128xf32>
    %117 = arith.addf %116, %115 : vector<16x128xf32>
    %118 = arith.divf %116, %117 : vector<16x128xf32>
    %119 = arith.select %5, %113, %118 : vector<16x128xi1>, vector<16x128xf32>
    %120 = vector.extract_strided_slice %119 {offsets = [0, 0], sizes = [16, 32], strides = [1, 1]} : vector<16x128xf32> to vector<16x32xf32>
    %121 = vector.extract_strided_slice %119 {offsets = [0, 32], sizes = [16, 32], strides = [1, 1]} : vector<16x128xf32> to vector<16x32xf32>
    %122 = vector.extract_strided_slice %119 {offsets = [0, 64], sizes = [16, 32], strides = [1, 1]} : vector<16x128xf32> to vector<16x32xf32>
    %123 = vector.extract_strided_slice %119 {offsets = [0, 96], sizes = [16, 32], strides = [1, 1]} : vector<16x128xf32> to vector<16x32xf32>
    %124 = arith.mulf %121, %97 : vector<16x32xf32>
    %125 = arith.mulf %120, %122 : vector<16x32xf32>
    %126 = arith.addf %124, %125 : vector<16x32xf32>
    %127 = math.tanh %126 : vector<16x32xf32>
    %128 = arith.mulf %123, %127 : vector<16x32xf32>
    %129 = arith.truncf %128 : vector<16x32xf32> to vector<16x32xbf16>
    %130 = arith.index_cast %c3_i32 : i32 to index
    %c0_41 = arith.constant 0 : index
    %c0_42 = arith.constant 0 : index
    %131 = vector.load %arg11[%130, %c0_41, %c0_42] : memref<8x16x32xbf16, #tpu.memory_space<vmem>>, vector<1x16x32xbf16>
    %132 = vector.shape_cast %131 : vector<1x16x32xbf16> to vector<16x32xbf16>
    %133 = vector.shape_cast %129 : vector<16x32xbf16> to vector<1x16x32xbf16>
    tpu.vector_store %arg11[%130, %c0_41, %c0_42], %133 {strides = array<i32>} : memref<8x16x32xbf16, #tpu.memory_space<vmem>>, vector<1x16x32xbf16>,
    %c4_i32 = arith.constant 4 : i32
    %134 = arith.index_cast %c4_i32 : i32 to index
    %c0_43 = arith.constant 0 : index
    %c0_44 = arith.constant 0 : index
    %135 = vector.load %arg13[%134, %c0_43, %c0_44] : memref<8x16x128xbf16, #tpu.memory_space<vmem>>, vector<1x16x128xbf16>
    %136 = vector.shape_cast %135 : vector<1x16x128xbf16> to vector<16x128xbf16>
    %137 = arith.extf %136 : vector<16x128xbf16> to vector<16x128xf32>
    %138 = arith.truncf %128 : vector<16x32xf32> to vector<16x32xbf16>
    %c0_45 = arith.constant 0 : index
    %c0_46 = arith.constant 0 : index
    %139 = vector.load %arg3[%c0_45, %c0_46] : memref<32x128xbf16, #tpu.memory_space<vmem>>, vector<32x128xbf16>
    %cst_47 = arith.constant dense<0.000000e+00> : vector<16x128xf32>
    %140 = tpu.matmul %138, %139, %cst_47 {dimension_numbers = #tpu.dot_dimension_numbers<[1], [0], [0], [1], [0, 0, 1, 1], [], []>} : vector<16x32xbf16>, vector<32x128xbf16>, vector<16x128xf32> -> vector<16x128xf32>
    %141 = arith.addf %137, %140 : vector<16x128xf32>
    %142 = math.tanh %141 : vector<16x128xf32>
    %143 = arith.negf %141 : vector<16x128xf32>
    %144 = math.exp %143 : vector<16x128xf32>
    %cst_48 = arith.constant 1.000000e+00 : f32
    %145 = vector.broadcast %cst_48 : f32 to vector<16x128xf32>
    %146 = arith.addf %145, %144 : vector<16x128xf32>
    %147 = arith.divf %145, %146 : vector<16x128xf32>
    %148 = arith.select %5, %142, %147 : vector<16x128xi1>, vector<16x128xf32>
    %149 = vector.extract_strided_slice %148 {offsets = [0, 0], sizes = [16, 32], strides = [1, 1]} : vector<16x128xf32> to vector<16x32xf32>
    %150 = vector.extract_strided_slice %148 {offsets = [0, 32], sizes = [16, 32], strides = [1, 1]} : vector<16x128xf32> to vector<16x32xf32>
    %151 = vector.extract_strided_slice %148 {offsets = [0, 64], sizes = [16, 32], strides = [1, 1]} : vector<16x128xf32> to vector<16x32xf32>
    %152 = vector.extract_strided_slice %148 {offsets = [0, 96], sizes = [16, 32], strides = [1, 1]} : vector<16x128xf32> to vector<16x32xf32>
    %153 = arith.mulf %150, %126 : vector<16x32xf32>
    %154 = arith.mulf %149, %151 : vector<16x32xf32>
    %155 = arith.addf %153, %154 : vector<16x32xf32>
    %156 = math.tanh %155 : vector<16x32xf32>
    %157 = arith.mulf %152, %156 : vector<16x32xf32>
    %158 = arith.truncf %157 : vector<16x32xf32> to vector<16x32xbf16>
    %159 = arith.index_cast %c4_i32 : i32 to index
    %c0_49 = arith.constant 0 : index
    %c0_50 = arith.constant 0 : index
    %160 = vector.load %arg11[%159, %c0_49, %c0_50] : memref<8x16x32xbf16, #tpu.memory_space<vmem>>, vector<1x16x32xbf16>
    %161 = vector.shape_cast %160 : vector<1x16x32xbf16> to vector<16x32xbf16>
    %162 = vector.shape_cast %158 : vector<16x32xbf16> to vector<1x16x32xbf16>
    tpu.vector_store %arg11[%159, %c0_49, %c0_50], %162 {strides = array<i32>} : memref<8x16x32xbf16, #tpu.memory_space<vmem>>, vector<1x16x32xbf16>,
    %c5_i32 = arith.constant 5 : i32
    %163 = arith.index_cast %c5_i32 : i32 to index
    %c0_51 = arith.constant 0 : index
    %c0_52 = arith.constant 0 : index
    %164 = vector.load %arg13[%163, %c0_51, %c0_52] : memref<8x16x128xbf16, #tpu.memory_space<vmem>>, vector<1x16x128xbf16>
    %165 = vector.shape_cast %164 : vector<1x16x128xbf16> to vector<16x128xbf16>
    %166 = arith.extf %165 : vector<16x128xbf16> to vector<16x128xf32>
    %167 = arith.truncf %157 : vector<16x32xf32> to vector<16x32xbf16>
    %c0_53 = arith.constant 0 : index
    %c0_54 = arith.constant 0 : index
    %168 = vector.load %arg3[%c0_53, %c0_54] : memref<32x128xbf16, #tpu.memory_space<vmem>>, vector<32x128xbf16>
    %cst_55 = arith.constant dense<0.000000e+00> : vector<16x128xf32>
    %169 = tpu.matmul %167, %168, %cst_55 {dimension_numbers = #tpu.dot_dimension_numbers<[1], [0], [0], [1], [0, 0, 1, 1], [], []>} : vector<16x32xbf16>, vector<32x128xbf16>, vector<16x128xf32> -> vector<16x128xf32>
    %170 = arith.addf %166, %169 : vector<16x128xf32>
    %171 = math.tanh %170 : vector<16x128xf32>
    %172 = arith.negf %170 : vector<16x128xf32>
    %173 = math.exp %172 : vector<16x128xf32>
    %cst_56 = arith.constant 1.000000e+00 : f32
    %174 = vector.broadcast %cst_56 : f32 to vector<16x128xf32>
    %175 = arith.addf %174, %173 : vector<16x128xf32>
    %176 = arith.divf %174, %175 : vector<16x128xf32>
    %177 = arith.select %5, %171, %176 : vector<16x128xi1>, vector<16x128xf32>
    %178 = vector.extract_strided_slice %177 {offsets = [0, 0], sizes = [16, 32], strides = [1, 1]} : vector<16x128xf32> to vector<16x32xf32>
    %179 = vector.extract_strided_slice %177 {offsets = [0, 32], sizes = [16, 32], strides = [1, 1]} : vector<16x128xf32> to vector<16x32xf32>
    %180 = vector.extract_strided_slice %177 {offsets = [0, 64], sizes = [16, 32], strides = [1, 1]} : vector<16x128xf32> to vector<16x32xf32>
    %181 = vector.extract_strided_slice %177 {offsets = [0, 96], sizes = [16, 32], strides = [1, 1]} : vector<16x128xf32> to vector<16x32xf32>
    %182 = arith.mulf %179, %155 : vector<16x32xf32>
    %183 = arith.mulf %178, %180 : vector<16x32xf32>
    %184 = arith.addf %182, %183 : vector<16x32xf32>
    %185 = math.tanh %184 : vector<16x32xf32>
    %186 = arith.mulf %181, %185 : vector<16x32xf32>
    %187 = arith.truncf %186 : vector<16x32xf32> to vector<16x32xbf16>
    %188 = arith.index_cast %c5_i32 : i32 to index
    %c0_57 = arith.constant 0 : index
    %c0_58 = arith.constant 0 : index
    %189 = vector.load %arg11[%188, %c0_57, %c0_58] : memref<8x16x32xbf16, #tpu.memory_space<vmem>>, vector<1x16x32xbf16>
    %190 = vector.shape_cast %189 : vector<1x16x32xbf16> to vector<16x32xbf16>
    %191 = vector.shape_cast %187 : vector<16x32xbf16> to vector<1x16x32xbf16>
    tpu.vector_store %arg11[%188, %c0_57, %c0_58], %191 {strides = array<i32>} : memref<8x16x32xbf16, #tpu.memory_space<vmem>>, vector<1x16x32xbf16>,
    %c6_i32 = arith.constant 6 : i32
    %192 = arith.index_cast %c6_i32 : i32 to index
    %c0_59 = arith.constant 0 : index
    %c0_60 = arith.constant 0 : index
    %193 = vector.load %arg13[%192, %c0_59, %c0_60] : memref<8x16x128xbf16, #tpu.memory_space<vmem>>, vector<1x16x128xbf16>
    %194 = vector.shape_cast %193 : vector<1x16x128xbf16> to vector<16x128xbf16>
    %195 = arith.extf %194 : vector<16x128xbf16> to vector<16x128xf32>
    %196 = arith.truncf %186 : vector<16x32xf32> to vector<16x32xbf16>
    %c0_61 = arith.constant 0 : index
    %c0_62 = arith.constant 0 : index
    %197 = vector.load %arg3[%c0_61, %c0_62] : memref<32x128xbf16, #tpu.memory_space<vmem>>, vector<32x128xbf16>
    %cst_63 = arith.constant dense<0.000000e+00> : vector<16x128xf32>
    %198 = tpu.matmul %196, %197, %cst_63 {dimension_numbers = #tpu.dot_dimension_numbers<[1], [0], [0], [1], [0, 0, 1, 1], [], []>} : vector<16x32xbf16>, vector<32x128xbf16>, vector<16x128xf32> -> vector<16x128xf32>
    %199 = arith.addf %195, %198 : vector<16x128xf32>
    %200 = math.tanh %199 : vector<16x128xf32>
    %201 = arith.negf %199 : vector<16x128xf32>
    %202 = math.exp %201 : vector<16x128xf32>
    %cst_64 = arith.constant 1.000000e+00 : f32
    %203 = vector.broadcast %cst_64 : f32 to vector<16x128xf32>
    %204 = arith.addf %203, %202 : vector<16x128xf32>
    %205 = arith.divf %203, %204 : vector<16x128xf32>
    %206 = arith.select %5, %200, %205 : vector<16x128xi1>, vector<16x128xf32>
    %207 = vector.extract_strided_slice %206 {offsets = [0, 0], sizes = [16, 32], strides = [1, 1]} : vector<16x128xf32> to vector<16x32xf32>
    %208 = vector.extract_strided_slice %206 {offsets = [0, 32], sizes = [16, 32], strides = [1, 1]} : vector<16x128xf32> to vector<16x32xf32>
    %209 = vector.extract_strided_slice %206 {offsets = [0, 64], sizes = [16, 32], strides = [1, 1]} : vector<16x128xf32> to vector<16x32xf32>
    %210 = vector.extract_strided_slice %206 {offsets = [0, 96], sizes = [16, 32], strides = [1, 1]} : vector<16x128xf32> to vector<16x32xf32>
    %211 = arith.mulf %208, %184 : vector<16x32xf32>
    %212 = arith.mulf %207, %209 : vector<16x32xf32>
    %213 = arith.addf %211, %212 : vector<16x32xf32>
    %214 = math.tanh %213 : vector<16x32xf32>
    %215 = arith.mulf %210, %214 : vector<16x32xf32>
    %216 = arith.truncf %215 : vector<16x32xf32> to vector<16x32xbf16>
    %217 = arith.index_cast %c6_i32 : i32 to index
    %c0_65 = arith.constant 0 : index
    %c0_66 = arith.constant 0 : index
    %218 = vector.load %arg11[%217, %c0_65, %c0_66] : memref<8x16x32xbf16, #tpu.memory_space<vmem>>, vector<1x16x32xbf16>
    %219 = vector.shape_cast %218 : vector<1x16x32xbf16> to vector<16x32xbf16>
    %220 = vector.shape_cast %216 : vector<16x32xbf16> to vector<1x16x32xbf16>
    tpu.vector_store %arg11[%217, %c0_65, %c0_66], %220 {strides = array<i32>} : memref<8x16x32xbf16, #tpu.memory_space<vmem>>, vector<1x16x32xbf16>,
    %c7_i32 = arith.constant 7 : i32
    %221 = arith.index_cast %c7_i32 : i32 to index
    %c0_67 = arith.constant 0 : index
    %c0_68 = arith.constant 0 : index
    %222 = vector.load %arg13[%221, %c0_67, %c0_68] : memref<8x16x128xbf16, #tpu.memory_space<vmem>>, vector<1x16x128xbf16>
    %223 = vector.shape_cast %222 : vector<1x16x128xbf16> to vector<16x128xbf16>
    %224 = arith.extf %223 : vector<16x128xbf16> to vector<16x128xf32>
    %225 = arith.truncf %215 : vector<16x32xf32> to vector<16x32xbf16>
    %c0_69 = arith.constant 0 : index
    %c0_70 = arith.constant 0 : index
    %226 = vector.load %arg3[%c0_69, %c0_70] : memref<32x128xbf16, #tpu.memory_space<vmem>>, vector<32x128xbf16>
    %cst_71 = arith.constant dense<0.000000e+00> : vector<16x128xf32>
    %227 = tpu.matmul %225, %226, %cst_71 {dimension_numbers = #tpu.dot_dimension_numbers<[1], [0], [0], [1], [0, 0, 1, 1], [], []>} : vector<16x32xbf16>, vector<32x128xbf16>, vector<16x128xf32> -> vector<16x128xf32>
    %228 = arith.addf %224, %227 : vector<16x128xf32>
    %229 = math.tanh %228 : vector<16x128xf32>
    %230 = arith.negf %228 : vector<16x128xf32>
    %231 = math.exp %230 : vector<16x128xf32>
    %cst_72 = arith.constant 1.000000e+00 : f32
    %232 = vector.broadcast %cst_72 : f32 to vector<16x128xf32>
    %233 = arith.addf %232, %231 : vector<16x128xf32>
    %234 = arith.divf %232, %233 : vector<16x128xf32>
    %235 = arith.select %5, %229, %234 : vector<16x128xi1>, vector<16x128xf32>
    %236 = vector.extract_strided_slice %235 {offsets = [0, 0], sizes = [16, 32], strides = [1, 1]} : vector<16x128xf32> to vector<16x32xf32>
    %237 = vector.extract_strided_slice %235 {offsets = [0, 32], sizes = [16, 32], strides = [1, 1]} : vector<16x128xf32> to vector<16x32xf32>
    %238 = vector.extract_strided_slice %235 {offsets = [0, 64], sizes = [16, 32], strides = [1, 1]} : vector<16x128xf32> to vector<16x32xf32>
    %239 = vector.extract_strided_slice %235 {offsets = [0, 96], sizes = [16, 32], strides = [1, 1]} : vector<16x128xf32> to vector<16x32xf32>
    %240 = arith.mulf %237, %213 : vector<16x32xf32>
    %241 = arith.mulf %236, %238 : vector<16x32xf32>
    %242 = arith.addf %240, %241 : vector<16x32xf32>
    %243 = math.tanh %242 : vector<16x32xf32>
    %244 = arith.mulf %239, %243 : vector<16x32xf32>
    %245 = arith.truncf %244 : vector<16x32xf32> to vector<16x32xbf16>
    %246 = arith.index_cast %c7_i32 : i32 to index
    %c0_73 = arith.constant 0 : index
    %c0_74 = arith.constant 0 : index
    %247 = vector.load %arg11[%246, %c0_73, %c0_74] : memref<8x16x32xbf16, #tpu.memory_space<vmem>>, vector<1x16x32xbf16>
    %248 = vector.shape_cast %247 : vector<1x16x32xbf16> to vector<16x32xbf16>
    %249 = vector.shape_cast %245 : vector<16x32xbf16> to vector<1x16x32xbf16>
    tpu.vector_store %arg11[%246, %c0_73, %c0_74], %249 {strides = array<i32>} : memref<8x16x32xbf16, #tpu.memory_space<vmem>>, vector<1x16x32xbf16>,
    %c8_i32 = arith.constant 8 : i32
    %c0_75 = arith.constant 0 : index
    %c0_76 = arith.constant 0 : index
    %c0_77 = arith.constant 0 : index
    %250 = vector.load %arg11[%c0_75, %c0_76, %c0_77] : memref<8x16x32xbf16, #tpu.memory_space<vmem>>, vector<8x16x32xbf16>
    %251 = vector.shape_cast %250 : vector<8x16x32xbf16> to vector<128x32xbf16>
    %c0_78 = arith.constant 0 : index
    %c0_79 = arith.constant 0 : index
    %252 = vector.load %arg5[%c0_78, %c0_79] : memref<32x128xbf16, #tpu.memory_space<vmem>>, vector<32x128xbf16>
    %cst_80 = arith.constant dense<0.000000e+00> : vector<128x128xf32>
    %253 = tpu.matmul %251, %252, %cst_80 {dimension_numbers = #tpu.dot_dimension_numbers<[1], [0], [0], [1], [0, 0, 1, 1], [], []>} : vector<128x32xbf16>, vector<32x128xbf16>, vector<128x128xf32> -> vector<128x128xf32>
    %c0_81 = arith.constant 0 : index
    %c0_82 = arith.constant 0 : index
    %254 = vector.load %arg7[%c0_81, %c0_82] : memref<1x128xf32, #tpu.memory_space<vmem>>, vector<1x128xf32>
    %255 = vector.broadcast %254 : vector<1x128xf32> to vector<128x128xf32>
    %256 = arith.addf %253, %255 : vector<128x128xf32>
    %257 = vector.shape_cast %256 : vector<128x128xf32> to vector<8x16x128xf32>
    %258 = arith.truncf %257 : vector<8x16x128xf32> to vector<8x16x128xbf16>
    %c0_83 = arith.constant 0 : index
    %c0_84 = arith.constant 0 : index
    %c0_85 = arith.constant 0 : index
    %259 = vector.load %arg13[%c0_83, %c0_84, %c0_85] : memref<8x16x128xbf16, #tpu.memory_space<vmem>>, vector<8x16x128xbf16>
    tpu.vector_store %arg13[%c0_83, %c0_84, %c0_85], %258 {strides = array<i32>} : memref<8x16x128xbf16, #tpu.memory_space<vmem>>, vector<8x16x128xbf16>,
    %cst_86 = arith.constant 0.000000e+00 : f32
    %260 = vector.broadcast %cst_86 : f32 to vector<16x32xf32>
    %cst_87 = arith.constant 0.000000e+00 : f32
    %261 = vector.broadcast %cst_87 : f32 to vector<16x32xf32>
    %c0_i32_88 = arith.constant 0 : i32
    %262 = arith.index_cast %c0_i32_88 : i32 to index
    %c0_89 = arith.constant 0 : index
    %c0_90 = arith.constant 0 : index
    %263 = vector.load %arg13[%262, %c0_89, %c0_90] : memref<8x16x128xbf16, #tpu.memory_space<vmem>>, vector<1x16x128xbf16>
    %264 = vector.shape_cast %263 : vector<1x16x128xbf16> to vector<16x128xbf16>
    %265 = arith.extf %264 : vector<16x128xbf16> to vector<16x128xf32>
    %266 = arith.truncf %260 : vector<16x32xf32> to vector<16x32xbf16>
    %c0_91 = arith.constant 0 : index
    %c0_92 = arith.constant 0 : index
    %267 = vector.load %arg6[%c0_91, %c0_92] : memref<32x128xbf16, #tpu.memory_space<vmem>>, vector<32x128xbf16>
    %cst_93 = arith.constant dense<0.000000e+00> : vector<16x128xf32>
    %268 = tpu.matmul %266, %267, %cst_93 {dimension_numbers = #tpu.dot_dimension_numbers<[1], [0], [0], [1], [0, 0, 1, 1], [], []>} : vector<16x32xbf16>, vector<32x128xbf16>, vector<16x128xf32> -> vector<16x128xf32>
    %269 = arith.addf %265, %268 : vector<16x128xf32>
    %270 = math.tanh %269 : vector<16x128xf32>
    %271 = arith.negf %269 : vector<16x128xf32>
    %272 = math.exp %271 : vector<16x128xf32>
    %cst_94 = arith.constant 1.000000e+00 : f32
    %273 = vector.broadcast %cst_94 : f32 to vector<16x128xf32>
    %274 = arith.addf %273, %272 : vector<16x128xf32>
    %275 = arith.divf %273, %274 : vector<16x128xf32>
    %276 = arith.select %5, %270, %275 : vector<16x128xi1>, vector<16x128xf32>
    %277 = vector.extract_strided_slice %276 {offsets = [0, 0], sizes = [16, 32], strides = [1, 1]} : vector<16x128xf32> to vector<16x32xf32>
    %278 = vector.extract_strided_slice %276 {offsets = [0, 32], sizes = [16, 32], strides = [1, 1]} : vector<16x128xf32> to vector<16x32xf32>
    %279 = vector.extract_strided_slice %276 {offsets = [0, 64], sizes = [16, 32], strides = [1, 1]} : vector<16x128xf32> to vector<16x32xf32>
    %280 = vector.extract_strided_slice %276 {offsets = [0, 96], sizes = [16, 32], strides = [1, 1]} : vector<16x128xf32> to vector<16x32xf32>
    %281 = arith.mulf %278, %261 : vector<16x32xf32>
    %282 = arith.mulf %277, %279 : vector<16x32xf32>
    %283 = arith.addf %281, %282 : vector<16x32xf32>
    %284 = math.tanh %283 : vector<16x32xf32>
    %285 = arith.mulf %280, %284 : vector<16x32xf32>
    %c1_i32_95 = arith.constant 1 : i32
    %286 = arith.index_cast %c1_i32_95 : i32 to index
    %c0_96 = arith.constant 0 : index
    %c0_97 = arith.constant 0 : index
    %287 = vector.load %arg13[%286, %c0_96, %c0_97] : memref<8x16x128xbf16, #tpu.memory_space<vmem>>, vector<1x16x128xbf16>
    %288 = vector.shape_cast %287 : vector<1x16x128xbf16> to vector<16x128xbf16>
    %289 = arith.extf %288 : vector<16x128xbf16> to vector<16x128xf32>
    %290 = arith.truncf %285 : vector<16x32xf32> to vector<16x32xbf16>
    %c0_98 = arith.constant 0 : index
    %c0_99 = arith.constant 0 : index
    %291 = vector.load %arg6[%c0_98, %c0_99] : memref<32x128xbf16, #tpu.memory_space<vmem>>, vector<32x128xbf16>
    %cst_100 = arith.constant dense<0.000000e+00> : vector<16x128xf32>
    %292 = tpu.matmul %290, %291, %cst_100 {dimension_numbers = #tpu.dot_dimension_numbers<[1], [0], [0], [1], [0, 0, 1, 1], [], []>} : vector<16x32xbf16>, vector<32x128xbf16>, vector<16x128xf32> -> vector<16x128xf32>
    %293 = arith.addf %289, %292 : vector<16x128xf32>
    %294 = math.tanh %293 : vector<16x128xf32>
    %295 = arith.negf %293 : vector<16x128xf32>
    %296 = math.exp %295 : vector<16x128xf32>
    %cst_101 = arith.constant 1.000000e+00 : f32
    %297 = vector.broadcast %cst_101 : f32 to vector<16x128xf32>
    %298 = arith.addf %297, %296 : vector<16x128xf32>
    %299 = arith.divf %297, %298 : vector<16x128xf32>
    %300 = arith.select %5, %294, %299 : vector<16x128xi1>, vector<16x128xf32>
    %301 = vector.extract_strided_slice %300 {offsets = [0, 0], sizes = [16, 32], strides = [1, 1]} : vector<16x128xf32> to vector<16x32xf32>
    %302 = vector.extract_strided_slice %300 {offsets = [0, 32], sizes = [16, 32], strides = [1, 1]} : vector<16x128xf32> to vector<16x32xf32>
    %303 = vector.extract_strided_slice %300 {offsets = [0, 64], sizes = [16, 32], strides = [1, 1]} : vector<16x128xf32> to vector<16x32xf32>
    %304 = vector.extract_strided_slice %300 {offsets = [0, 96], sizes = [16, 32], strides = [1, 1]} : vector<16x128xf32> to vector<16x32xf32>
    %305 = arith.mulf %302, %283 : vector<16x32xf32>
    %306 = arith.mulf %301, %303 : vector<16x32xf32>
    %307 = arith.addf %305, %306 : vector<16x32xf32>
    %308 = math.tanh %307 : vector<16x32xf32>
    %309 = arith.mulf %304, %308 : vector<16x32xf32>
    %c2_i32_102 = arith.constant 2 : i32
    %310 = arith.index_cast %c2_i32_102 : i32 to index
    %c0_103 = arith.constant 0 : index
    %c0_104 = arith.constant 0 : index
    %311 = vector.load %arg13[%310, %c0_103, %c0_104] : memref<8x16x128xbf16, #tpu.memory_space<vmem>>, vector<1x16x128xbf16>
    %312 = vector.shape_cast %311 : vector<1x16x128xbf16> to vector<16x128xbf16>
    %313 = arith.extf %312 : vector<16x128xbf16> to vector<16x128xf32>
    %314 = arith.truncf %309 : vector<16x32xf32> to vector<16x32xbf16>
    %c0_105 = arith.constant 0 : index
    %c0_106 = arith.constant 0 : index
    %315 = vector.load %arg6[%c0_105, %c0_106] : memref<32x128xbf16, #tpu.memory_space<vmem>>, vector<32x128xbf16>
    %cst_107 = arith.constant dense<0.000000e+00> : vector<16x128xf32>
    %316 = tpu.matmul %314, %315, %cst_107 {dimension_numbers = #tpu.dot_dimension_numbers<[1], [0], [0], [1], [0, 0, 1, 1], [], []>} : vector<16x32xbf16>, vector<32x128xbf16>, vector<16x128xf32> -> vector<16x128xf32>
    %317 = arith.addf %313, %316 : vector<16x128xf32>
    %318 = math.tanh %317 : vector<16x128xf32>
    %319 = arith.negf %317 : vector<16x128xf32>
    %320 = math.exp %319 : vector<16x128xf32>
    %cst_108 = arith.constant 1.000000e+00 : f32
    %321 = vector.broadcast %cst_108 : f32 to vector<16x128xf32>
    %322 = arith.addf %321, %320 : vector<16x128xf32>
    %323 = arith.divf %321, %322 : vector<16x128xf32>
    %324 = arith.select %5, %318, %323 : vector<16x128xi1>, vector<16x128xf32>
    %325 = vector.extract_strided_slice %324 {offsets = [0, 0], sizes = [16, 32], strides = [1, 1]} : vector<16x128xf32> to vector<16x32xf32>
    %326 = vector.extract_strided_slice %324 {offsets = [0, 32], sizes = [16, 32], strides = [1, 1]} : vector<16x128xf32> to vector<16x32xf32>
    %327 = vector.extract_strided_slice %324 {offsets = [0, 64], sizes = [16, 32], strides = [1, 1]} : vector<16x128xf32> to vector<16x32xf32>
    %328 = vector.extract_strided_slice %324 {offsets = [0, 96], sizes = [16, 32], strides = [1, 1]} : vector<16x128xf32> to vector<16x32xf32>
    %329 = arith.mulf %326, %307 : vector<16x32xf32>
    %330 = arith.mulf %325, %327 : vector<16x32xf32>
    %331 = arith.addf %329, %330 : vector<16x32xf32>
    %332 = math.tanh %331 : vector<16x32xf32>
    %333 = arith.mulf %328, %332 : vector<16x32xf32>
    %c3_i32_109 = arith.constant 3 : i32
    %334 = arith.index_cast %c3_i32_109 : i32 to index
    %c0_110 = arith.constant 0 : index
    %c0_111 = arith.constant 0 : index
    %335 = vector.load %arg13[%334, %c0_110, %c0_111] : memref<8x16x128xbf16, #tpu.memory_space<vmem>>, vector<1x16x128xbf16>
    %336 = vector.shape_cast %335 : vector<1x16x128xbf16> to vector<16x128xbf16>
    %337 = arith.extf %336 : vector<16x128xbf16> to vector<16x128xf32>
    %338 = arith.truncf %333 : vector<16x32xf32> to vector<16x32xbf16>
    %c0_112 = arith.constant 0 : index
    %c0_113 = arith.constant 0 : index
    %339 = vector.load %arg6[%c0_112, %c0_113] : memref<32x128xbf16, #tpu.memory_space<vmem>>, vector<32x128xbf16>
    %cst_114 = arith.constant dense<0.000000e+00> : vector<16x128xf32>
    %340 = tpu.matmul %338, %339, %cst_114 {dimension_numbers = #tpu.dot_dimension_numbers<[1], [0], [0], [1], [0, 0, 1, 1], [], []>} : vector<16x32xbf16>, vector<32x128xbf16>, vector<16x128xf32> -> vector<16x128xf32>
    %341 = arith.addf %337, %340 : vector<16x128xf32>
    %342 = math.tanh %341 : vector<16x128xf32>
    %343 = arith.negf %341 : vector<16x128xf32>
    %344 = math.exp %343 : vector<16x128xf32>
    %cst_115 = arith.constant 1.000000e+00 : f32
    %345 = vector.broadcast %cst_115 : f32 to vector<16x128xf32>
    %346 = arith.addf %345, %344 : vector<16x128xf32>
    %347 = arith.divf %345, %346 : vector<16x128xf32>
    %348 = arith.select %5, %342, %347 : vector<16x128xi1>, vector<16x128xf32>
    %349 = vector.extract_strided_slice %348 {offsets = [0, 0], sizes = [16, 32], strides = [1, 1]} : vector<16x128xf32> to vector<16x32xf32>
    %350 = vector.extract_strided_slice %348 {offsets = [0, 32], sizes = [16, 32], strides = [1, 1]} : vector<16x128xf32> to vector<16x32xf32>
    %351 = vector.extract_strided_slice %348 {offsets = [0, 64], sizes = [16, 32], strides = [1, 1]} : vector<16x128xf32> to vector<16x32xf32>
    %352 = vector.extract_strided_slice %348 {offsets = [0, 96], sizes = [16, 32], strides = [1, 1]} : vector<16x128xf32> to vector<16x32xf32>
    %353 = arith.mulf %350, %331 : vector<16x32xf32>
    %354 = arith.mulf %349, %351 : vector<16x32xf32>
    %355 = arith.addf %353, %354 : vector<16x32xf32>
    %356 = math.tanh %355 : vector<16x32xf32>
    %357 = arith.mulf %352, %356 : vector<16x32xf32>
    %c4_i32_116 = arith.constant 4 : i32
    %358 = arith.index_cast %c4_i32_116 : i32 to index
    %c0_117 = arith.constant 0 : index
    %c0_118 = arith.constant 0 : index
    %359 = vector.load %arg13[%358, %c0_117, %c0_118] : memref<8x16x128xbf16, #tpu.memory_space<vmem>>, vector<1x16x128xbf16>
    %360 = vector.shape_cast %359 : vector<1x16x128xbf16> to vector<16x128xbf16>
    %361 = arith.extf %360 : vector<16x128xbf16> to vector<16x128xf32>
    %362 = arith.truncf %357 : vector<16x32xf32> to vector<16x32xbf16>
    %c0_119 = arith.constant 0 : index
    %c0_120 = arith.constant 0 : index
    %363 = vector.load %arg6[%c0_119, %c0_120] : memref<32x128xbf16, #tpu.memory_space<vmem>>, vector<32x128xbf16>
    %cst_121 = arith.constant dense<0.000000e+00> : vector<16x128xf32>
    %364 = tpu.matmul %362, %363, %cst_121 {dimension_numbers = #tpu.dot_dimension_numbers<[1], [0], [0], [1], [0, 0, 1, 1], [], []>} : vector<16x32xbf16>, vector<32x128xbf16>, vector<16x128xf32> -> vector<16x128xf32>
    %365 = arith.addf %361, %364 : vector<16x128xf32>
    %366 = math.tanh %365 : vector<16x128xf32>
    %367 = arith.negf %365 : vector<16x128xf32>
    %368 = math.exp %367 : vector<16x128xf32>
    %cst_122 = arith.constant 1.000000e+00 : f32
    %369 = vector.broadcast %cst_122 : f32 to vector<16x128xf32>
    %370 = arith.addf %369, %368 : vector<16x128xf32>
    %371 = arith.divf %369, %370 : vector<16x128xf32>
    %372 = arith.select %5, %366, %371 : vector<16x128xi1>, vector<16x128xf32>
    %373 = vector.extract_strided_slice %372 {offsets = [0, 0], sizes = [16, 32], strides = [1, 1]} : vector<16x128xf32> to vector<16x32xf32>
    %374 = vector.extract_strided_slice %372 {offsets = [0, 32], sizes = [16, 32], strides = [1, 1]} : vector<16x128xf32> to vector<16x32xf32>
    %375 = vector.extract_strided_slice %372 {offsets = [0, 64], sizes = [16, 32], strides = [1, 1]} : vector<16x128xf32> to vector<16x32xf32>
    %376 = vector.extract_strided_slice %372 {offsets = [0, 96], sizes = [16, 32], strides = [1, 1]} : vector<16x128xf32> to vector<16x32xf32>
    %377 = arith.mulf %374, %355 : vector<16x32xf32>
    %378 = arith.mulf %373, %375 : vector<16x32xf32>
    %379 = arith.addf %377, %378 : vector<16x32xf32>
    %380 = math.tanh %379 : vector<16x32xf32>
    %381 = arith.mulf %376, %380 : vector<16x32xf32>
    %c5_i32_123 = arith.constant 5 : i32
    %382 = arith.index_cast %c5_i32_123 : i32 to index
    %c0_124 = arith.constant 0 : index
    %c0_125 = arith.constant 0 : index
    %383 = vector.load %arg13[%382, %c0_124, %c0_125] : memref<8x16x128xbf16, #tpu.memory_space<vmem>>, vector<1x16x128xbf16>
    %384 = vector.shape_cast %383 : vector<1x16x128xbf16> to vector<16x128xbf16>
    %385 = arith.extf %384 : vector<16x128xbf16> to vector<16x128xf32>
    %386 = arith.truncf %381 : vector<16x32xf32> to vector<16x32xbf16>
    %c0_126 = arith.constant 0 : index
    %c0_127 = arith.constant 0 : index
    %387 = vector.load %arg6[%c0_126, %c0_127] : memref<32x128xbf16, #tpu.memory_space<vmem>>, vector<32x128xbf16>
    %cst_128 = arith.constant dense<0.000000e+00> : vector<16x128xf32>
    %388 = tpu.matmul %386, %387, %cst_128 {dimension_numbers = #tpu.dot_dimension_numbers<[1], [0], [0], [1], [0, 0, 1, 1], [], []>} : vector<16x32xbf16>, vector<32x128xbf16>, vector<16x128xf32> -> vector<16x128xf32>
    %389 = arith.addf %385, %388 : vector<16x128xf32>
    %390 = math.tanh %389 : vector<16x128xf32>
    %391 = arith.negf %389 : vector<16x128xf32>
    %392 = math.exp %391 : vector<16x128xf32>
    %cst_129 = arith.constant 1.000000e+00 : f32
    %393 = vector.broadcast %cst_129 : f32 to vector<16x128xf32>
    %394 = arith.addf %393, %392 : vector<16x128xf32>
    %395 = arith.divf %393, %394 : vector<16x128xf32>
    %396 = arith.select %5, %390, %395 : vector<16x128xi1>, vector<16x128xf32>
    %397 = vector.extract_strided_slice %396 {offsets = [0, 0], sizes = [16, 32], strides = [1, 1]} : vector<16x128xf32> to vector<16x32xf32>
    %398 = vector.extract_strided_slice %396 {offsets = [0, 32], sizes = [16, 32], strides = [1, 1]} : vector<16x128xf32> to vector<16x32xf32>
    %399 = vector.extract_strided_slice %396 {offsets = [0, 64], sizes = [16, 32], strides = [1, 1]} : vector<16x128xf32> to vector<16x32xf32>
    %400 = vector.extract_strided_slice %396 {offsets = [0, 96], sizes = [16, 32], strides = [1, 1]} : vector<16x128xf32> to vector<16x32xf32>
    %401 = arith.mulf %398, %379 : vector<16x32xf32>
    %402 = arith.mulf %397, %399 : vector<16x32xf32>
    %403 = arith.addf %401, %402 : vector<16x32xf32>
    %404 = math.tanh %403 : vector<16x32xf32>
    %405 = arith.mulf %400, %404 : vector<16x32xf32>
    %c6_i32_130 = arith.constant 6 : i32
    %406 = arith.index_cast %c6_i32_130 : i32 to index
    %c0_131 = arith.constant 0 : index
    %c0_132 = arith.constant 0 : index
    %407 = vector.load %arg13[%406, %c0_131, %c0_132] : memref<8x16x128xbf16, #tpu.memory_space<vmem>>, vector<1x16x128xbf16>
    %408 = vector.shape_cast %407 : vector<1x16x128xbf16> to vector<16x128xbf16>
    %409 = arith.extf %408 : vector<16x128xbf16> to vector<16x128xf32>
    %410 = arith.truncf %405 : vector<16x32xf32> to vector<16x32xbf16>
    %c0_133 = arith.constant 0 : index
    %c0_134 = arith.constant 0 : index
    %411 = vector.load %arg6[%c0_133, %c0_134] : memref<32x128xbf16, #tpu.memory_space<vmem>>, vector<32x128xbf16>
    %cst_135 = arith.constant dense<0.000000e+00> : vector<16x128xf32>
    %412 = tpu.matmul %410, %411, %cst_135 {dimension_numbers = #tpu.dot_dimension_numbers<[1], [0], [0], [1], [0, 0, 1, 1], [], []>} : vector<16x32xbf16>, vector<32x128xbf16>, vector<16x128xf32> -> vector<16x128xf32>
    %413 = arith.addf %409, %412 : vector<16x128xf32>
    %414 = math.tanh %413 : vector<16x128xf32>
    %415 = arith.negf %413 : vector<16x128xf32>
    %416 = math.exp %415 : vector<16x128xf32>
    %cst_136 = arith.constant 1.000000e+00 : f32
    %417 = vector.broadcast %cst_136 : f32 to vector<16x128xf32>
    %418 = arith.addf %417, %416 : vector<16x128xf32>
    %419 = arith.divf %417, %418 : vector<16x128xf32>
    %420 = arith.select %5, %414, %419 : vector<16x128xi1>, vector<16x128xf32>
    %421 = vector.extract_strided_slice %420 {offsets = [0, 0], sizes = [16, 32], strides = [1, 1]} : vector<16x128xf32> to vector<16x32xf32>
    %422 = vector.extract_strided_slice %420 {offsets = [0, 32], sizes = [16, 32], strides = [1, 1]} : vector<16x128xf32> to vector<16x32xf32>
    %423 = vector.extract_strided_slice %420 {offsets = [0, 64], sizes = [16, 32], strides = [1, 1]} : vector<16x128xf32> to vector<16x32xf32>
    %424 = vector.extract_strided_slice %420 {offsets = [0, 96], sizes = [16, 32], strides = [1, 1]} : vector<16x128xf32> to vector<16x32xf32>
    %425 = arith.mulf %422, %403 : vector<16x32xf32>
    %426 = arith.mulf %421, %423 : vector<16x32xf32>
    %427 = arith.addf %425, %426 : vector<16x32xf32>
    %428 = math.tanh %427 : vector<16x32xf32>
    %429 = arith.mulf %424, %428 : vector<16x32xf32>
    %c7_i32_137 = arith.constant 7 : i32
    %430 = arith.index_cast %c7_i32_137 : i32 to index
    %c0_138 = arith.constant 0 : index
    %c0_139 = arith.constant 0 : index
    %431 = vector.load %arg13[%430, %c0_138, %c0_139] : memref<8x16x128xbf16, #tpu.memory_space<vmem>>, vector<1x16x128xbf16>
    %432 = vector.shape_cast %431 : vector<1x16x128xbf16> to vector<16x128xbf16>
    %433 = arith.extf %432 : vector<16x128xbf16> to vector<16x128xf32>
    %434 = arith.truncf %429 : vector<16x32xf32> to vector<16x32xbf16>
    %c0_140 = arith.constant 0 : index
    %c0_141 = arith.constant 0 : index
    %435 = vector.load %arg6[%c0_140, %c0_141] : memref<32x128xbf16, #tpu.memory_space<vmem>>, vector<32x128xbf16>
    %cst_142 = arith.constant dense<0.000000e+00> : vector<16x128xf32>
    %436 = tpu.matmul %434, %435, %cst_142 {dimension_numbers = #tpu.dot_dimension_numbers<[1], [0], [0], [1], [0, 0, 1, 1], [], []>} : vector<16x32xbf16>, vector<32x128xbf16>, vector<16x128xf32> -> vector<16x128xf32>
    %437 = arith.addf %433, %436 : vector<16x128xf32>
    %438 = math.tanh %437 : vector<16x128xf32>
    %439 = arith.negf %437 : vector<16x128xf32>
    %440 = math.exp %439 : vector<16x128xf32>
    %cst_143 = arith.constant 1.000000e+00 : f32
    %441 = vector.broadcast %cst_143 : f32 to vector<16x128xf32>
    %442 = arith.addf %441, %440 : vector<16x128xf32>
    %443 = arith.divf %441, %442 : vector<16x128xf32>
    %444 = arith.select %5, %438, %443 : vector<16x128xi1>, vector<16x128xf32>
    %445 = vector.extract_strided_slice %444 {offsets = [0, 0], sizes = [16, 32], strides = [1, 1]} : vector<16x128xf32> to vector<16x32xf32>
    %446 = vector.extract_strided_slice %444 {offsets = [0, 32], sizes = [16, 32], strides = [1, 1]} : vector<16x128xf32> to vector<16x32xf32>
    %447 = vector.extract_strided_slice %444 {offsets = [0, 64], sizes = [16, 32], strides = [1, 1]} : vector<16x128xf32> to vector<16x32xf32>
    %448 = vector.extract_strided_slice %444 {offsets = [0, 96], sizes = [16, 32], strides = [1, 1]} : vector<16x128xf32> to vector<16x32xf32>
    %449 = arith.mulf %446, %427 : vector<16x32xf32>
    %450 = arith.mulf %445, %447 : vector<16x32xf32>
    %451 = arith.addf %449, %450 : vector<16x32xf32>
    %452 = math.tanh %451 : vector<16x32xf32>
    %453 = arith.mulf %448, %452 : vector<16x32xf32>
    %c8_i32_144 = arith.constant 8 : i32
    %c0_145 = arith.constant 0 : index
    %c0_146 = arith.constant 0 : index
    %454 = vector.load %arg8[%c0_145, %c0_146] : memref<32x128xf32, #tpu.memory_space<vmem>>, vector<32x128xf32>
    %cst_147 = arith.constant dense<0.000000e+00> : vector<16x128xf32>
    %455 = tpu.matmul %453, %454, %cst_147 {dimension_numbers = #tpu.dot_dimension_numbers<[1], [0], [0], [1], [0, 0, 1, 1], [], []>} : vector<16x32xf32>, vector<32x128xf32>, vector<16x128xf32> -> vector<16x128xf32>
    %c0_148 = arith.constant 0 : index
    %c0_149 = arith.constant 0 : index
    %456 = vector.load %arg9[%c0_148, %c0_149] : memref<1x128xf32, #tpu.memory_space<vmem>>, vector<1x128xf32>
    %457 = vector.broadcast %456 : vector<1x128xf32> to vector<16x128xf32>
    %458 = arith.addf %455, %457 : vector<16x128xf32>
    %c0_150 = arith.constant 0 : index
    %c0_151 = arith.constant 0 : index
    %459 = vector.load %arg10[%c0_150, %c0_151] : memref<16x128xf32, #tpu.memory_space<vmem>>, vector<16x128xf32>
    tpu.vector_store %arg10[%c0_150, %c0_151], %458 {strides = array<i32>} : memref<16x128xf32, #tpu.memory_space<vmem>>, vector<16x128xf32>,
    return
  }
  func.func @transform_0(%arg0: i32) -> (i32, i32, i32) {
    %c0_i32 = arith.constant 0 : i32
    %c0_i32_0 = arith.constant 0 : i32
    %c0_i32_1 = arith.constant 0 : i32
    return %c0_i32, %arg0, %c0_i32_0 : i32, i32, i32
  }
  func.func @transform_1(%arg0: i32) -> (i32, i32) {
    %c0_i32 = arith.constant 0 : i32
    %c0_i32_0 = arith.constant 0 : i32
    %c0_i32_1 = arith.constant 0 : i32
    return %c0_i32, %c0_i32_0 : i32, i32
  }
  func.func @transform_2(%arg0: i32) -> (i32, i32) {
    %c0_i32 = arith.constant 0 : i32
    %c0_i32_0 = arith.constant 0 : i32
    %c0_i32_1 = arith.constant 0 : i32
    return %c0_i32, %c0_i32_0 : i32, i32
  }
  func.func @transform_3(%arg0: i32) -> (i32, i32) {
    %c0_i32 = arith.constant 0 : i32
    %c0_i32_0 = arith.constant 0 : i32
    %c0_i32_1 = arith.constant 0 : i32
    return %c0_i32, %c0_i32_0 : i32, i32
  }
  func.func @transform_4(%arg0: i32) -> (i32, i32) {
    %c0_i32 = arith.constant 0 : i32
    %c0_i32_0 = arith.constant 0 : i32
    %c0_i32_1 = arith.constant 0 : i32
    return %c0_i32, %c0_i32_0 : i32, i32
  }
  func.func @transform_5(%arg0: i32) -> (i32, i32) {
    %c0_i32 = arith.constant 0 : i32
    %c0_i32_0 = arith.constant 0 : i32
    %c0_i32_1 = arith.constant 0 : i32
    return %c0_i32, %c0_i32_0 : i32, i32
  }
  func.func @transform_6(%arg0: i32) -> (i32, i32) {
    %c0_i32 = arith.constant 0 : i32
    %c0_i32_0 = arith.constant 0 : i32
    %c0_i32_1 = arith.constant 0 : i32
    return %c0_i32, %c0_i32_0 : i32, i32
  }
  func.func @transform_7(%arg0: i32) -> (i32, i32) {
    %c0_i32 = arith.constant 0 : i32
    %c0_i32_0 = arith.constant 0 : i32
    %c0_i32_1 = arith.constant 0 : i32
    return %c0_i32, %c0_i32_0 : i32, i32
  }
  func.func @transform_8(%arg0: i32) -> (i32, i32) {
    %c0_i32 = arith.constant 0 : i32
    %c0_i32_0 = arith.constant 0 : i32
    %c0_i32_1 = arith.constant 0 : i32
    return %c0_i32, %c0_i32_0 : i32, i32
  }
  func.func @transform_9(%arg0: i32) -> (i32, i32) {
    %c0_i32 = arith.constant 0 : i32
    %c0_i32_0 = arith.constant 0 : i32
    return %arg0, %c0_i32 : i32, i32
  }
}

</mosaic_0001>

<bundles_post_ra>
// kernel: lstm_forward.1
= control target key start
LH: loop header
LB: loop body
LE: loop exit
PB: predicated region body
PF: predicated region fallthrough
CT: control target
= control target key end

     0   :  { %vm106_vm0 = vcmask 130048   ;;  %v3011_v4 = vmov 0   ;;  %v33_v23 = vlaneseq  ;;  %s3012_s18 = smov 64   ;;  %s3013_s19 = smov 32   ;;  %vm232_vm12 = vcmask 261120   ;;  %s3714_s1 = inlined_call_operand.vmem [shape: bf16[16,128], index: 1, kind: input, shape index: {}]   ;;  %s3715_s2 = inlined_call_operand.vmem [shape: bf16[32,128], index: 2, kind: input, shape index: {}]   ;;  %s3716_s0 = inlined_call_operand.vmem [shape: bf16[8,16,16], index: 0, kind: input, shape index: {}]   ;;  %s3717_s3 = inlined_call_operand.vmem [shape: f32[1,128], index: 3, kind: input, shape index: {}]   ;;  %s3718_s4 = inlined_call_operand.vmem [shape: bf16[32,128], index: 4, kind: input, shape index: {}]   ;;  %s3719_s6 = inlined_call_operand.vmem [shape: f32[1,128], index: 6, kind: input, shape index: {}]   ;;  %s3720_s5 = inlined_call_operand.vmem [shape: bf16[32,128], index: 5, kind: input, shape index: {}]   ;;  %s3721_s7 = inlined_call_operand.vmem [shape: f32[32,128], index: 7, kind: input, shape index: {}]   ;;  %s3722_s8 = inlined_call_operand.vmem [shape: f32[1,128], index: 8, kind: input, shape index: {}]   ;;  %s3723_s9 = inlined_call_operand.vmem [shape: f32[16,128], index: 9, kind: output, shape index: {}]  }
   0x1   :  { %v2560_v0 = vld [vmem:[%s3714_s1] sm:$0xff]  ;;  %v2562_v1 = vld [vmem:[%s3715_s2 + $0x8] sm:$0xff] }
   0x2   :  { %v2552_v2 = vld [vmem:[%s3716_s0] sm:$0xff]  ;;  %138 = vmatpush.bf16.msra.mxu0 %v2560_v0  ;;  %242 = vmatpush.bf16.msra.mxu1 %v2562_v1  ;;  %v34_v24 = vand.u32 127, %v33_v23  ;;  %v2553_v62 = vld [vmem:[%s3716_s0 + $0x8] sm:$0xff] }
   0x3   :  { %v2561_v3 = vld [vmem:[%s3715_s2] sm:$0xff]  ;;  %v2564_v63 = vld [vmem:[%s3715_s2 + $0x8] sm:$0xff] }
   0x4   :  { %v3081_v7 = vld [vmem:[%s3717_s3] ss:$0 sm:$0xff]  ;;  %vm35_vm1 = vcmp.ge.s32.totalorder %v34_v24, 64  ;;  %vm36_vm2 = vcmp.lt.s32.totalorder %v34_v24, 96  ;;  %376 = vmatpush.bf16.msra.mxu2 %v2564_v63 }
   0x5   :  { %2376 = vmatmul.msk.bf16.vlgmr.msra.gmra.mxu0 %vm106_vm0, %v2552_v2  ;;  %vm3085_vm4 = vmand %vm35_vm1, %vm36_vm2  ;;  %v2563_v0 = vld [vmem:[%s3715_s2] sm:$0xff] }
   0x6   :  { %243 = vmatpush.bf16.msra.mxu1 %v2561_v3 }
   0x8   :  { %377 = vmatpush.bf16.msra.mxu2 %v2563_v0 }
   0x9   :  { %244 = vmatmul.bf16.vlgmr.msra.gmra.mxu1 %v3011_v4 }
  0x15   :  { %2377 = vmatmul.msk.bf16.gmra.mxu0 %vm106_vm0, %v2553_v62 }
  0x82   :  { %v140_v5 = vpop.f32.mrf.mxu0 }
  0x83   :  { %v141_v9 = vadd.f32 %v3081_v7, %v140_v5 }
  0x86   :  { %v245_v6 = vpop.f32.mrf.mxu1 }
  0x8a   :  { %v142_v8 = vpop.f32.mrf.mxu0 }
  0x8b   :  { %v143_v10 = vadd.f32 %v3081_v7, %v142_v8 }
  0x8d   :  { %v2592_v11 = vpack.c.bf16 %v143_v10, %v141_v9 }
  0x8e   :  { %v247_v12 = vpop.f32.mrf.mxu1 }
  0x8f   :  { %v2631_v13 = vunpack.c.l.bf16 %v2592_v11  ;;  %v2632_v14 = vunpack.c.h.bf16 %v2592_v11 }
  0x91   :  { %v250_v15 = vadd.f32 %v2631_v13, %v245_v6  ;;  %v251_v16 = vadd.f32 %v2632_v14, %v247_v12 }
  0x92   :  { %v145_v13 = vpop.f32.mrf.mxu0 }
  0x93   :  { %v2392_v17 = vmul.f32 -1.442695, %v250_v15  ;;  %v2393_v18 = vmul.f32 -1.442695, %v251_v16 }
  0x95   :  { %2753 = vpow2.f32 %v2392_v17 }
  0x96   :  { %2755 = vpow2.f32 %v2393_v18 }
  0x9a   :  { %v147_v14 = vpop.f32.mrf.mxu0 }
  0x9b   :  { %v2754_v19 = vpop.eup %2753 }
  0x9c   :  { %v2756_v20 = vpop.eup %2755  ;;  %v260_v21 = vadd.f32 1.0, %v2754_v19 }
  0x9d   :  { %v261_v22 = vadd.f32 1.0, %v2756_v20 }
  0x9e   :  { %2757 = vrcp.f32 %v260_v21  ;;  %v273_v30 = vand.u32 2147483648, %v260_v21  ;;  %v271_v33 = vand.u32 2147483647, %v260_v21  ;;  %vm267_vm5 = vweird.f32 %v260_v21 }
  0x9f   :  { %2759 = vrcp.f32 %v261_v22  ;;  %v288_v42 = vand.u32 2147483648, %v261_v22  ;;  %vm282_vm9 = vweird.f32 %v261_v22  ;;  %v286_v44 = vand.u32 2147483647, %v261_v22 }
  0xa0   :  { %2761 = vtanh.f32 %v250_v15  ;;  %v274_v37 = vor.u32 1.1754944e-38, %v273_v30  ;;  %vm272_vm7 = vcmp.eq.f32.partialorder %v271_v33, 8.507059e+37  ;;  %v146_v15 = vadd.f32 %v3081_v7, %v145_v13 }
  0xa1   :  { %2763 = vtanh.f32 %v251_v16  ;;  %v289_v46 = vor.u32 1.1754944e-38, %v288_v42  ;;  %vm287_vm11 = vcmp.eq.f32.partialorder %v286_v44, 8.507059e+37  ;;  %v148_v16 = vadd.f32 %v3081_v7, %v147_v14 }
  0xa3   :  { %v2597_v17 = vpack.c.bf16 %v148_v16, %v146_v15 }
  0xa4   :  { %v2758_v25 = vpop.eup %2757 }
  0xa5   :  { %v2760_v26 = vpop.eup %2759  ;;  %v263_v27 = vmul.f32 %v2758_v25, %v260_v21  ;;  %vm268_vm3 = vweird.f32 %v2758_v25  ;;  %v2635_v18 = vunpack.c.l.bf16 %v2597_v17 }
  0xa6   :  { %v278_v28 = vmul.f32 %v2760_v26, %v261_v22  ;;  %vm269_vm6 = vmor %vm267_vm5, %vm268_vm3  ;;  %vm283_vm8 = vweird.f32 %v2760_v26  ;;  %v2762_v40 = vpop.eup %2761  ;;  %v2636_v22 = vunpack.c.h.bf16 %v2597_v17 }
  0xa7   :  { %v264_v29 = vsub.f32 1.0, %v263_v27  ;;  %vm284_vm10 = vmor %vm282_vm9, %vm283_vm8  ;;  %v2764_v48 = vpop.eup %2763 }
  0xa8   :  { %v279_v31 = vsub.f32 1.0, %v278_v28 }
  0xa9   :  { %v265_v32 = vmul.f32 %v2758_v25, %v264_v29 }
  0xaa   :  { %v280_v34 = vmul.f32 %v2760_v26, %v279_v31 }
  0xab   :  { %v266_v36 = vadd.f32 %v2758_v25, %v265_v32 }
  0xac   :  { %v281_v39 = vadd.f32 %v2760_v26, %v280_v34 }
  0xad   :  { %v270_v38 = vsel %vm269_vm6, %v2758_v25, %v266_v36 }
  0xae   :  { %v275_v41 = vsel %vm272_vm7, %v274_v37, %v270_v38  ;;  %v285_v45 = vsel %vm284_vm10, %v2760_v26, %v281_v39 }
  0xaf   :  { %v292_v43 = vsel %vm3085_vm4, %v2762_v40, %v275_v41  ;;  %v290_v47 = vsel %vm287_vm11, %v289_v46, %v285_v45 }
  0xb0   :  { %298 = vrot.lane.b32.xlu0 %v292_v43, %s3012_s18  ;;  %v293_v49 = vsel %vm3085_vm4, %v2764_v48, %v290_v47  ;;  %v294_v54 = vmul.f32 0.0, %v292_v43 }
  0xb1   :  { %v295_v57 = vmul.f32 0.0, %v293_v49 }
  0xb8   :  { %300 = vrot.lane.b32.xlu0 %v293_v49, %s3012_s18 }
 0x122   :  { %v299_v50 = vpop.permute.xlu0 %298 }
 0x123   :  { %v304_v51 = vmul.f32 %v299_v50, %v292_v43 }
 0x125   :  { %308 = vrot.lane.b32.xlu1 %v304_v51, %s3013_s19 }
 0x12a   :  { %v301_v52 = vpop.permute.xlu0 %300 }
 0x12b   :  { %v305_v53 = vmul.f32 %v301_v52, %v293_v49 }
 0x12d   :  { %310 = vrot.lane.b32.xlu1 %v305_v53, %s3013_s19 }
 0x197   :  { %v309_v55 = vpop.permute.xlu1 %308 }
 0x198   :  { %v3097_v56 = vadd.f32 %v309_v55, %v294_v54 }
 0x19a   :  { %2765 = vtanh.f32 %v3097_v56 }
 0x19f   :  { %v311_v58 = vpop.permute.xlu1 %310 }
 0x1a0   :  { %v2766_v59 = vpop.eup %2765  ;;  %v3100_v60 = vadd.f32 %v311_v58, %v295_v57 }
 0x1a1   :  { %320 = vrot.lane.b32.xlu2 %v2766_v59, %s3012_s18 }
 0x1a2   :  { %2767 = vtanh.f32 %v3100_v60 }
 0x1a8   :  { %v2768_v61 = vpop.eup %2767 }
 0x1a9   :  { %322 = vrot.lane.b32.xlu2 %v2768_v61, %s3012_s18 }
 0x1fb   :  { %v321_v1 = vpop.permute.xlu2 %320 }
 0x1fc   :  { %v326_v2 = vmul.f32 %v321_v1, %v292_v43 }
 0x1fe   :  { %v3115_v5 = vpack.c.bf16 %v326_v2, %v326_v2 }
 0x200   :  { %v350_v9 = vunpack.c.l.b16 %v3115_v5 }
 0x203   :  { %v323_v3 = vpop.permute.xlu2 %322 }
 0x204   :  { %v327_v6 = vmul.f32 %v323_v3, %v293_v49 }
 0x206   :  { %v3117_v8 = vpack.c.bf16 %v327_v6, %v327_v6 }
 0x208   :  { %v351_v10 = vunpack.c.l.b16 %v3117_v8 }
 0x20a   :  { %v352_v11 = vpack.c.b16 %v351_v10, %v350_v9  ;;  %v2554_v9 = vld [vmem:[%s3716_s0 + $0x10] sm:$0xff] }
 0x20b   :  { %2378 = vmatmul.msk.bf16.gmra.mxu0 %vm106_vm0, %v2554_v9 }
 0x20c   :  { %353 = vrot.lane.b32.xlu0 %v352_v11, %s3013_s19 }
 0x27e   :  { %v354_v12 = vpop.permute.xlu0 %353 }
 0x27f   :  { %2402 = vmatmul.msk.bf16.vlgmr.msra.gmra.mxu2 %vm232_vm12, %v354_v12 }
 0x302   :  { %v379_v19 = vpop.f32.mrf.mxu2 }
 0x303   :  { %v384_v20 = vadd.f32 %v2635_v18, %v379_v19 }
 0x305   :  { %v2403_v21 = vmul.f32 -1.442695, %v384_v20 }
 0x307   :  { %2769 = vpow2.f32 %v2403_v21 }
 0x30a   :  { %v381_v23 = vpop.f32.mrf.mxu2 }
 0x30b   :  { %v385_v24 = vadd.f32 %v2636_v22, %v381_v23 }
 0x30d   :  { %v2770_v25 = vpop.eup %2769  ;;  %v2404_v26 = vmul.f32 -1.442695, %v385_v24 }
 0x30e   :  { %v394_v27 = vadd.f32 1.0, %v2770_v25 }
 0x30f   :  { %2771 = vpow2.f32 %v2404_v26 }
 0x310   :  { %2773 = vrcp.f32 %v394_v27  ;;  %v407_v33 = vand.u32 2147483648, %v394_v27  ;;  %v405_v36 = vand.u32 2147483647, %v394_v27  ;;  %vm401_vm14 = vweird.f32 %v394_v27 }
 0x312   :  { %v408_v39 = vor.u32 1.1754944e-38, %v407_v33  ;;  %vm406_vm1 = vcmp.eq.f32.partialorder %v405_v36, 8.507059e+37 }
 0x315   :  { %v2772_v28 = vpop.eup %2771 }
 0x316   :  { %v2774_v29 = vpop.eup %2773  ;;  %v395_v30 = vadd.f32 1.0, %v2772_v28 }
 0x317   :  { %v397_v31 = vmul.f32 %v2774_v29, %v394_v27  ;;  %vm402_vm13 = vweird.f32 %v2774_v29 }
 0x318   :  { %2775 = vrcp.f32 %v395_v30  ;;  %vm403_vm15 = vmor %vm401_vm14, %vm402_vm13  ;;  %v422_v46 = vand.u32 2147483648, %v395_v30  ;;  %v420_v48 = vand.u32 2147483647, %v395_v30  ;;  %vm416_vm3 = vweird.f32 %v395_v30 }
 0x319   :  { %v398_v32 = vsub.f32 1.0, %v397_v31  ;;  %2777 = vtanh.f32 %v384_v20  ;;  %v150_v20 = vpop.f32.mrf.mxu0 }
 0x31a   :  { %2779 = vtanh.f32 %v385_v24  ;;  %v423_v50 = vor.u32 1.1754944e-38, %v422_v46  ;;  %vm421_vm6 = vcmp.eq.f32.partialorder %v420_v48, 8.507059e+37  ;;  %v151_v22 = vadd.f32 %v3081_v7, %v150_v20 }
 0x31b   :  { %v399_v34 = vmul.f32 %v2774_v29, %v398_v32 }
 0x31d   :  { %v400_v37 = vadd.f32 %v2774_v29, %v399_v34 }
 0x31e   :  { %v2776_v38 = vpop.eup %2775 }
 0x31f   :  { %v404_v40 = vsel %vm403_vm15, %v2774_v29, %v400_v37  ;;  %v412_v41 = vmul.f32 %v2776_v38, %v395_v30  ;;  %v2778_v42 = vpop.eup %2777  ;;  %vm417_vm2 = vweird.f32 %v2776_v38 }
 0x320   :  { %v409_v43 = vsel %vm406_vm1, %v408_v39, %v404_v40  ;;  %vm418_vm5 = vmor %vm416_vm3, %vm417_vm2  ;;  %v2780_v52 = vpop.eup %2779 }
 0x321   :  { %v426_v44 = vsel %vm3085_vm4, %v2778_v42, %v409_v43  ;;  %v413_v45 = vsub.f32 1.0, %v412_v41  ;;  %v152_v21 = vpop.f32.mrf.mxu0 }
 0x322   :  { %432 = vrot.lane.b32.xlu1 %v426_v44, %s3012_s18  ;;  %v428_v1 = vmul.f32 %v426_v44, %v3097_v56  ;;  %v2565_v56 = vld [vmem:[%s3715_s2] sm:$0xff]  ;;  %v153_v23 = vadd.f32 %v3081_v7, %v152_v21 }
 0x323   :  { %v414_v47 = vmul.f32 %v2776_v38, %v413_v45 }
 0x324   :  { %v2602_v24 = vpack.c.bf16 %v153_v23, %v151_v22 }
 0x325   :  { %v415_v49 = vadd.f32 %v2776_v38, %v414_v47 }
 0x326   :  { %v2639_v25 = vunpack.c.l.bf16 %v2602_v24  ;;  %v2640_v29 = vunpack.c.h.bf16 %v2602_v24 }
 0x327   :  { %v419_v51 = vsel %vm418_vm5, %v2776_v38, %v415_v49 }
 0x328   :  { %v424_v53 = vsel %vm421_vm6, %v423_v50, %v419_v51 }
 0x329   :  { %v427_v54 = vsel %vm3085_vm4, %v2780_v52, %v424_v53 }
 0x32a   :  { %434 = vrot.lane.b32.xlu2 %v427_v54, %s3012_s18  ;;  %v429_v61 = vmul.f32 %v427_v54, %v3100_v60  ;;  %v2566_v60 = vld [vmem:[%s3715_s2 + $0x8] sm:$0xff] }
 0x32b   :  { %510 = vmatpush.bf16.msrb.mxu2 %v2566_v60 }
 0x32f   :  { %511 = vmatpush.bf16.msrb.mxu2 %v2565_v56 }
 0x384   :  { %v435_v55 = vpop.permute.xlu2 %434 }
 0x385   :  { %v439_v57 = vmul.f32 %v435_v55, %v427_v54 }
 0x387   :  { %444 = vrot.lane.b32.xlu1 %v439_v57, %s3013_s19 }
 0x394   :  { %v433_v58 = vpop.permute.xlu1 %432 }
 0x395   :  { %v438_v59 = vmul.f32 %v433_v58, %v426_v44 }
 0x397   :  { %442 = vrot.lane.b32.xlu0 %v438_v59, %s3013_s19 }
 0x3f9   :  { %v445_v62 = vpop.permute.xlu1 %444 }
 0x3fa   :  { %v3134_v63 = vadd.f32 %v445_v62, %v429_v61 }
 0x3fc   :  { %2781 = vtanh.f32 %v3134_v63 }
 0x402   :  { %v2782_v0 = vpop.eup %2781 }
 0x403   :  { %456 = vrot.lane.b32.xlu0 %v2782_v0, %s3012_s18 }
 0x409   :  { %v443_v2 = vpop.permute.xlu0 %442 }
 0x40a   :  { %v3139_v3 = vadd.f32 %v443_v2, %v428_v1 }
 0x40c   :  { %2783 = vtanh.f32 %v3139_v3 }
 0x412   :  { %v2784_v6 = vpop.eup %2783 }
 0x413   :  { %454 = vrot.lane.b32.xlu2 %v2784_v6, %s3012_s18 }
 0x46d   :  { %v455_v10 = vpop.permute.xlu2 %454 }
 0x46e   :  { %v460_v11 = vmul.f32 %v455_v10, %v426_v44 }
 0x470   :  { %v3153_v13 = vpack.c.bf16 %v460_v11, %v460_v11 }
 0x472   :  { %v484_v16 = vunpack.c.l.b16 %v3153_v13 }
 0x475   :  { %v457_v12 = vpop.permute.xlu0 %456 }
 0x476   :  { %v461_v14 = vmul.f32 %v457_v12, %v427_v54 }
 0x478   :  { %v3155_v15 = vpack.c.bf16 %v461_v14, %v461_v14 }
 0x47a   :  { %v485_v17 = vunpack.c.l.b16 %v3155_v15 }
 0x47c   :  { %v486_v18 = vpack.c.b16 %v485_v17, %v484_v16 }
 0x47e   :  { %487 = vrot.lane.b32.xlu1 %v486_v18, %s3013_s19  ;;  %v2555_v18 = vld [vmem:[%s3716_s0 + $0x18] sm:$0xff] }
 0x47f   :  { %2379 = vmatmul.msk.bf16.gmra.mxu0 %vm106_vm0, %v2555_v18 }
 0x4f0   :  { %v488_v19 = vpop.permute.xlu1 %487 }
 0x4f1   :  { %2413 = vmatmul.msk.bf16.vlgmr.msrb.gmra.mxu2 %vm232_vm12, %v488_v19 }
 0x574   :  { %v513_v26 = vpop.f32.mrf.mxu2 }
 0x575   :  { %v518_v27 = vadd.f32 %v2639_v25, %v513_v26 }
 0x577   :  { %v2414_v28 = vmul.f32 -1.442695, %v518_v27 }
 0x579   :  { %2785 = vpow2.f32 %v2414_v28 }
 0x57c   :  { %v515_v30 = vpop.f32.mrf.mxu2 }
 0x57d   :  { %v519_v31 = vadd.f32 %v2640_v29, %v515_v30  ;;  %v155_v29 = vpop.f32.mrf.mxu0 }
 0x57f   :  { %v2786_v32 = vpop.eup %2785  ;;  %v2415_v33 = vmul.f32 -1.442695, %v519_v31 }
 0x580   :  { %v528_v34 = vadd.f32 1.0, %v2786_v32 }
 0x581   :  { %2787 = vpow2.f32 %v2415_v33 }
 0x582   :  { %2789 = vrcp.f32 %v528_v34  ;;  %v541_v41 = vand.u32 2147483648, %v528_v34  ;;  %v539_v43 = vand.u32 2147483647, %v528_v34  ;;  %vm535_vm8 = vweird.f32 %v528_v34 }
 0x584   :  { %v542_v46 = vor.u32 1.1754944e-38, %v541_v41  ;;  %vm540_vm10 = vcmp.eq.f32.partialorder %v539_v43, 8.507059e+37 }
 0x585   :  { %v157_v30 = vpop.f32.mrf.mxu0 }
 0x586   :  { %v158_v32 = vadd.f32 %v3081_v7, %v157_v30 }
 0x587   :  { %v2788_v36 = vpop.eup %2787 }
 0x588   :  { %v2790_v37 = vpop.eup %2789  ;;  %v529_v38 = vadd.f32 1.0, %v2788_v36 }
 0x589   :  { %v531_v39 = vmul.f32 %v2790_v37, %v528_v34  ;;  %vm536_vm7 = vweird.f32 %v2790_v37 }
 0x58a   :  { %2791 = vrcp.f32 %v529_v38  ;;  %vm537_vm9 = vmor %vm535_vm8, %vm536_vm7  ;;  %v556_v53 = vand.u32 2147483648, %v529_v38  ;;  %v554_v55 = vand.u32 2147483647, %v529_v38  ;;  %vm550_vm13 = vweird.f32 %v529_v38 }
 0x58b   :  { %v532_v40 = vsub.f32 1.0, %v531_v39  ;;  %2793 = vtanh.f32 %v518_v27 }
 0x58c   :  { %2795 = vtanh.f32 %v519_v31  ;;  %v557_v58 = vor.u32 1.1754944e-38, %v556_v53  ;;  %vm555_vm15 = vcmp.eq.f32.partialorder %v554_v55, 8.507059e+37  ;;  %v156_v31 = vadd.f32 %v3081_v7, %v155_v29  ;;  %v2556_v29 = vld [vmem:[%s3716_s0 + $0x20] sm:$0xff] }
 0x58d   :  { %v533_v42 = vmul.f32 %v2790_v37, %v532_v40  ;;  %2380 = vmatmul.msk.bf16.gmra.mxu0 %vm106_vm0, %v2556_v29 }
 0x58e   :  { %v2607_v33 = vpack.c.bf16 %v158_v32, %v156_v31 }
 0x58f   :  { %v534_v44 = vadd.f32 %v2790_v37, %v533_v42 }
 0x590   :  { %v2792_v45 = vpop.eup %2791  ;;  %v2643_v34 = vunpack.c.l.bf16 %v2607_v33  ;;  %v2644_v39 = vunpack.c.h.bf16 %v2607_v33 }
 0x591   :  { %v538_v47 = vsel %vm537_vm9, %v2790_v37, %v534_v44  ;;  %v546_v48 = vmul.f32 %v2792_v45, %v529_v38  ;;  %v2794_v49 = vpop.eup %2793  ;;  %vm551_vm11 = vweird.f32 %v2792_v45 }
 0x592   :  { %v543_v50 = vsel %vm540_vm10, %v542_v46, %v538_v47  ;;  %vm552_vm14 = vmor %vm550_vm13, %vm551_vm11  ;;  %v2796_v61 = vpop.eup %2795 }
 0x593   :  { %v560_v51 = vsel %vm3085_vm4, %v2794_v49, %v543_v50  ;;  %v547_v52 = vsub.f32 1.0, %v546_v48 }
 0x594   :  { %566 = vrot.lane.b32.xlu2 %v560_v51, %s3012_s18  ;;  %v562_v9 = vmul.f32 %v560_v51, %v3139_v3  ;;  %v2568_v3 = vld [vmem:[%s3715_s2 + $0x8] sm:$0xff] }
 0x595   :  { %v548_v54 = vmul.f32 %v2792_v45, %v547_v52  ;;  %644 = vmatpush.bf16.msrb.mxu1 %v2568_v3 }
 0x597   :  { %v549_v57 = vadd.f32 %v2792_v45, %v548_v54 }
 0x599   :  { %v553_v59 = vsel %vm552_vm14, %v2792_v45, %v549_v57 }
 0x59a   :  { %v558_v62 = vsel %vm555_vm15, %v557_v58, %v553_v59 }
 0x59b   :  { %v561_v0 = vsel %vm3085_vm4, %v2796_v61, %v558_v62 }
 0x59c   :  { %568 = vrot.lane.b32.xlu0 %v561_v0, %s3012_s18  ;;  %v563_v11 = vmul.f32 %v561_v0, %v3134_v63  ;;  %v2567_v63 = vld [vmem:[%s3715_s2] sm:$0xff] }
 0x59d   :  { %645 = vmatpush.bf16.msrb.mxu1 %v2567_v63 }
 0x5ee   :  { %v567_v1 = vpop.permute.xlu2 %566 }
 0x5ef   :  { %v572_v2 = vmul.f32 %v567_v1, %v560_v51 }
 0x5f1   :  { %576 = vrot.lane.b32.xlu1 %v572_v2, %s3013_s19 }
 0x60e   :  { %v569_v6 = vpop.permute.xlu0 %568 }
 0x60f   :  { %v573_v60 = vmul.f32 %v569_v6, %v561_v0 }
 0x611   :  { %578 = vrot.lane.b32.xlu2 %v573_v60, %s3013_s19 }
 0x663   :  { %v577_v56 = vpop.permute.xlu1 %576 }
 0x664   :  { %v3172_v10 = vadd.f32 %v577_v56, %v562_v9 }
 0x666   :  { %2797 = vtanh.f32 %v3172_v10 }
 0x66b   :  { %v579_v12 = vpop.permute.xlu2 %578 }
 0x66c   :  { %v2798_v14 = vpop.eup %2797  ;;  %v3176_v16 = vadd.f32 %v579_v12, %v563_v11 }
 0x66d   :  { %588 = vrot.lane.b32.xlu0 %v2798_v14, %s3012_s18 }
 0x66e   :  { %2799 = vtanh.f32 %v3176_v16 }
 0x674   :  { %v2800_v17 = vpop.eup %2799 }
 0x675   :  { %590 = vrot.lane.b32.xlu1 %v2800_v17, %s3012_s18 }
 0x6df   :  { %v589_v19 = vpop.permute.xlu0 %588 }
 0x6e0   :  { %v594_v20 = vmul.f32 %v589_v19, %v560_v51 }
 0x6e2   :  { %v3191_v22 = vpack.c.bf16 %v594_v20, %v594_v20 }
 0x6e4   :  { %v618_v25 = vunpack.c.l.b16 %v3191_v22 }
 0x6e7   :  { %v591_v21 = vpop.permute.xlu1 %590 }
 0x6e8   :  { %v595_v23 = vmul.f32 %v591_v21, %v561_v0 }
 0x6ea   :  { %v3193_v24 = vpack.c.bf16 %v595_v23, %v595_v23 }
 0x6ec   :  { %v619_v26 = vunpack.c.l.b16 %v3193_v24 }
 0x6ee   :  { %v620_v27 = vpack.c.b16 %v619_v26, %v618_v25 }
 0x6f0   :  { %621 = vrot.lane.b32.xlu2 %v620_v27, %s3013_s19 }
 0x74a   :  { %v622_v28 = vpop.permute.xlu2 %621 }
 0x74b   :  { %2424 = vmatmul.msk.bf16.vlgmr.msrb.gmra.mxu1 %vm232_vm12, %v622_v28 }
 0x7c8   :  { %v647_v36 = vpop.f32.mrf.mxu1 }
 0x7c9   :  { %v652_v37 = vadd.f32 %v2643_v34, %v647_v36 }
 0x7cb   :  { %v2425_v38 = vmul.f32 -1.442695, %v652_v37 }
 0x7cd   :  { %2801 = vpow2.f32 %v2425_v38 }
 0x7d0   :  { %v649_v40 = vpop.f32.mrf.mxu1 }
 0x7d1   :  { %v653_v41 = vadd.f32 %v2644_v39, %v649_v40 }
 0x7d3   :  { %v2802_v42 = vpop.eup %2801  ;;  %v2426_v43 = vmul.f32 -1.442695, %v653_v41 }
 0x7d4   :  { %v662_v44 = vadd.f32 1.0, %v2802_v42 }
 0x7d5   :  { %2803 = vpow2.f32 %v2426_v43 }
 0x7d6   :  { %2805 = vrcp.f32 %v662_v44  ;;  %v675_v50 = vand.u32 2147483648, %v662_v44  ;;  %v673_v52 = vand.u32 2147483647, %v662_v44  ;;  %vm669_vm2 = vweird.f32 %v662_v44 }
 0x7d8   :  { %v676_v55 = vor.u32 1.1754944e-38, %v675_v50  ;;  %vm674_vm5 = vcmp.eq.f32.partialorder %v673_v52, 8.507059e+37 }
 0x7db   :  { %v2804_v45 = vpop.eup %2803 }
 0x7dc   :  { %v2806_v46 = vpop.eup %2805  ;;  %v663_v47 = vadd.f32 1.0, %v2804_v45 }
 0x7dd   :  { %v665_v48 = vmul.f32 %v2806_v46, %v662_v44  ;;  %vm670_vm1 = vweird.f32 %v2806_v46 }
 0x7de   :  { %2807 = vrcp.f32 %v663_v47  ;;  %vm671_vm3 = vmor %vm669_vm2, %vm670_vm1  ;;  %v690_v1 = vand.u32 2147483648, %v663_v47  ;;  %v688_v6 = vand.u32 2147483647, %v663_v47  ;;  %vm684_vm7 = vweird.f32 %v663_v47 }
 0x7df   :  { %v666_v49 = vsub.f32 1.0, %v665_v48  ;;  %2809 = vtanh.f32 %v652_v37 }
 0x7e0   :  { %2811 = vtanh.f32 %v653_v41  ;;  %v691_v9 = vor.u32 1.1754944e-38, %v690_v1  ;;  %vm689_vm9 = vcmp.eq.f32.partialorder %v688_v6, 8.507059e+37  ;;  %v160_v41 = vpop.f32.mrf.mxu0 }
 0x7e1   :  { %v667_v51 = vmul.f32 %v2806_v46, %v666_v49  ;;  %v161_v43 = vadd.f32 %v3081_v7, %v160_v41 }
 0x7e3   :  { %v668_v53 = vadd.f32 %v2806_v46, %v667_v51 }
 0x7e4   :  { %v2808_v54 = vpop.eup %2807 }
 0x7e5   :  { %v672_v57 = vsel %vm671_vm3, %v2806_v46, %v668_v53  ;;  %v680_v58 = vmul.f32 %v2808_v54, %v663_v47  ;;  %v2810_v59 = vpop.eup %2809  ;;  %vm685_vm6 = vweird.f32 %v2808_v54 }
 0x7e6   :  { %v677_v61 = vsel %vm674_vm5, %v676_v55, %v672_v57  ;;  %vm686_vm8 = vmor %vm684_vm7, %vm685_vm6  ;;  %v2812_v11 = vpop.eup %2811 }
 0x7e7   :  { %v694_v62 = vsel %vm3085_vm4, %v2810_v59, %v677_v61  ;;  %v681_v0 = vsub.f32 1.0, %v680_v58 }
 0x7e8   :  { %700 = vrot.lane.b32.xlu0 %v694_v62, %s3012_s18  ;;  %v696_v19 = vmul.f32 %v694_v62, %v3172_v10  ;;  %v2570_v10 = vld [vmem:[%s3715_s2 + $0x8] sm:$0xff]  ;;  %v162_v42 = vpop.f32.mrf.mxu0 }
 0x7e9   :  { %v682_v2 = vmul.f32 %v2808_v54, %v681_v0  ;;  %778 = vmatpush.bf16.msra.mxu2 %v2570_v10  ;;  %v163_v44 = vadd.f32 %v3081_v7, %v162_v42 }
 0x7eb   :  { %v683_v60 = vadd.f32 %v2808_v54, %v682_v2  ;;  %v2612_v45 = vpack.c.bf16 %v163_v44, %v161_v43  ;;  %v2571_v43 = vld [vmem:[%s3715_s2] sm:$0xff]  ;;  %v2558_v44 = vld [vmem:[%s3716_s0 + $0x30] sm:$0xff] }
 0x7ed   :  { %v687_v56 = vsel %vm686_vm8, %v2808_v54, %v683_v60  ;;  %v2647_v46 = vunpack.c.l.bf16 %v2612_v45  ;;  %v2648_v50 = vunpack.c.h.bf16 %v2612_v45 }
 0x7ee   :  { %v692_v12 = vsel %vm689_vm9, %v691_v9, %v687_v56 }
 0x7ef   :  { %v695_v14 = vsel %vm3085_vm4, %v2812_v11, %v692_v12 }
 0x7f0   :  { %702 = vrot.lane.b32.xlu1 %v695_v14, %s3012_s18  ;;  %v697_v25 = vmul.f32 %v695_v14, %v3176_v16  ;;  %v2569_v16 = vld [vmem:[%s3715_s2] sm:$0xff] }
 0x7f1   :  { %779 = vmatpush.bf16.msra.mxu2 %v2569_v16 }
 0x85a   :  { %v701_v17 = vpop.permute.xlu0 %700 }
 0x85b   :  { %v706_v3 = vmul.f32 %v701_v17, %v694_v62 }
 0x85d   :  { %710 = vrot.lane.b32.xlu2 %v706_v3, %s3013_s19 }
 0x862   :  { %v703_v18 = vpop.permute.xlu1 %702 }
 0x863   :  { %v707_v63 = vmul.f32 %v703_v18, %v695_v14 }
 0x865   :  { %712 = vrot.lane.b32.xlu0 %v707_v63, %s3013_s19 }
 0x8b7   :  { %v711_v20 = vpop.permute.xlu2 %710 }
 0x8b8   :  { %v3210_v21 = vadd.f32 %v711_v20, %v696_v19 }
 0x8ba   :  { %2813 = vtanh.f32 %v3210_v21 }
 0x8c0   :  { %v2814_v23 = vpop.eup %2813 }
 0x8c1   :  { %722 = vrot.lane.b32.xlu1 %v2814_v23, %s3012_s18 }
 0x8d7   :  { %v713_v26 = vpop.permute.xlu0 %712 }
 0x8d8   :  { %v3215_v27 = vadd.f32 %v713_v26, %v697_v25 }
 0x8da   :  { %2815 = vtanh.f32 %v3215_v27 }
 0x8e0   :  { %v2816_v28 = vpop.eup %2815 }
 0x8e1   :  { %724 = vrot.lane.b32.xlu2 %v2816_v28, %s3012_s18 }
 0x933   :  { %v723_v30 = vpop.permute.xlu1 %722 }
 0x934   :  { %v728_v31 = vmul.f32 %v723_v30, %v694_v62 }
 0x936   :  { %v3229_v33 = vpack.c.bf16 %v728_v31, %v728_v31 }
 0x938   :  { %v752_v37 = vunpack.c.l.b16 %v3229_v33 }
 0x93b   :  { %v725_v32 = vpop.permute.xlu2 %724 }
 0x93c   :  { %v729_v34 = vmul.f32 %v725_v32, %v695_v14 }
 0x93e   :  { %v3231_v36 = vpack.c.bf16 %v729_v34, %v729_v34 }
 0x940   :  { %v753_v38 = vunpack.c.l.b16 %v3231_v36 }
 0x942   :  { %v754_v39 = vpack.c.b16 %v753_v38, %v752_v37 }
 0x944   :  { %755 = vrot.lane.b32.xlu0 %v754_v39, %s3013_s19 }
 0x9b6   :  { %v756_v40 = vpop.permute.xlu0 %755 }
 0x9b7   :  { %2435 = vmatmul.msk.bf16.vlgmr.msra.gmra.mxu2 %vm232_vm12, %v756_v40 }
 0xa3a   :  { %v781_v47 = vpop.f32.mrf.mxu2 }
 0xa3b   :  { %v786_v48 = vadd.f32 %v2647_v46, %v781_v47 }
 0xa3d   :  { %v2436_v49 = vmul.f32 -1.442695, %v786_v48 }
 0xa3f   :  { %2817 = vpow2.f32 %v2436_v49 }
 0xa42   :  { %v783_v51 = vpop.f32.mrf.mxu2 }
 0xa43   :  { %v787_v52 = vadd.f32 %v2648_v50, %v783_v51 }
 0xa45   :  { %v2818_v53 = vpop.eup %2817  ;;  %v2437_v54 = vmul.f32 -1.442695, %v787_v52 }
 0xa46   :  { %v796_v55 = vadd.f32 1.0, %v2818_v53 }
 0xa47   :  { %2819 = vpow2.f32 %v2437_v54  ;;  %v2559_v54 = vld [vmem:[%s3716_s0 + $0x38] sm:$0xff] }
 0xa48   :  { %2821 = vrcp.f32 %v796_v55  ;;  %v809_v0 = vand.u32 2147483648, %v796_v55  ;;  %v807_v2 = vand.u32 2147483647, %v796_v55  ;;  %vm803_vm11 = vweird.f32 %v796_v55 }
 0xa4a   :  { %v810_v9 = vor.u32 1.1754944e-38, %v809_v0  ;;  %vm808_vm14 = vcmp.eq.f32.partialorder %v807_v2, 8.507059e+37 }
 0xa4d   :  { %v2820_v57 = vpop.eup %2819 }
 0xa4e   :  { %v2822_v58 = vpop.eup %2821  ;;  %v797_v59 = vadd.f32 1.0, %v2820_v57 }
 0xa4f   :  { %v799_v61 = vmul.f32 %v2822_v58, %v796_v55  ;;  %vm804_vm10 = vweird.f32 %v2822_v58 }
 0xa50   :  { %2823 = vrcp.f32 %v797_v59  ;;  %vm805_vm13 = vmor %vm803_vm11, %vm804_vm10  ;;  %v824_v18 = vand.u32 2147483648, %v797_v59  ;;  %v822_v19 = vand.u32 2147483647, %v797_v59  ;;  %vm818_vm1 = vweird.f32 %v797_v59 }
 0xa51   :  { %v800_v62 = vsub.f32 1.0, %v799_v61  ;;  %2825 = vtanh.f32 %v786_v48 }
 0xa52   :  { %2827 = vtanh.f32 %v787_v52  ;;  %v825_v23 = vor.u32 1.1754944e-38, %v824_v18  ;;  %vm823_vm3 = vcmp.eq.f32.partialorder %v822_v19, 8.507059e+37 }
 0xa53   :  { %v801_v1 = vmul.f32 %v2822_v58, %v800_v62 }
 0xa55   :  { %v802_v6 = vadd.f32 %v2822_v58, %v801_v1 }
 0xa56   :  { %v2824_v60 = vpop.eup %2823 }
 0xa57   :  { %v806_v56 = vsel %vm805_vm13, %v2822_v58, %v802_v6  ;;  %v814_v11 = vmul.f32 %v2824_v60, %v797_v59  ;;  %v2826_v12 = vpop.eup %2825  ;;  %vm819_vm15 = vweird.f32 %v2824_v60  ;;  %vm338_vm13 = vcmask 257024  }
 0xa58   :  { %v811_v14 = vsel %vm808_vm14, %v810_v9, %v806_v56  ;;  %vm820_vm2 = vmor %vm818_vm1, %vm819_vm15  ;;  %v2828_v26 = vpop.eup %2827 }
 0xa59   :  { %v828_v17 = vsel %vm3085_vm4, %v2826_v12, %v811_v14  ;;  %v815_v3 = vsub.f32 1.0, %v814_v11 }
 0xa5a   :  { %834 = vrot.lane.b32.xlu1 %v828_v17, %s3012_s18  ;;  %v830_v39 = vmul.f32 %v828_v17, %v3210_v21  ;;  %v2557_v21 = vld [vmem:[%s3716_s0 + $0x28] sm:$0xff] }
 0xa5b   :  { %v816_v63 = vmul.f32 %v2824_v60, %v815_v3  ;;  %2381 = vmatmul.msk.bf16.gmra.mxu0 %vm106_vm0, %v2557_v21 }
 0xa5d   :  { %v817_v20 = vadd.f32 %v2824_v60, %v816_v63 }
 0xa5f   :  { %v821_v25 = vsel %vm820_vm2, %v2824_v60, %v817_v20 }
 0xa60   :  { %v826_v28 = vsel %vm823_vm3, %v825_v23, %v821_v25 }
 0xa61   :  { %v829_v10 = vsel %vm3085_vm4, %v2828_v26, %v826_v28 }
 0xa62   :  { %836 = vrot.lane.b32.xlu2 %v829_v10, %s3012_s18  ;;  %v831_v32 = vmul.f32 %v829_v10, %v3215_v27  ;;  %v2572_v27 = vld [vmem:[%s3715_s2 + $0x8] sm:$0xff] }
 0xa63   :  { %912 = vmatpush.bf16.msrb.mxu0 %v2572_v27 }
 0xa67   :  { %913 = vmatpush.bf16.msrb.mxu0 %v2571_v43 }
 0xa6b   :  { %2382 = vmatmul.msk.bf16.gmra.mxu0 %vm106_vm0, %v2558_v44 }
 0xa7b   :  { %2383 = vmatmul.msk.bf16.gmra.mxu0 %vm106_vm0, %v2559_v54 }
 0xabc   :  { %v837_v29 = vpop.permute.xlu2 %836 }
 0xabd   :  { %v841_v16 = vmul.f32 %v837_v29, %v829_v10 }
 0xabf   :  { %846 = vrot.lane.b32.xlu1 %v841_v16, %s3013_s19 }
 0xacc   :  { %v835_v30 = vpop.permute.xlu1 %834 }
 0xacd   :  { %v840_v31 = vmul.f32 %v835_v30, %v828_v17 }
 0xacf   :  { %844 = vrot.lane.b32.xlu0 %v840_v31, %s3013_s19 }
 0xad8   :  { %v165_v55 = vpop.f32.mrf.mxu0 }
 0xad9   :  { %v166_v6 = vadd.f32 %v3081_v7, %v165_v55 }
 0xae0   :  { %v167_v57 = vpop.f32.mrf.mxu0 }
 0xae1   :  { %v168_v60 = vadd.f32 %v3081_v7, %v167_v57 }
 0xae3   :  { %v2617_v56 = vpack.c.bf16 %v168_v60, %v166_v6 }
 0xae5   :  { %v2651_v11 = vunpack.c.l.bf16 %v2617_v56  ;;  %v2652_v3 = vunpack.c.h.bf16 %v2617_v56 }
 0xae8   :  { %v170_v58 = vpop.f32.mrf.mxu0 }
 0xae9   :  { %v171_v61 = vadd.f32 %v3081_v7, %v170_v58 }
 0xaf0   :  { %v172_v62 = vpop.f32.mrf.mxu0 }
 0xaf1   :  { %v173_v0 = vadd.f32 %v3081_v7, %v172_v62 }
 0xaf3   :  { %v3285_v1 = vpack.c.bf16 %v173_v0, %v171_v61 }
 0xaf8   :  { %v3287_v2 = vpop.f32.mrf.mxu0 }
 0xb00   :  { %v3291_v9 = vpop.f32.mrf.mxu0 }
 0xb31   :  { %v847_v34 = vpop.permute.xlu1 %846 }
 0xb32   :  { %v3248_v37 = vadd.f32 %v847_v34, %v831_v32 }
 0xb34   :  { %2829 = vtanh.f32 %v3248_v37 }
 0xb3a   :  { %v2830_v38 = vpop.eup %2829 }
 0xb3b   :  { %858 = vrot.lane.b32.xlu0 %v2830_v38, %s3012_s18 }
 0xb41   :  { %v845_v40 = vpop.permute.xlu0 %844 }
 0xb42   :  { %v3253_v41 = vadd.f32 %v845_v40, %v830_v39 }
 0xb44   :  { %2831 = vtanh.f32 %v3253_v41 }
 0xb4a   :  { %v2832_v42 = vpop.eup %2831 }
 0xb4b   :  { %856 = vrot.lane.b32.xlu2 %v2832_v42, %s3012_s18 }
 0xba5   :  { %v857_v45 = vpop.permute.xlu2 %856 }
 0xba6   :  { %v862_v46 = vmul.f32 %v857_v45, %v828_v17 }
 0xba8   :  { %v3271_v48 = vpack.c.bf16 %v862_v46, %v862_v46 }
 0xbaa   :  { %v886_v51 = vunpack.c.l.b16 %v3271_v48 }
 0xbad   :  { %v859_v47 = vpop.permute.xlu0 %858 }
 0xbae   :  { %v863_v49 = vmul.f32 %v859_v47, %v829_v10 }
 0xbb0   :  { %v3273_v50 = vpack.c.bf16 %v863_v49, %v863_v49 }
 0xbb2   :  { %v887_v52 = vunpack.c.l.b16 %v3273_v50 }
 0xbb4   :  { %v888_v53 = vpack.c.b16 %v887_v52, %v886_v51 }
 0xbb6   :  { %889 = vrot.lane.b32.xlu1 %v888_v53, %s3013_s19 }
 0xc28   :  { %v890_v59 = vpop.permute.xlu1 %889 }
 0xc29   :  { %2446 = vmatmul.msk.bf16.vlgmr.msrb.gmra.mxu0 %vm232_vm12, %v890_v59 }
 0xca6   :  { %v915_v12 = vpop.f32.mrf.mxu0 }
 0xca7   :  { %v920_v14 = vadd.f32 %v2651_v11, %v915_v12  ;;  %v2574_v12 = vld [vmem:[%s3715_s2 + $0x8] sm:$0xff] }
 0xca8   :  { %1046 = vmatpush.bf16.msra.mxu1 %v2574_v12 }
 0xca9   :  { %v2447_v17 = vmul.f32 -1.442695, %v920_v14 }
 0xcab   :  { %2833 = vpow2.f32 %v2447_v17 }
 0xcae   :  { %v917_v18 = vpop.f32.mrf.mxu0 }
 0xcaf   :  { %v921_v63 = vadd.f32 %v2652_v3, %v917_v18 }
 0xcb1   :  { %v2834_v19 = vpop.eup %2833  ;;  %v2448_v20 = vmul.f32 -1.442695, %v921_v63 }
 0xcb2   :  { %v930_v23 = vadd.f32 1.0, %v2834_v19 }
 0xcb3   :  { %2835 = vpow2.f32 %v2448_v20 }
 0xcb4   :  { %2837 = vrcp.f32 %v930_v23  ;;  %v943_v29 = vand.u32 2147483648, %v930_v23  ;;  %v941_v30 = vand.u32 2147483647, %v930_v23  ;;  %vm937_vm5 = vweird.f32 %v930_v23 }
 0xcb6   :  { %v944_v34 = vor.u32 1.1754944e-38, %v943_v29  ;;  %vm942_vm7 = vcmp.eq.f32.partialorder %v941_v30, 8.507059e+37  ;;  %v2655_v30 = vunpack.c.l.bf16 %v3285_v1 }
 0xcb9   :  { %v2836_v25 = vpop.eup %2835 }
 0xcba   :  { %v2838_v26 = vpop.eup %2837  ;;  %v931_v28 = vadd.f32 1.0, %v2836_v25 }
 0xcbb   :  { %v933_v7 = vmul.f32 %v2838_v26, %v930_v23  ;;  %vm938_vm0 = vweird.f32 %v2838_v26 }
 0xcbc   :  { %2839 = vrcp.f32 %v931_v28  ;;  %vm939_vm6 = vmor %vm937_vm5, %vm938_vm0  ;;  %v958_v21 = vand.u32 2147483648, %v931_v28  ;;  %v956_v45 = vand.u32 2147483647, %v931_v28  ;;  %vm952_vm9 = vweird.f32 %v931_v28 }
 0xcbd   :  { %v934_v10 = vsub.f32 1.0, %v933_v7  ;;  %2841 = vtanh.f32 %v920_v14  ;;  %v3340_v7 = vld [vmem:[%s3720_s5 + $0x8] sm:$0xff] }
 0xcbe   :  { %2843 = vtanh.f32 %v921_v63  ;;  %v959_v47 = vor.u32 1.1754944e-38, %v958_v21  ;;  %vm957_vm11 = vcmp.eq.f32.partialorder %v956_v45, 8.507059e+37 }
 0xcbf   :  { %v935_v16 = vmul.f32 %v2838_v26, %v934_v10  ;;  %v3346_v10 = vld [vmem:[%s3720_s5] sm:$0xff] }
 0xcc1   :  { %v936_v31 = vadd.f32 %v2838_v26, %v935_v16 }
 0xcc2   :  { %v2840_v32 = vpop.eup %2839 }
 0xcc3   :  { %v940_v38 = vsel %vm939_vm6, %v2838_v26, %v936_v31  ;;  %v948_v39 = vmul.f32 %v2840_v32, %v931_v28  ;;  %v2842_v40 = vpop.eup %2841  ;;  %vm953_vm8 = vweird.f32 %v2840_v32 }
 0xcc4   :  { %v945_v42 = vsel %vm942_vm7, %v944_v34, %v940_v38  ;;  %vm954_vm10 = vmor %vm952_vm9, %vm953_vm8  ;;  %v2844_v51 = vpop.eup %2843 }
 0xcc5   :  { %v962_v27 = vsel %vm3085_vm4, %v2842_v40, %v945_v42  ;;  %v949_v43 = vsub.f32 1.0, %v948_v39  ;;  %v3359_v39 = vld [vmem:[%s3719_s6] ss:$0 sm:$0xff] }
 0xcc6   :  { %968 = vrot.lane.b32.xlu2 %v962_v27, %s3012_s18  ;;  %v964_v59 = vmul.f32 %v962_v27, %v3253_v41  ;;  %v2585_v41 = vld [vmem:[%s3718_s4] sm:$0xff] }
 0xcc7   :  { %v950_v44 = vmul.f32 %v2840_v32, %v949_v43 }
 0xcc9   :  { %v951_v46 = vadd.f32 %v2840_v32, %v950_v44 }
 0xccb   :  { %v955_v49 = vsel %vm954_vm10, %v2840_v32, %v951_v46 }
 0xccc   :  { %v960_v52 = vsel %vm957_vm11, %v959_v47, %v955_v49 }
 0xccd   :  { %v963_v53 = vsel %vm3085_vm4, %v2844_v51, %v960_v52 }
 0xcce   :  { %970 = vrot.lane.b32.xlu0 %v963_v53, %s3012_s18  ;;  %v965_v0 = vmul.f32 %v963_v53, %v3248_v37  ;;  %v2586_v37 = vld [vmem:[%s3718_s4 + $0x8] sm:$0xff] }
 0xccf   :  { %1385 = vmatpush.bf16.msra.mxu3 %v2586_v37 }
 0xcd3   :  { %1386 = vmatpush.bf16.msra.mxu3 %v2585_v41 }
 0xd20   :  { %v969_v54 = vpop.permute.xlu2 %968 }
 0xd21   :  { %v974_v55 = vmul.f32 %v969_v54, %v962_v27 }
 0xd23   :  { %978 = vrot.lane.b32.xlu1 %v974_v55, %s3013_s19 }
 0xd40   :  { %v971_v57 = vpop.permute.xlu0 %970 }
 0xd41   :  { %v975_v58 = vmul.f32 %v971_v57, %v963_v53 }
 0xd43   :  { %980 = vrot.lane.b32.xlu2 %v975_v58, %s3013_s19 }
 0xd4b   :  { %332 = vrot.lane.b32.xlu2 %v3115_v5, %s3013_s19 }
 0xd95   :  { %v979_v61 = vpop.permute.xlu1 %978 }
 0xd96   :  { %v3304_v62 = vadd.f32 %v979_v61, %v964_v59 }
 0xd98   :  { %2845 = vtanh.f32 %v3304_v62 }
 0xd9d   :  { %v981_v6 = vpop.permute.xlu2 %980 }
 0xd9e   :  { %v2846_v60 = vpop.eup %2845  ;;  %v3308_v56 = vadd.f32 %v981_v6, %v965_v0 }
 0xd9f   :  { %990 = vrot.lane.b32.xlu0 %v2846_v60, %s3012_s18 }
 0xda0   :  { %2847 = vtanh.f32 %v3308_v56 }
 0xda5   :  { %v333_v11 = vpop.permute.xlu2 %332 }
 0xda6   :  { %v2848_v5 = vpop.eup %2847  ;;  %339 = vst.msk [vmem:[#allocation2] sm:$0xf] %vm338_vm13, %v333_v11 }
 0xda7   :  { %334 = vrot.lane.b32.xlu0 %v3117_v8, %s3013_s19  ;;  %992 = vrot.lane.b32.xlu1 %v2848_v5, %s3012_s18  ;;  %v2573_v8 = vld [vmem:[%s3715_s2] sm:$0xff] }
 0xda8   :  { %1047 = vmatpush.bf16.msra.mxu1 %v2573_v8 }
 0xdac   :  { %1486 = vmatpush.bf16.msrb.mxu1 %v3340_v7 }
 0xdb0   :  { %1487 = vmatpush.bf16.msrb.mxu1 %v3346_v10 }
 0xe11   :  { %v991_v14 = vpop.permute.xlu0 %990 }
 0xe12   :  { %v996_v17 = vmul.f32 %v991_v14, %v962_v27 }
 0xe14   :  { %v3328_v63 = vpack.c.bf16 %v996_v17, %v996_v17 }
 0xe16   :  { %v1020_v23 = vunpack.c.l.b16 %v3328_v63 }
 0xe19   :  { %v335_v3 = vpop.permute.xlu0 %334  ;;  %v993_v18 = vpop.permute.xlu1 %992 }
 0xe1a   :  { %340 = vst.msk [vmem:[#allocation2 + $0x4] sm:$0xf] %vm338_vm13, %v335_v3  ;;  %v997_v19 = vmul.f32 %v993_v18, %v963_v53 }
 0xe1c   :  { %v3331_v20 = vpack.c.bf16 %v997_v19, %v997_v19 }
 0xe1e   :  { %v1021_v25 = vunpack.c.l.b16 %v3331_v20 }
 0xe20   :  { %v1022_v26 = vpack.c.b16 %v1021_v25, %v1020_v23 }
 0xe21   :  { %v2577_v28 = vld [vmem:[#allocation2] sm:$0xff] }
 0xe22   :  { %1023 = vrot.lane.b32.xlu1 %v1022_v26, %s3013_s19  ;;  %2511 = vmatmul.msk.bf16.vlgmr.msra.gmra.mxu3 %vm232_vm12, %v2577_v28 }
 0xe94   :  { %v1024_v29 = vpop.permute.xlu1 %1023 }
 0xe95   :  { %2457 = vmatmul.msk.bf16.vlgmr.msra.gmra.mxu1 %vm232_vm12, %v1024_v29 }
 0xe96   :  { %1692 = vmatpush.bf16.msra.mxu1 %v3340_v7 }
 0xe9a   :  { %1693 = vmatpush.bf16.msra.mxu1 %v3346_v10 }
 0xea5   :  { %1488 = vmatmul.bf16.vlgmr.msrb.gmra.mxu1 %v3011_v4  ;;  %v1388_v16 = vpop.f32.mrf.mxu3  ;;  %v2656_v4 = vunpack.c.h.bf16 %v3285_v1 }
 0xea6   :  { %1898 = vmatpush.bf16.msrb.mxu1 %v3340_v7  ;;  %v1389_v27 = vadd.f32 %v3359_v39, %v1388_v16 }
 0xeaa   :  { %1899 = vmatpush.bf16.msrb.mxu1 %v3346_v10 }
 0xead   :  { %v1390_v38 = vpop.f32.mrf.mxu3 }
 0xeae   :  { %v1391_v40 = vadd.f32 %v3359_v39, %v1390_v38 }
 0xeb0   :  { %v2664_v44 = vpack.c.bf16 %v1391_v40, %v1389_v27 }
 0xeb2   :  { %v2703_v47 = vunpack.c.l.bf16 %v2664_v44  ;;  %v2704_v1 = vunpack.c.h.bf16 %v2664_v44 }
 0xf12   :  { %v1049_v31 = vpop.f32.mrf.mxu1 }
 0xf13   :  { %v1054_v32 = vadd.f32 %v2655_v30, %v1049_v31 }
 0xf15   :  { %v2458_v34 = vmul.f32 -1.442695, %v1054_v32 }
 0xf17   :  { %2849 = vpow2.f32 %v2458_v34 }
 0xf1a   :  { %v1051_v42 = vpop.f32.mrf.mxu1 }
 0xf1b   :  { %v1055_v43 = vadd.f32 %v2656_v4, %v1051_v42 }
 0xf1d   :  { %v2850_v21 = vpop.eup %2849  ;;  %v2459_v45 = vmul.f32 -1.442695, %v1055_v43 }
 0xf1e   :  { %v1064_v46 = vadd.f32 1.0, %v2850_v21 }
 0xf1f   :  { %2851 = vpow2.f32 %v2459_v45 }
 0xf20   :  { %2853 = vrcp.f32 %v1064_v46  ;;  %v1077_v61 = vand.u32 2147483648, %v1064_v46  ;;  %v1075_v60 = vand.u32 2147483647, %v1064_v46  ;;  %vm1071_vm15 = vweird.f32 %v1064_v46 }
 0xf22   :  { %v1489_v49 = vpop.f32.mrf.mxu1  ;;  %v1078_v8 = vor.u32 1.1754944e-38, %v1077_v61  ;;  %vm1076_vm2 = vcmp.eq.f32.partialorder %v1075_v60, 8.507059e+37 }
 0xf23   :  { %v1494_v51 = vadd.f32 %v2703_v47, %v1489_v49 }
 0xf25   :  { %v2852_v52 = vpop.eup %2851  ;;  %v2527_v53 = vmul.f32 -1.442695, %v1494_v51 }
 0xf26   :  { %v2854_v54 = vpop.eup %2853  ;;  %v1065_v55 = vadd.f32 1.0, %v2852_v52 }
 0xf27   :  { %2855 = vpow2.f32 %v2527_v53  ;;  %v1067_v57 = vmul.f32 %v2854_v54, %v1064_v46  ;;  %vm1072_vm14 = vweird.f32 %v2854_v54 }
 0xf28   :  { %2857 = vrcp.f32 %v1065_v55  ;;  %vm1073_vm1 = vmor %vm1071_vm15, %vm1072_vm14  ;;  %v1092_v25 = vand.u32 2147483648, %v1065_v55  ;;  %v1090_v28 = vand.u32 2147483647, %v1065_v55  ;;  %vm1086_vm0 = vweird.f32 %v1065_v55 }
 0xf29   :  { %v1068_v58 = vsub.f32 1.0, %v1067_v57  ;;  %2859 = vtanh.f32 %v1054_v32 }
 0xf2a   :  { %v1491_v59 = vpop.f32.mrf.mxu1  ;;  %v1093_v32 = vor.u32 1.1754944e-38, %v1092_v25  ;;  %vm1091_vm6 = vcmp.eq.f32.partialorder %v1090_v28, 8.507059e+37 }
 0xf2b   :  { %v1495_v0 = vadd.f32 %v2704_v1, %v1491_v59  ;;  %v1069_v6 = vmul.f32 %v2854_v54, %v1068_v58 }
 0xf2d   :  { %v2856_v11 = vpop.eup %2855  ;;  %v2528_v5 = vmul.f32 -1.442695, %v1495_v0  ;;  %v1070_v37 = vadd.f32 %v2854_v54, %v1069_v6 }
 0xf2e   :  { %v2858_v41 = vpop.eup %2857  ;;  %v1504_v12 = vadd.f32 1.0, %v2856_v11 }
 0xf2f   :  { %2861 = vpow2.f32 %v2528_v5  ;;  %v1074_v14 = vsel %vm1073_vm1, %v2854_v54, %v1070_v37  ;;  %v1082_v17 = vmul.f32 %v2858_v41, %v1065_v55  ;;  %v2860_v3 = vpop.eup %2859  ;;  %vm1087_vm3 = vweird.f32 %v2858_v41 }
 0xf30   :  { %2863 = vrcp.f32 %v1504_v12  ;;  %v1079_v18 = vsel %vm1076_vm2, %v1078_v8, %v1074_v14  ;;  %vm1088_vm5 = vmor %vm1086_vm0, %vm1087_vm3  ;;  %v1515_v44 = vand.u32 2147483647, %v1504_v12  ;;  %vm1511_vm8 = vweird.f32 %v1504_v12 }
 0xf31   :  { %v3366_v19 = vsel %vm3085_vm4, %v2860_v3, %v1079_v18  ;;  %v1083_v23 = vsub.f32 1.0, %v1082_v17  ;;  %2865 = vtanh.f32 %v1055_v43  ;;  %v1517_v43 = vand.u32 2147483648, %v1504_v12 }
 0xf32   :  { %1102 = vrot.lane.b32.xlu2 %v3366_v19, %s3012_s18  ;;  %vm1516_vm10 = vcmp.eq.f32.partialorder %v1515_v44, 8.507059e+37  ;;  %v1098_v18 = vmul.f32 %v3366_v19, %v3304_v62 }
 0xf33   :  { %v1084_v26 = vmul.f32 %v2858_v41, %v1083_v23  ;;  %v1518_v47 = vor.u32 1.1754944e-38, %v1517_v43 }
 0xf35   :  { %v2862_v29 = vpop.eup %2861  ;;  %v1085_v16 = vadd.f32 %v2858_v41, %v1084_v26 }
 0xf36   :  { %v2864_v30 = vpop.eup %2863  ;;  %v1505_v31 = vadd.f32 1.0, %v2862_v29 }
 0xf37   :  { %v1089_v34 = vsel %vm1088_vm5, %v2858_v41, %v1085_v16  ;;  %v1507_v38 = vmul.f32 %v2864_v30, %v1504_v12  ;;  %v2866_v40 = vpop.eup %2865  ;;  %vm1512_vm7 = vweird.f32 %v2864_v30 }
 0xf38   :  { %2867 = vrcp.f32 %v1505_v31  ;;  %v1094_v4 = vsel %vm1091_vm6, %v1093_v32, %v1089_v34  ;;  %vm1513_vm9 = vmor %vm1511_vm8, %vm1512_vm7  ;;  %v1532_v57 = vand.u32 2147483648, %v1505_v31  ;;  %v1530_v58 = vand.u32 2147483647, %v1505_v31 }
 0xf39   :  { %v3372_v42 = vsel %vm3085_vm4, %v2866_v40, %v1094_v4  ;;  %v1508_v27 = vsub.f32 1.0, %v1507_v38  ;;  %2869 = vtanh.f32 %v1494_v51  ;;  %vm1526_vm14 = vweird.f32 %v1505_v31 }
 0xf3a   :  { %1104 = vrot.lane.b32.xlu0 %v3372_v42, %s3012_s18  ;;  %2871 = vtanh.f32 %v1495_v0  ;;  %v1533_v61 = vor.u32 1.1754944e-38, %v1532_v57  ;;  %vm1531_vm1 = vcmp.eq.f32.partialorder %v1530_v58, 8.507059e+37  ;;  %v1099_v62 = vmul.f32 %v3372_v42, %v3308_v56  ;;  %v2576_v56 = vld [vmem:[%s3715_s2 + $0x8] sm:$0xff]  ;;  %v2575_v58 = vld [vmem:[%s3715_s2] sm:$0xff] }
 0xf3b   :  { %v1509_v21 = vmul.f32 %v2864_v30, %v1508_v27  ;;  %1180 = vmatpush.bf16.msrb.mxu2 %v2576_v56 }
 0xf3d   :  { %v1510_v45 = vadd.f32 %v2864_v30, %v1509_v21 }
 0xf3e   :  { %v2868_v46 = vpop.eup %2867 }
 0xf3f   :  { %v1514_v49 = vsel %vm1513_vm9, %v2864_v30, %v1510_v45  ;;  %v1522_v52 = vmul.f32 %v2868_v46, %v1505_v31  ;;  %v2870_v53 = vpop.eup %2869  ;;  %vm1527_vm11 = vweird.f32 %v2868_v46  ;;  %1181 = vmatpush.bf16.msrb.mxu2 %v2575_v58 }
 0xf40   :  { %v1519_v54 = vsel %vm1516_vm10, %v1518_v47, %v1514_v49  ;;  %vm1528_vm15 = vmor %vm1526_vm14, %vm1527_vm11  ;;  %v2872_v60 = vpop.eup %2871 }
 0xf41   :  { %v3378_v51 = vsel %vm3085_vm4, %v2870_v53, %v1519_v54  ;;  %v1523_v55 = vsub.f32 1.0, %v1522_v52 }
 0xf42   :  { %1542 = vrot.lane.b32.xlu1 %v3378_v51, %s3012_s18  ;;  %v1538_v28 = vmul.f32 0.0, %v3378_v51 }
 0xf43   :  { %v1524_v1 = vmul.f32 %v2868_v46, %v1523_v55  ;;  %1589 = vmatpush.bf16.msra.mxu2 %v3340_v7 }
 0xf45   :  { %v1525_v59 = vadd.f32 %v2868_v46, %v1524_v1 }
 0xf47   :  { %v1529_v6 = vsel %vm1528_vm15, %v2868_v46, %v1525_v59  ;;  %1590 = vmatpush.bf16.msra.mxu2 %v3346_v10 }
 0xf48   :  { %v1534_v11 = vsel %vm1531_vm1, %v1533_v61, %v1529_v6  ;;  %v3009_v61 = vld [vmem:[%s3717_s3] ss:$0 sm:$0xff] }
 0xf49   :  { %v1537_v5 = vsel %vm3085_vm4, %v2872_v60, %v1534_v11  ;;  %v176_v6 = vadd.f32 %v3009_v61, %v3287_v2  ;;  %v178_v60 = vadd.f32 %v3009_v61, %v3291_v9 }
 0xf4a   :  { %1544 = vrot.lane.b32.xlu2 %v1537_v5, %s3012_s18  ;;  %v1539_v30 = vmul.f32 0.0, %v1537_v5 }
 0xf8c   :  { %v1103_v0 = vpop.permute.xlu2 %1102 }
 0xf8d   :  { %v1108_v37 = vmul.f32 %v1103_v0, %v3366_v19 }
 0xf8f   :  { %1112 = vrot.lane.b32.xlu0 %v1108_v37, %s3013_s19 }
 0xfa4   :  { %v1545_v41 = vpop.permute.xlu2 %1544 }
 0xfa5   :  { %v1549_v12 = vmul.f32 %v1545_v41, %v1537_v5 }
 0xfa7   :  { %1554 = vrot.lane.b32.xlu0 %v1549_v12, %s3013_s19 }
 0xfac   :  { %v1105_v8 = vpop.permute.xlu0 %1104 }
 0xfad   :  { %v1109_v14 = vmul.f32 %v1105_v8, %v3372_v42 }
 0xfaf   :  { %1114 = vrot.lane.b32.xlu1 %v1109_v14, %s3013_s19 }
 0xfb4   :  { %v1543_v17 = vpop.permute.xlu1 %1542 }
 0xfb5   :  { %v1548_v3 = vmul.f32 %v1543_v17, %v3378_v51 }
 0xfb7   :  { %1552 = vrot.lane.b32.xlu2 %v1548_v3, %s3013_s19 }
0x1001   :  { %v1113_v23 = vpop.permute.xlu0 %1112 }
0x1002   :  { %v3394_v25 = vadd.f32 %v1113_v23, %v1098_v18 }
0x1004   :  { %2873 = vtanh.f32 %v3394_v25 }
0x100a   :  { %v2874_v26 = vpop.eup %2873 }
0x100b   :  { %1124 = vrot.lane.b32.xlu1 %v2874_v26, %s3012_s18 }
0x1011   :  { %v1553_v29 = vpop.permute.xlu2 %1552 }
0x1012   :  { %v3399_v16 = vadd.f32 %v1553_v29, %v1538_v28 }
0x1014   :  { %2875 = vtanh.f32 %v3399_v16 }
0x1019   :  { %v1555_v31 = vpop.permute.xlu0 %1554 }
0x101a   :  { %v2876_v32 = vpop.eup %2875  ;;  %v3402_v34 = vadd.f32 %v1555_v31, %v1539_v30 }
0x101b   :  { %1564 = vrot.lane.b32.xlu0 %v2876_v32, %s3012_s18 }
0x101c   :  { %2877 = vtanh.f32 %v3402_v34 }
0x1021   :  { %v1115_v38 = vpop.permute.xlu1 %1114 }
0x1022   :  { %v2878_v40 = vpop.eup %2877  ;;  %v3408_v4 = vadd.f32 %v1115_v38, %v1099_v62 }
0x1023   :  { %468 = vrot.lane.b32.xlu0 %v3155_v15, %s3013_s19  ;;  %1566 = vrot.lane.b32.xlu1 %v2878_v40, %s3012_s18 }
0x1024   :  { %2879 = vtanh.f32 %v3408_v4 }
0x102a   :  { %v2880_v27 = vpop.eup %2879 }
0x102b   :  { %1126 = vrot.lane.b32.xlu2 %v2880_v27, %s3012_s18 }
0x1033   :  { %466 = vrot.lane.b32.xlu2 %v3153_v13, %s3013_s19 }
0x107d   :  { %v1125_v43 = vpop.permute.xlu1 %1124 }
0x107e   :  { %v1130_v21 = vmul.f32 %v1125_v43, %v3366_v19 }
0x1080   :  { %v3421_v15 = vpack.c.bf16 %v1130_v21, %v1130_v21 }
0x1082   :  { %v1154_v47 = vunpack.c.l.b16 %v3421_v15 }
0x1085   :  { %v1127_v44 = vpop.permute.xlu2 %1126 }
0x1086   :  { %v1131_v45 = vmul.f32 %v1127_v44, %v3372_v42 }
0x1088   :  { %v3424_v46 = vpack.c.bf16 %v1131_v45, %v1131_v45 }
0x108a   :  { %v1155_v49 = vunpack.c.l.b16 %v3424_v46 }
0x108c   :  { %v1156_v13 = vpack.c.b16 %v1155_v49, %v1154_v47 }
0x108d   :  { %v1565_v52 = vpop.permute.xlu0 %1564  ;;  %v467_v53 = vpop.permute.xlu2 %466 }
0x108e   :  { %473 = vst.msk [vmem:[#allocation2 + $0x8] sm:$0xf] %vm338_vm13, %v467_v53  ;;  %1157 = vrot.lane.b32.xlu1 %v1156_v13, %s3013_s19  ;;  %v1570_v55 = vmul.f32 %v1565_v52, %v3378_v51 }
0x1095   :  { %v1567_v54 = vpop.permute.xlu1 %1566  ;;  %v469_v19 = vpop.permute.xlu0 %468 }
0x1096   :  { %v1571_v57 = vmul.f32 %v1567_v54, %v1537_v5  ;;  %474 = vst.msk [vmem:[#allocation2 + $0xc] sm:$0xf] %vm338_vm13, %v469_v19  ;;  %v2627_v5 = vpack.c.bf16 %v178_v60, %v176_v6 }
0x1098   :  { %v1576_v42 = vpack.c.bf16 %v1571_v57, %v1570_v55  ;;  %v2659_v0 = vunpack.c.l.bf16 %v2627_v5  ;;  %v2660_v14 = vunpack.c.h.bf16 %v2627_v5 }
0x109a   :  { %1578 = vrot.lane.b32.xlu2 %v1576_v42, %s3013_s19 }
0x109d   :  { %v2578_v1 = vld [vmem:[#allocation2 + $0x8] sm:$0xff] }
0x109e   :  { %2512 = vmatmul.msk.bf16.gmra.mxu3 %vm232_vm12, %v2578_v1 }
0x10f4   :  { %v1579_v51 = vpop.permute.xlu2 %1578 }
0x1100   :  { %v1158_v59 = vpop.permute.xlu1 %1157 }
0x1101   :  { %2468 = vmatmul.msk.bf16.vlgmr.msrb.gmra.mxu2 %vm232_vm12, %v1158_v59 }
0x1102   :  { %1795 = vmatpush.bf16.msrb.mxu2 %v3340_v7 }
0x1106   :  { %1796 = vmatpush.bf16.msrb.mxu2 %v3346_v10 }
0x1111   :  { %2529 = vmatmul.msk.bf16.vlgmr.msra.gmra.mxu2 %vm232_vm12, %v1579_v51 }
0x1112   :  { %2001 = vmatpush.bf16.msra.mxu2 %v3340_v7 }
0x1116   :  { %2002 = vmatpush.bf16.msra.mxu2 %v3346_v10 }
0x1121   :  { %v1393_v11 = vpop.f32.mrf.mxu3 }
0x1122   :  { %v1394_v3 = vadd.f32 %v3359_v39, %v1393_v11 }
0x1129   :  { %v1395_v12 = vpop.f32.mrf.mxu3 }
0x112a   :  { %v1396_v8 = vadd.f32 %v3359_v39, %v1395_v12 }
0x112c   :  { %v2669_v23 = vpack.c.bf16 %v1396_v8, %v1394_v3 }
0x112e   :  { %v2707_v26 = vunpack.c.l.bf16 %v2669_v23  ;;  %v2708_v29 = vunpack.c.h.bf16 %v2669_v23 }
0x1184   :  { %v1183_v37 = vpop.f32.mrf.mxu2 }
0x1185   :  { %v3450_v41 = vadd.f32 %v2659_v0, %v1183_v37 }
0x118c   :  { %v1185_v17 = vpop.f32.mrf.mxu2 }
0x118d   :  { %v3454_v18 = vadd.f32 %v2660_v14, %v1185_v17 }
0x1194   :  { %v1592_v2 = vpop.f32.mrf.mxu2 }
0x1195   :  { %v1597_v28 = vadd.f32 %v2707_v26, %v1592_v2 }
0x1197   :  { %v2530_v9 = vmul.f32 -1.442695, %v1597_v28 }
0x1199   :  { %2881 = vpow2.f32 %v2530_v9 }
0x119c   :  { %v1594_v30 = vpop.f32.mrf.mxu2 }
0x119d   :  { %v1598_v31 = vadd.f32 %v2708_v29, %v1594_v30 }
0x119f   :  { %v2882_v32 = vpop.eup %2881  ;;  %v2531_v62 = vmul.f32 -1.442695, %v1598_v31 }
0x11a0   :  { %v1607_v38 = vadd.f32 1.0, %v2882_v32 }
0x11a1   :  { %2883 = vpow2.f32 %v2531_v62 }
0x11a2   :  { %2885 = vrcp.f32 %v1607_v38  ;;  %v1620_v44 = vand.u32 2147483648, %v1607_v38  ;;  %v1618_v47 = vand.u32 2147483647, %v1607_v38  ;;  %vm1614_vm3 = vweird.f32 %v1607_v38 }
0x11a4   :  { %v1621_v52 = vor.u32 1.1754944e-38, %v1620_v44  ;;  %vm1619_vm5 = vcmp.eq.f32.partialorder %v1618_v47, 8.507059e+37 }
0x11a7   :  { %v2884_v40 = vpop.eup %2883 }
0x11a8   :  { %v2886_v27 = vpop.eup %2885  ;;  %v1608_v43 = vadd.f32 1.0, %v2884_v40 }
0x11a9   :  { %v1610_v56 = vmul.f32 %v2886_v27, %v1607_v38  ;;  %vm1615_vm2 = vweird.f32 %v2886_v27 }
0x11aa   :  { %2887 = vrcp.f32 %v1608_v43  ;;  %vm1616_vm0 = vmor %vm1614_vm3, %vm1615_vm2  ;;  %v1635_v1 = vand.u32 2147483648, %v1608_v43  ;;  %v1633_v59 = vand.u32 2147483647, %v1608_v43  ;;  %vm1629_vm7 = vweird.f32 %v1608_v43 }
0x11ab   :  { %v1611_v21 = vsub.f32 1.0, %v1610_v56  ;;  %2889 = vtanh.f32 %v1597_v28 }
0x11ac   :  { %2891 = vtanh.f32 %v1598_v31  ;;  %v1636_v61 = vor.u32 1.1754944e-38, %v1635_v1  ;;  %vm1634_vm9 = vcmp.eq.f32.partialorder %v1633_v59, 8.507059e+37 }
0x11ad   :  { %v1612_v45 = vmul.f32 %v2886_v27, %v1611_v21 }
0x11af   :  { %v1613_v49 = vadd.f32 %v2886_v27, %v1612_v45 }
0x11b0   :  { %v2888_v13 = vpop.eup %2887 }
0x11b1   :  { %v1617_v53 = vsel %vm1616_vm0, %v2886_v27, %v1613_v49  ;;  %v1625_v54 = vmul.f32 %v2888_v13, %v1608_v43  ;;  %v2890_v19 = vpop.eup %2889  ;;  %vm1630_vm6 = vweird.f32 %v2888_v13 }
0x11b2   :  { %v1622_v55 = vsel %vm1619_vm5, %v1621_v52, %v1617_v53  ;;  %vm1631_vm8 = vmor %vm1629_vm7, %vm1630_vm6  ;;  %v2892_v60 = vpop.eup %2891 }
0x11b3   :  { %v1639_v57 = vsel %vm3085_vm4, %v2890_v19, %v1622_v55  ;;  %v1626_v42 = vsub.f32 1.0, %v1625_v54 }
0x11b4   :  { %1645 = vrot.lane.b32.xlu0 %v1639_v57, %s3012_s18  ;;  %v1641_v14 = vmul.f32 %v1639_v57, %v3399_v16 }
0x11b5   :  { %v1627_v58 = vmul.f32 %v2888_v13, %v1626_v42 }
0x11b7   :  { %v1628_v51 = vadd.f32 %v2888_v13, %v1627_v58 }
0x11b9   :  { %v1632_v6 = vsel %vm1631_vm8, %v2888_v13, %v1628_v51 }
0x11ba   :  { %v1637_v11 = vsel %vm1634_vm9, %v1636_v61, %v1632_v6 }
0x11bb   :  { %v1640_v5 = vsel %vm3085_vm4, %v2892_v60, %v1637_v11 }
0x11bc   :  { %1647 = vrot.lane.b32.xlu1 %v1640_v5, %s3012_s18  ;;  %v1642_v26 = vmul.f32 %v1640_v5, %v3402_v34 }
0x1226   :  { %v1646_v0 = vpop.permute.xlu0 %1645 }
0x1227   :  { %v1651_v37 = vmul.f32 %v1646_v0, %v1639_v57 }
0x1229   :  { %1655 = vrot.lane.b32.xlu2 %v1651_v37, %s3013_s19 }
0x122e   :  { %v1648_v12 = vpop.permute.xlu1 %1647 }
0x122f   :  { %v1652_v8 = vmul.f32 %v1648_v12, %v1640_v5 }
0x1231   :  { %1657 = vrot.lane.b32.xlu0 %v1652_v8, %s3013_s19 }
0x1239   :  { %600 = vrot.lane.b32.xlu0 %v3191_v22, %s3013_s19 }
0x1283   :  { %v1656_v17 = vpop.permute.xlu2 %1655 }
0x1284   :  { %v3467_v3 = vadd.f32 %v1656_v17, %v1641_v14 }
0x1286   :  { %2893 = vtanh.f32 %v3467_v3 }
0x128c   :  { %v2894_v23 = vpop.eup %2893 }
0x128d   :  { %1667 = vrot.lane.b32.xlu1 %v2894_v23, %s3012_s18 }
0x1295   :  { %602 = vrot.lane.b32.xlu1 %v3193_v24, %s3013_s19 }
0x12a3   :  { %v1658_v2 = vpop.permute.xlu0 %1657 }
0x12a4   :  { %v3474_v28 = vadd.f32 %v1658_v2, %v1642_v26 }
0x12a6   :  { %2895 = vtanh.f32 %v3474_v28 }
0x12ab   :  { %v601_v22 = vpop.permute.xlu0 %600 }
0x12ac   :  { %v2896_v16 = vpop.eup %2895  ;;  %607 = vst.msk [vmem:[#allocation2 + $0x10] sm:$0xf] %vm338_vm13, %v601_v22 }
0x12ad   :  { %1669 = vrot.lane.b32.xlu2 %v2896_v16, %s3012_s18 }
0x12ff   :  { %v1668_v9 = vpop.permute.xlu1 %1667 }
0x1300   :  { %v1673_v31 = vmul.f32 %v1668_v9, %v1639_v57 }
0x1307   :  { %v603_v29 = vpop.permute.xlu1 %602  ;;  %v1670_v30 = vpop.permute.xlu2 %1669 }
0x1308   :  { %608 = vst.msk [vmem:[#allocation2 + $0x14] sm:$0xf] %vm338_vm13, %v603_v29  ;;  %v1674_v24 = vmul.f32 %v1670_v30, %v1640_v5 }
0x130a   :  { %v1679_v32 = vpack.c.bf16 %v1674_v24, %v1673_v31 }
0x130c   :  { %1681 = vrot.lane.b32.xlu2 %v1679_v32, %s3013_s19 }
0x130f   :  { %v2579_v34 = vld [vmem:[#allocation2 + $0x10] sm:$0xff] }
0x1310   :  { %2513 = vmatmul.msk.bf16.gmra.mxu3 %vm232_vm12, %v2579_v34 }
0x1366   :  { %v1682_v62 = vpop.permute.xlu2 %1681 }
0x1367   :  { %2532 = vmatmul.msk.bf16.vlgmr.msra.gmra.mxu1 %vm232_vm12, %v1682_v62 }
0x1368   :  { %2104 = vmatpush.bf16.msra.mxu1 %v3340_v7 }
0x136c   :  { %2105 = vmatpush.bf16.msra.mxu1 %v3346_v10 }
0x1393   :  { %v1398_v38 = vpop.f32.mrf.mxu3 }
0x1394   :  { %v1399_v43 = vadd.f32 %v3359_v39, %v1398_v38 }
0x139b   :  { %v1400_v40 = vpop.f32.mrf.mxu3 }
0x139c   :  { %v1401_v27 = vadd.f32 %v3359_v39, %v1400_v40 }
0x139e   :  { %v2674_v56 = vpack.c.bf16 %v1401_v27, %v1399_v43 }
0x13a0   :  { %v2711_v21 = vunpack.c.l.bf16 %v2674_v56  ;;  %v2712_v49 = vunpack.c.h.bf16 %v2674_v56 }
0x13e4   :  { %v1695_v44 = vpop.f32.mrf.mxu1 }
0x13e5   :  { %v1700_v45 = vadd.f32 %v2711_v21, %v1695_v44 }
0x13e7   :  { %v2533_v47 = vmul.f32 -1.442695, %v1700_v45 }
0x13e9   :  { %2897 = vpow2.f32 %v2533_v47 }
0x13ec   :  { %v1697_v13 = vpop.f32.mrf.mxu1 }
0x13ed   :  { %v1701_v52 = vadd.f32 %v2712_v49, %v1697_v13 }
0x13ef   :  { %v2898_v53 = vpop.eup %2897  ;;  %v2534_v54 = vmul.f32 -1.442695, %v1701_v52 }
0x13f0   :  { %v1710_v19 = vadd.f32 1.0, %v2898_v53 }
0x13f1   :  { %2899 = vpow2.f32 %v2534_v54 }
0x13f2   :  { %2901 = vrcp.f32 %v1710_v19  ;;  %v1723_v59 = vand.u32 2147483648, %v1710_v19  ;;  %v1721_v61 = vand.u32 2147483647, %v1710_v19  ;;  %vm1717_vm11 = vweird.f32 %v1710_v19 }
0x13f4   :  { %v1724_v11 = vor.u32 1.1754944e-38, %v1723_v59  ;;  %vm1722_vm15 = vcmp.eq.f32.partialorder %v1721_v61, 8.507059e+37 }
0x13f7   :  { %v2900_v55 = vpop.eup %2899 }
0x13f8   :  { %v2902_v57 = vpop.eup %2901  ;;  %v1711_v42 = vadd.f32 1.0, %v2900_v55 }
0x13f9   :  { %v1713_v1 = vmul.f32 %v2902_v57, %v1710_v19  ;;  %vm1718_vm10 = vweird.f32 %v2902_v57 }
0x13fa   :  { %2903 = vrcp.f32 %v1711_v42  ;;  %vm1719_vm14 = vmor %vm1717_vm11, %vm1718_vm10  ;;  %v1738_v17 = vand.u32 2147483648, %v1711_v42  ;;  %v1736_v26 = vand.u32 2147483647, %v1711_v42  ;;  %vm1732_vm2 = vweird.f32 %v1711_v42 }
0x13fb   :  { %v1714_v58 = vsub.f32 1.0, %v1713_v1  ;;  %2905 = vtanh.f32 %v1700_v45 }
0x13fc   :  { %2907 = vtanh.f32 %v1701_v52  ;;  %v1739_v22 = vor.u32 1.1754944e-38, %v1738_v17  ;;  %vm1737_vm0 = vcmp.eq.f32.partialorder %v1736_v26, 8.507059e+37 }
0x13fd   :  { %v1715_v51 = vmul.f32 %v2902_v57, %v1714_v58 }
0x13ff   :  { %v1716_v6 = vadd.f32 %v2902_v57, %v1715_v51 }
0x1400   :  { %v2904_v60 = vpop.eup %2903 }
0x1401   :  { %v1720_v5 = vsel %vm1719_vm14, %v2902_v57, %v1716_v6  ;;  %v1728_v0 = vmul.f32 %v2904_v60, %v1711_v42  ;;  %v2906_v37 = vpop.eup %2905  ;;  %vm1733_vm1 = vweird.f32 %v2904_v60 }
0x1402   :  { %v1725_v12 = vsel %vm1722_vm15, %v1724_v11, %v1720_v5  ;;  %vm1734_vm3 = vmor %vm1732_vm2, %vm1733_vm1  ;;  %v2908_v9 = vpop.eup %2907 }
0x1403   :  { %v1742_v8 = vsel %vm3085_vm4, %v2906_v37, %v1725_v12  ;;  %v1729_v14 = vsub.f32 1.0, %v1728_v0 }
0x1404   :  { %1748 = vrot.lane.b32.xlu0 %v1742_v8, %s3012_s18  ;;  %v1744_v62 = vmul.f32 %v1742_v8, %v3467_v3 }
0x1405   :  { %v1730_v23 = vmul.f32 %v2904_v60, %v1729_v14 }
0x1407   :  { %v1731_v2 = vadd.f32 %v2904_v60, %v1730_v23 }
0x1409   :  { %v1735_v16 = vsel %vm1734_vm3, %v2904_v60, %v1731_v2 }
0x140a   :  { %v1740_v29 = vsel %vm1737_vm0, %v1739_v22, %v1735_v16 }
0x140b   :  { %v1743_v30 = vsel %vm3085_vm4, %v2908_v9, %v1740_v29 }
0x140c   :  { %1750 = vrot.lane.b32.xlu1 %v1743_v30, %s3012_s18  ;;  %v1745_v43 = vmul.f32 %v1743_v30, %v3474_v28 }
0x1476   :  { %v1749_v31 = vpop.permute.xlu0 %1748 }
0x1477   :  { %v1754_v24 = vmul.f32 %v1749_v31, %v1742_v8 }
0x1479   :  { %1758 = vrot.lane.b32.xlu2 %v1754_v24, %s3013_s19 }
0x147e   :  { %v1751_v32 = vpop.permute.xlu1 %1750 }
0x147f   :  { %v1755_v34 = vmul.f32 %v1751_v32, %v1743_v30 }
0x1481   :  { %1760 = vrot.lane.b32.xlu0 %v1755_v34, %s3013_s19 }
0x1489   :  { %734 = vrot.lane.b32.xlu0 %v3229_v33, %s3013_s19 }
0x14d3   :  { %v1759_v38 = vpop.permute.xlu2 %1758 }
0x14d4   :  { %v3498_v40 = vadd.f32 %v1759_v38, %v1744_v62 }
0x14d6   :  { %2909 = vtanh.f32 %v3498_v40 }
0x14dc   :  { %v2910_v27 = vpop.eup %2909 }
0x14dd   :  { %1770 = vrot.lane.b32.xlu1 %v2910_v27, %s3012_s18 }
0x14e5   :  { %736 = vrot.lane.b32.xlu1 %v3231_v36, %s3013_s19 }
0x14f3   :  { %v1761_v56 = vpop.permute.xlu0 %1760 }
0x14f4   :  { %v3505_v21 = vadd.f32 %v1761_v56, %v1745_v43 }
0x14f6   :  { %2911 = vtanh.f32 %v3505_v21 }
0x14fb   :  { %v735_v33 = vpop.permute.xlu0 %734 }
0x14fc   :  { %v2912_v3 = vpop.eup %2911  ;;  %741 = vst.msk [vmem:[#allocation2 + $0x18] sm:$0xf] %vm338_vm13, %v735_v33 }
0x14fd   :  { %1772 = vrot.lane.b32.xlu2 %v2912_v3, %s3012_s18 }
0x154f   :  { %v1771_v44 = vpop.permute.xlu1 %1770 }
0x1550   :  { %v1776_v49 = vmul.f32 %v1771_v44, %v1742_v8 }
0x1557   :  { %v737_v45 = vpop.permute.xlu1 %736  ;;  %v1773_v47 = vpop.permute.xlu2 %1772 }
0x1558   :  { %742 = vst.msk [vmem:[#allocation2 + $0x1c] sm:$0xf] %vm338_vm13, %v737_v45  ;;  %v1777_v36 = vmul.f32 %v1773_v47, %v1743_v30 }
0x155a   :  { %v1782_v13 = vpack.c.bf16 %v1777_v36, %v1776_v49 }
0x155c   :  { %1784 = vrot.lane.b32.xlu2 %v1782_v13, %s3013_s19 }
0x155f   :  { %v2580_v28 = vld [vmem:[#allocation2 + $0x18] sm:$0xff] }
0x1560   :  { %2514 = vmatmul.msk.bf16.gmra.mxu3 %vm232_vm12, %v2580_v28 }
0x15b6   :  { %v1785_v52 = vpop.permute.xlu2 %1784 }
0x15b7   :  { %2535 = vmatmul.msk.bf16.vlgmr.msrb.gmra.mxu2 %vm232_vm12, %v1785_v52 }
0x15b8   :  { %2207 = vmatpush.bf16.msrb.mxu2 %v3340_v7 }
0x15bc   :  { %2208 = vmatpush.bf16.msrb.mxu2 %v3346_v10 }
0x15e3   :  { %v1403_v53 = vpop.f32.mrf.mxu3 }
0x15e4   :  { %v1404_v55 = vadd.f32 %v3359_v39, %v1403_v53 }
0x15eb   :  { %v1405_v54 = vpop.f32.mrf.mxu3 }
0x15ec   :  { %v1406_v19 = vadd.f32 %v3359_v39, %v1405_v54 }
0x15ee   :  { %v2679_v57 = vpack.c.bf16 %v1406_v19, %v1404_v55 }
0x15f0   :  { %v2715_v42 = vunpack.c.l.bf16 %v2679_v57  ;;  %v2716_v51 = vunpack.c.h.bf16 %v2679_v57 }
0x163a   :  { %v1798_v1 = vpop.f32.mrf.mxu2 }
0x163b   :  { %v1803_v58 = vadd.f32 %v2715_v42, %v1798_v1 }
0x163d   :  { %v2536_v59 = vmul.f32 -1.442695, %v1803_v58 }
0x163f   :  { %2913 = vpow2.f32 %v2536_v59 }
0x1642   :  { %v1800_v61 = vpop.f32.mrf.mxu2 }
0x1643   :  { %v1804_v6 = vadd.f32 %v2716_v51, %v1800_v61 }
0x1645   :  { %v2914_v60 = vpop.eup %2913  ;;  %v2537_v11 = vmul.f32 -1.442695, %v1804_v6 }
0x1646   :  { %v1813_v7 = vadd.f32 1.0, %v2914_v60 }
0x1647   :  { %2915 = vpow2.f32 %v2537_v11 }
0x1648   :  { %2917 = vrcp.f32 %v1813_v7  ;;  %v1826_v8 = vand.u32 2147483648, %v1813_v7  ;;  %v1824_v17 = vand.u32 2147483647, %v1813_v7  ;;  %vm1820_vm6 = vweird.f32 %v1813_v7 }
0x164a   :  { %v1827_v2 = vor.u32 1.1754944e-38, %v1826_v8  ;;  %vm1825_vm8 = vcmp.eq.f32.partialorder %v1824_v17, 8.507059e+37 }
0x164d   :  { %v2916_v10 = vpop.eup %2915 }
0x164e   :  { %v2918_v5 = vpop.eup %2917  ;;  %v1814_v0 = vadd.f32 1.0, %v2916_v10 }
0x164f   :  { %v1816_v37 = vmul.f32 %v2918_v5, %v1813_v7  ;;  %vm1821_vm5 = vweird.f32 %v2918_v5 }
0x1650   :  { %2919 = vrcp.f32 %v1814_v0  ;;  %vm1822_vm7 = vmor %vm1820_vm6, %vm1821_vm5  ;;  %v1841_v24 = vand.u32 2147483648, %v1814_v0  ;;  %v1839_v34 = vand.u32 2147483647, %v1814_v0  ;;  %vm1835_vm10 = vweird.f32 %v1814_v0 }
0x1651   :  { %v1817_v12 = vsub.f32 1.0, %v1816_v37  ;;  %2921 = vtanh.f32 %v1803_v58 }
0x1652   :  { %2923 = vtanh.f32 %v1804_v6  ;;  %v1842_v38 = vor.u32 1.1754944e-38, %v1841_v24  ;;  %vm1840_vm14 = vcmp.eq.f32.partialorder %v1839_v34, 8.507059e+37 }
0x1653   :  { %v1818_v14 = vmul.f32 %v2918_v5, %v1817_v12 }
0x1655   :  { %v1819_v23 = vadd.f32 %v2918_v5, %v1818_v14 }
0x1656   :  { %v2920_v26 = vpop.eup %2919 }
0x1657   :  { %v1823_v22 = vsel %vm1822_vm7, %v2918_v5, %v1819_v23  ;;  %v1831_v16 = vmul.f32 %v2920_v26, %v1814_v0  ;;  %v2922_v9 = vpop.eup %2921  ;;  %vm1836_vm9 = vweird.f32 %v2920_v26 }
0x1658   :  { %v1828_v29 = vsel %vm1825_vm8, %v1827_v2, %v1823_v22  ;;  %vm1837_vm11 = vmor %vm1835_vm10, %vm1836_vm9  ;;  %v2924_v43 = vpop.eup %2923 }
0x1659   :  { %v1845_v30 = vsel %vm3085_vm4, %v2922_v9, %v1828_v29  ;;  %v1832_v31 = vsub.f32 1.0, %v1831_v16 }
0x165a   :  { %1851 = vrot.lane.b32.xlu0 %v1845_v30, %s3012_s18  ;;  %v1847_v49 = vmul.f32 %v1845_v30, %v3498_v40 }
0x165b   :  { %v1833_v32 = vmul.f32 %v2920_v26, %v1832_v31 }
0x165d   :  { %v1834_v62 = vadd.f32 %v2920_v26, %v1833_v32 }
0x165f   :  { %v1838_v27 = vsel %vm1837_vm11, %v2920_v26, %v1834_v62 }
0x1660   :  { %v1843_v56 = vsel %vm1840_vm14, %v1842_v38, %v1838_v27 }
0x1661   :  { %v1846_v33 = vsel %vm3085_vm4, %v2924_v43, %v1843_v56 }
0x1662   :  { %1853 = vrot.lane.b32.xlu1 %v1846_v33, %s3012_s18  ;;  %v1848_v52 = vmul.f32 %v1846_v33, %v3505_v21 }
0x16cc   :  { %v1852_v3 = vpop.permute.xlu0 %1851 }
0x16cd   :  { %v1857_v44 = vmul.f32 %v1852_v3, %v1845_v30 }
0x16cf   :  { %1861 = vrot.lane.b32.xlu2 %v1857_v44, %s3013_s19 }
0x16d4   :  { %v1854_v45 = vpop.permute.xlu1 %1853 }
0x16d5   :  { %v1858_v47 = vmul.f32 %v1854_v45, %v1846_v33 }
0x16d7   :  { %1863 = vrot.lane.b32.xlu0 %v1858_v47, %s3013_s19 }
0x16df   :  { %868 = vrot.lane.b32.xlu0 %v3271_v48, %s3013_s19 }
0x1729   :  { %v1862_v36 = vpop.permute.xlu2 %1861 }
0x172a   :  { %v3529_v13 = vadd.f32 %v1862_v36, %v1847_v49 }
0x172c   :  { %2925 = vtanh.f32 %v3529_v13 }
0x1732   :  { %v2926_v28 = vpop.eup %2925 }
0x1733   :  { %1873 = vrot.lane.b32.xlu1 %v2926_v28, %s3012_s18 }
0x173b   :  { %870 = vrot.lane.b32.xlu1 %v3273_v50, %s3013_s19 }
0x1749   :  { %v1864_v53 = vpop.permute.xlu0 %1863 }
0x174a   :  { %v3536_v54 = vadd.f32 %v1864_v53, %v1848_v52 }
0x174c   :  { %2927 = vtanh.f32 %v3536_v54 }
0x1751   :  { %v869_v48 = vpop.permute.xlu0 %868 }
0x1752   :  { %v2928_v40 = vpop.eup %2927  ;;  %875 = vst.msk [vmem:[#allocation2 + $0x20] sm:$0xf] %vm338_vm13, %v869_v48 }
0x1753   :  { %1875 = vrot.lane.b32.xlu2 %v2928_v40, %s3012_s18 }
0x17a5   :  { %v1874_v19 = vpop.permute.xlu1 %1873 }
0x17a6   :  { %v1879_v42 = vmul.f32 %v1874_v19, %v1845_v30 }
0x17ad   :  { %v871_v55 = vpop.permute.xlu1 %870  ;;  %v1876_v57 = vpop.permute.xlu2 %1875 }
0x17ae   :  { %876 = vst.msk [vmem:[#allocation2 + $0x24] sm:$0xf] %vm338_vm13, %v871_v55  ;;  %v1880_v50 = vmul.f32 %v1876_v57, %v1846_v33 }
0x17b0   :  { %v1885_v1 = vpack.c.bf16 %v1880_v50, %v1879_v42 }
0x17b2   :  { %1887 = vrot.lane.b32.xlu2 %v1885_v1, %s3013_s19 }
0x17b5   :  { %v2581_v21 = vld [vmem:[#allocation2 + $0x20] sm:$0xff] }
0x17b6   :  { %2515 = vmatmul.msk.bf16.gmra.mxu3 %vm232_vm12, %v2581_v21 }
0x180c   :  { %v1888_v58 = vpop.permute.xlu2 %1887 }
0x180d   :  { %2538 = vmatmul.msk.bf16.vlgmr.msrb.gmra.mxu1 %vm232_vm12, %v1888_v58 }
0x1839   :  { %v1408_v59 = vpop.f32.mrf.mxu3 }
0x183a   :  { %v1409_v6 = vadd.f32 %v3359_v39, %v1408_v59 }
0x1841   :  { %v1410_v51 = vpop.f32.mrf.mxu3 }
0x1842   :  { %v1411_v61 = vadd.f32 %v3359_v39, %v1410_v51 }
0x1844   :  { %v2684_v60 = vpack.c.bf16 %v1411_v61, %v1409_v6 }
0x1846   :  { %v2719_v11 = vunpack.c.l.bf16 %v2684_v60  ;;  %v2720_v0 = vunpack.c.h.bf16 %v2684_v60 }
0x188a   :  { %v1901_v7 = vpop.f32.mrf.mxu1 }
0x188b   :  { %v1906_v10 = vadd.f32 %v2719_v11, %v1901_v7 }
0x188d   :  { %v2539_v5 = vmul.f32 -1.442695, %v1906_v10 }
0x188f   :  { %2929 = vpow2.f32 %v2539_v5 }
0x1892   :  { %v1903_v37 = vpop.f32.mrf.mxu1 }
0x1893   :  { %v1907_v12 = vadd.f32 %v2720_v0, %v1903_v37 }
0x1895   :  { %v2930_v8 = vpop.eup %2929  ;;  %v2540_v14 = vmul.f32 -1.442695, %v1907_v12 }
0x1896   :  { %v1916_v17 = vadd.f32 1.0, %v2930_v8 }
0x1897   :  { %2931 = vpow2.f32 %v2540_v14 }
0x1898   :  { %2933 = vrcp.f32 %v1916_v17  ;;  %v1929_v16 = vand.u32 2147483648, %v1916_v17  ;;  %v1927_v29 = vand.u32 2147483647, %v1916_v17  ;;  %vm1923_vm1 = vweird.f32 %v1916_v17 }
0x189a   :  { %v1930_v24 = vor.u32 1.1754944e-38, %v1929_v16  ;;  %vm1928_vm3 = vcmp.eq.f32.partialorder %v1927_v29, 8.507059e+37 }
0x189d   :  { %v2932_v23 = vpop.eup %2931 }
0x189e   :  { %v2934_v26 = vpop.eup %2933  ;;  %v1917_v2 = vadd.f32 1.0, %v2932_v23 }
0x189f   :  { %v1919_v22 = vmul.f32 %v2934_v26, %v1916_v17  ;;  %vm1924_vm15 = vweird.f32 %v2934_v26 }
0x18a0   :  { %2935 = vrcp.f32 %v1917_v2  ;;  %vm1925_vm2 = vmor %vm1923_vm1, %vm1924_vm15  ;;  %v1944_v56 = vand.u32 2147483648, %v1917_v2  ;;  %v1942_v3 = vand.u32 2147483647, %v1917_v2  ;;  %vm1938_vm5 = vweird.f32 %v1917_v2 }
0x18a1   :  { %v1920_v39 = vsub.f32 1.0, %v1919_v22  ;;  %2937 = vtanh.f32 %v1906_v10  ;;  %v3577_v10 = vld [vmem:[%s3719_s6] ss:$0 sm:$0xff] }
0x18a2   :  { %2939 = vtanh.f32 %v1907_v12  ;;  %v1945_v45 = vor.u32 1.1754944e-38, %v1944_v56  ;;  %vm1943_vm7 = vcmp.eq.f32.partialorder %v1942_v3, 8.507059e+37 }
0x18a3   :  { %v1921_v9 = vmul.f32 %v2934_v26, %v1920_v39 }
0x18a5   :  { %v1922_v30 = vadd.f32 %v2934_v26, %v1921_v9 }
0x18a6   :  { %v2936_v31 = vpop.eup %2935 }
0x18a7   :  { %v1926_v32 = vsel %vm1925_vm2, %v2934_v26, %v1922_v30  ;;  %v1934_v34 = vmul.f32 %v2936_v31, %v1917_v2  ;;  %v2938_v62 = vpop.eup %2937  ;;  %vm1939_vm0 = vweird.f32 %v2936_v31 }
0x18a8   :  { %v1931_v38 = vsel %vm1928_vm3, %v1930_v24, %v1926_v32  ;;  %vm1940_vm6 = vmor %vm1938_vm5, %vm1939_vm0  ;;  %v2940_v49 = vpop.eup %2939 }
0x18a9   :  { %v1948_v27 = vsel %vm3085_vm4, %v2938_v62, %v1931_v38  ;;  %v1935_v43 = vsub.f32 1.0, %v1934_v34 }
0x18aa   :  { %1954 = vrot.lane.b32.xlu0 %v1948_v27, %s3012_s18  ;;  %v1950_v19 = vmul.f32 %v1948_v27, %v3529_v13 }
0x18ab   :  { %v1936_v33 = vmul.f32 %v2936_v31, %v1935_v43 }
0x18ad   :  { %v1937_v44 = vadd.f32 %v2936_v31, %v1936_v33 }
0x18af   :  { %v1941_v47 = vsel %vm1940_vm6, %v2936_v31, %v1937_v44 }
0x18b0   :  { %v1946_v36 = vsel %vm1943_vm7, %v1945_v45, %v1941_v47 }
0x18b1   :  { %v1949_v28 = vsel %vm3085_vm4, %v2940_v49, %v1946_v36 }
0x18b2   :  { %1956 = vrot.lane.b32.xlu1 %v1949_v28, %s3012_s18  ;;  %v1951_v50 = vmul.f32 %v1949_v28, %v3536_v54 }
0x191c   :  { %v1955_v52 = vpop.permute.xlu0 %1954 }
0x191d   :  { %v1960_v53 = vmul.f32 %v1955_v52, %v1948_v27 }
0x191f   :  { %1964 = vrot.lane.b32.xlu2 %v1960_v53, %s3013_s19 }
0x1924   :  { %v1957_v48 = vpop.permute.xlu1 %1956 }
0x1925   :  { %v1961_v40 = vmul.f32 %v1957_v48, %v1949_v28 }
0x1927   :  { %1966 = vrot.lane.b32.xlu0 %v1961_v40, %s3013_s19 }
0x192f   :  { %1002 = vrot.lane.b32.xlu0 %v3328_v63, %s3013_s19 }
0x1979   :  { %v1965_v55 = vpop.permute.xlu2 %1964 }
0x197a   :  { %v3558_v57 = vadd.f32 %v1965_v55, %v1950_v19 }
0x197c   :  { %2941 = vtanh.f32 %v3558_v57 }
0x1982   :  { %v2942_v42 = vpop.eup %2941 }
0x1983   :  { %1976 = vrot.lane.b32.xlu1 %v2942_v42, %s3012_s18  ;;  %v2469_v42 = vmul.f32 -1.442695, %v3450_v41 }
0x198b   :  { %1004 = vrot.lane.b32.xlu1 %v3331_v20, %s3013_s19 }
0x1999   :  { %v1967_v1 = vpop.permute.xlu0 %1966 }
0x199a   :  { %v3565_v21 = vadd.f32 %v1967_v1, %v1951_v50 }
0x199c   :  { %2943 = vtanh.f32 %v3565_v21 }
0x19a1   :  { %v1003_v63 = vpop.permute.xlu0 %1002 }
0x19a2   :  { %v2944_v13 = vpop.eup %2943  ;;  %1009 = vst.msk [vmem:[#allocation2 + $0x28] sm:$0xf] %vm338_vm13, %v1003_v63 }
0x19a3   :  { %1978 = vrot.lane.b32.xlu2 %v2944_v13, %s3012_s18 }
0x19f5   :  { %v1977_v58 = vpop.permute.xlu1 %1976 }
0x19f6   :  { %v1982_v61 = vmul.f32 %v1977_v58, %v1948_v27 }
0x19fd   :  { %v1005_v59 = vpop.permute.xlu1 %1004  ;;  %v1979_v51 = vpop.permute.xlu2 %1978 }
0x19fe   :  { %1010 = vst.msk [vmem:[#allocation2 + $0x2c] sm:$0xf] %vm338_vm13, %v1005_v59  ;;  %v1983_v20 = vmul.f32 %v1979_v51, %v1949_v28 }
0x1a00   :  { %v1988_v6 = vpack.c.bf16 %v1983_v20, %v1982_v61 }
0x1a02   :  { %1990 = vrot.lane.b32.xlu2 %v1988_v6, %s3013_s19 }
0x1a05   :  { %v2582_v54 = vld [vmem:[#allocation2 + $0x28] sm:$0xff] }
0x1a06   :  { %2516 = vmatmul.msk.bf16.gmra.mxu3 %vm232_vm12, %v2582_v54 }
0x1a5c   :  { %v1991_v60 = vpop.permute.xlu2 %1990 }
0x1a5d   :  { %2541 = vmatmul.msk.bf16.vlgmr.msra.gmra.mxu2 %vm232_vm12, %v1991_v60 }
0x1a89   :  { %v1413_v11 = vpop.f32.mrf.mxu3 }
0x1a8a   :  { %v1414_v0 = vadd.f32 %v3577_v10, %v1413_v11 }
0x1a91   :  { %v1415_v7 = vpop.f32.mrf.mxu3 }
0x1a92   :  { %v1416_v5 = vadd.f32 %v3577_v10, %v1415_v7 }
0x1a94   :  { %v2689_v37 = vpack.c.bf16 %v1416_v5, %v1414_v0 }
0x1a96   :  { %v2723_v12 = vunpack.c.l.bf16 %v2689_v37  ;;  %v2724_v23 = vunpack.c.h.bf16 %v2689_v37 }
0x1ae0   :  { %v2004_v8 = vpop.f32.mrf.mxu2 }
0x1ae1   :  { %v2009_v14 = vadd.f32 %v2723_v12, %v2004_v8  ;;  %v2470_v8 = vmul.f32 -1.442695, %v3454_v18 }
0x1ae3   :  { %v2542_v17 = vmul.f32 -1.442695, %v2009_v14 }
0x1ae5   :  { %2945 = vpow2.f32 %v2542_v17 }
0x1ae8   :  { %v2006_v26 = vpop.f32.mrf.mxu2 }
0x1ae9   :  { %v2010_v2 = vadd.f32 %v2724_v23, %v2006_v26 }
0x1aeb   :  { %v2946_v22 = vpop.eup %2945  ;;  %v2543_v39 = vmul.f32 -1.442695, %v2010_v2 }
0x1aec   :  { %v2019_v16 = vadd.f32 1.0, %v2946_v22 }
0x1aed   :  { %2947 = vpow2.f32 %v2543_v39 }
0x1aee   :  { %2949 = vrcp.f32 %v2019_v16  ;;  %v2032_v32 = vand.u32 2147483648, %v2019_v16  ;;  %v2030_v62 = vand.u32 2147483647, %v2019_v16  ;;  %vm2026_vm9 = vweird.f32 %v2019_v16 }
0x1af0   :  { %v2033_v43 = vor.u32 1.1754944e-38, %v2032_v32  ;;  %vm2031_vm11 = vcmp.eq.f32.partialorder %v2030_v62, 8.507059e+37 }
0x1af3   :  { %v2948_v9 = vpop.eup %2947 }
0x1af4   :  { %v2950_v29 = vpop.eup %2949  ;;  %v2020_v30 = vadd.f32 1.0, %v2948_v9 }
0x1af5   :  { %v2022_v31 = vmul.f32 %v2950_v29, %v2019_v16  ;;  %vm2027_vm8 = vweird.f32 %v2950_v29 }
0x1af6   :  { %2951 = vrcp.f32 %v2020_v30  ;;  %vm2028_vm10 = vmor %vm2026_vm9, %vm2027_vm8  ;;  %v2047_v49 = vand.u32 2147483648, %v2020_v30  ;;  %v2045_v28 = vand.u32 2147483647, %v2020_v30  ;;  %vm2041_vm15 = vweird.f32 %v2020_v30 }
0x1af7   :  { %v2023_v24 = vsub.f32 1.0, %v2022_v31  ;;  %2953 = vtanh.f32 %v2009_v14 }
0x1af8   :  { %2955 = vtanh.f32 %v2010_v2  ;;  %v2048_v53 = vor.u32 1.1754944e-38, %v2047_v49  ;;  %vm2046_vm2 = vcmp.eq.f32.partialorder %v2045_v28, 8.507059e+37 }
0x1af9   :  { %v2024_v34 = vmul.f32 %v2950_v29, %v2023_v24  ;;  %2957 = vpow2.f32 %v2469_v42 }
0x1afb   :  { %v2025_v38 = vadd.f32 %v2950_v29, %v2024_v34 }
0x1afc   :  { %v2952_v27 = vpop.eup %2951 }
0x1afd   :  { %v2029_v56 = vsel %vm2028_vm10, %v2950_v29, %v2025_v38  ;;  %v2037_v33 = vmul.f32 %v2952_v27, %v2020_v30  ;;  %v2954_v3 = vpop.eup %2953  ;;  %vm2042_vm14 = vweird.f32 %v2952_v27 }
0x1afe   :  { %v2034_v44 = vsel %vm2031_vm11, %v2033_v43, %v2029_v56  ;;  %vm2043_vm1 = vmor %vm2041_vm15, %vm2042_vm14  ;;  %v2956_v40 = vpop.eup %2955 }
0x1aff   :  { %v3583_v45 = vsel %vm3085_vm4, %v2954_v3, %v2034_v44  ;;  %v2038_v47 = vsub.f32 1.0, %v2037_v33  ;;  %v2958_v50 = vpop.eup %2957 }
0x1b00   :  { %2057 = vrot.lane.b32.xlu0 %v3583_v45, %s3012_s18  ;;  %v1198_v1 = vadd.f32 1.0, %v2958_v50 }
0x1b01   :  { %v2039_v36 = vmul.f32 %v2952_v27, %v2038_v47 }
0x1b02   :  { %2959 = vrcp.f32 %v1198_v1  ;;  %v1211_v60 = vand.u32 2147483648, %v1198_v1  ;;  %vm1205_vm0 = vweird.f32 %v1198_v1  ;;  %v1209_v11 = vand.u32 2147483647, %v1198_v1 }
0x1b03   :  { %v2040_v52 = vadd.f32 %v2952_v27, %v2039_v36  ;;  %2961 = vtanh.f32 %v3450_v41 }
0x1b04   :  { %v1212_v5 = vor.u32 1.1754944e-38, %v1211_v60  ;;  %vm1210_vm6 = vcmp.eq.f32.partialorder %v1209_v11, 8.507059e+37  ;;  %2963 = vpow2.f32 %v2470_v8 }
0x1b05   :  { %v2044_v48 = vsel %vm2043_vm1, %v2952_v27, %v2040_v52 }
0x1b06   :  { %v2049_v19 = vsel %vm2046_vm2, %v2048_v53, %v2044_v48 }
0x1b07   :  { %v3589_v55 = vsel %vm3085_vm4, %v2956_v40, %v2049_v19 }
0x1b08   :  { %2059 = vrot.lane.b32.xlu1 %v3589_v55, %s3012_s18  ;;  %v2960_v13 = vpop.eup %2959  ;;  %v2054_v62 = vmul.f32 %v3589_v55, %v3565_v21 }
0x1b09   :  { %v1201_v59 = vmul.f32 %v2960_v13, %v1198_v1  ;;  %vm1206_vm3 = vweird.f32 %v2960_v13  ;;  %v2962_v37 = vpop.eup %2961 }
0x1b0a   :  { %vm1207_vm5 = vmor %vm1205_vm0, %vm1206_vm3  ;;  %v2964_v41 = vpop.eup %2963 }
0x1b0b   :  { %v1202_v61 = vsub.f32 1.0, %v1201_v59  ;;  %v1199_v14 = vadd.f32 1.0, %v2964_v41 }
0x1b0d   :  { %v1203_v6 = vmul.f32 %v2960_v13, %v1202_v61  ;;  %2965 = vrcp.f32 %v1199_v14  ;;  %v1226_v29 = vand.u32 2147483648, %v1199_v14  ;;  %vm1220_vm8 = vweird.f32 %v1199_v14 }
0x1b0e   :  { %v1224_v30 = vand.u32 2147483647, %v1199_v14 }
0x1b0f   :  { %v1204_v54 = vadd.f32 %v2960_v13, %v1203_v6  ;;  %v1227_v31 = vor.u32 1.1754944e-38, %v1226_v29 }
0x1b10   :  { %vm1225_vm10 = vcmp.eq.f32.partialorder %v1224_v30, 8.507059e+37 }
0x1b11   :  { %v1208_v7 = vsel %vm1207_vm5, %v2960_v13, %v1204_v54 }
0x1b12   :  { %v1213_v0 = vsel %vm1210_vm6, %v1212_v5, %v1208_v7 }
0x1b13   :  { %v3603_v12 = vsel %vm3085_vm4, %v2962_v37, %v1213_v0  ;;  %v2966_v17 = vpop.eup %2965 }
0x1b14   :  { %v1216_v2 = vmul.f32 %v2966_v17, %v1199_v14  ;;  %vm1221_vm7 = vweird.f32 %v2966_v17  ;;  %v1232_v30 = vmul.f32 %v3603_v12, %v3394_v25 }
0x1b15   :  { %vm1222_vm9 = vmor %vm1220_vm8, %vm1221_vm7 }
0x1b16   :  { %v1217_v22 = vsub.f32 1.0, %v1216_v2 }
0x1b18   :  { %v1218_v16 = vmul.f32 %v2966_v17, %v1217_v22 }
0x1b1a   :  { %v1219_v9 = vadd.f32 %v2966_v17, %v1218_v16 }
0x1b72   :  { %v2058_v63 = vpop.permute.xlu0 %2057 }
0x1b73   :  { %v2063_v58 = vmul.f32 %v2058_v63, %v3583_v45 }
0x1b75   :  { %2067 = vrot.lane.b32.xlu2 %v2063_v58, %s3013_s19 }
0x1b7a   :  { %v2060_v51 = vpop.permute.xlu1 %2059 }
0x1b7b   :  { %v2064_v20 = vmul.f32 %v2060_v51, %v3589_v55 }
0x1b7d   :  { %2069 = vrot.lane.b32.xlu0 %v2064_v20, %s3013_s19 }
0x1b85   :  { %1136 = vrot.lane.b32.xlu0 %v3421_v15, %s3013_s19  ;;  %v2053_v15 = vmul.f32 %v3583_v45, %v3558_v57  ;;  %v1223_v57 = vsel %vm1222_vm9, %v2966_v17, %v1219_v9 }
0x1b86   :  { %v1228_v24 = vsel %vm1225_vm10, %v1227_v31, %v1223_v57 }
0x1b8d   :  { %1236 = vrot.lane.b32.xlu0 %v3603_v12, %s3012_s18 }
0x1bcf   :  { %v2068_v23 = vpop.permute.xlu2 %2067 }
0x1bd0   :  { %v3610_v26 = vadd.f32 %v2068_v23, %v2053_v15 }
0x1bd2   :  { %2967 = vtanh.f32 %v3610_v26 }
0x1bd3   :  { %2969 = vtanh.f32 %v3454_v18 }
0x1bd8   :  { %v2968_v39 = vpop.eup %2967 }
0x1bd9   :  { %2079 = vrot.lane.b32.xlu1 %v2968_v39, %s3012_s18  ;;  %v2970_v32 = vpop.eup %2969 }
0x1bda   :  { %v3619_v34 = vsel %vm3085_vm4, %v2970_v32, %v1228_v24 }
0x1be1   :  { %1138 = vrot.lane.b32.xlu1 %v3424_v46, %s3013_s19 }
0x1be9   :  { %1238 = vrot.lane.b32.xlu1 %v3619_v34, %s3012_s18 }
0x1bef   :  { %v2070_v18 = vpop.permute.xlu0 %2069 }
0x1bf0   :  { %v3625_v38 = vadd.f32 %v2070_v18, %v2054_v62 }
0x1bf2   :  { %2971 = vtanh.f32 %v3625_v38 }
0x1bf7   :  { %v1137_v46 = vpop.permute.xlu0 %1136 }
0x1bf8   :  { %v2972_v27 = vpop.eup %2971  ;;  %1143 = vst.msk [vmem:[#allocation2 + $0x30] sm:$0xf] %vm338_vm13, %v1137_v46 }
0x1bf9   :  { %2081 = vrot.lane.b32.xlu2 %v2972_v27, %s3012_s18 }
0x1bff   :  { %v1237_v43 = vpop.permute.xlu0 %1236 }
0x1c00   :  { %v1242_v56 = vmul.f32 %v1237_v43, %v3603_v12 }
0x1c02   :  { %1246 = vrot.lane.b32.xlu1 %v1242_v56, %s3013_s19 }
0x1c4b   :  { %v2080_v33 = vpop.permute.xlu1 %2079 }
0x1c4c   :  { %v2085_v21 = vmul.f32 %v2080_v33, %v3583_v45  ;;  %v1233_v33 = vmul.f32 %v3619_v34, %v3408_v4 }
0x1c53   :  { %v1139_v3 = vpop.permute.xlu1 %1138  ;;  %v2082_v44 = vpop.permute.xlu2 %2081 }
0x1c54   :  { %1144 = vst.msk [vmem:[#allocation2 + $0x34] sm:$0xf] %vm338_vm13, %v1139_v3  ;;  %v2086_v47 = vmul.f32 %v2082_v44, %v3589_v55 }
0x1c56   :  { %v2091_v49 = vpack.c.bf16 %v2086_v47, %v2085_v21 }
0x1c58   :  { %2093 = vrot.lane.b32.xlu2 %v2091_v49, %s3013_s19 }
0x1c5b   :  { %v2583_v36 = vld [vmem:[#allocation2 + $0x30] sm:$0xff]  ;;  %v1239_v0 = vpop.permute.xlu1 %1238 }
0x1c5c   :  { %2517 = vmatmul.msk.bf16.gmra.mxu3 %vm232_vm12, %v2583_v36  ;;  %v1243_v18 = vmul.f32 %v1239_v0, %v3619_v34 }
0x1c74   :  { %v1247_v29 = vpop.permute.xlu1 %1246 }
0x1c75   :  { %v1252_v24 = vadd.f32 %v1247_v29, %v1232_v30 }
0x1cb2   :  { %v2094_v28 = vpop.permute.xlu2 %2093 }
0x1cb3   :  { %2544 = vmatmul.msk.bf16.vlgmr.msra.gmra.mxu1 %vm232_vm12, %v2094_v28 }
0x1cdf   :  { %v1418_v52 = vpop.f32.mrf.mxu3 }
0x1ce0   :  { %v1419_v40 = vadd.f32 %v3577_v10, %v1418_v52 }
0x1ce7   :  { %v1420_v53 = vpop.f32.mrf.mxu3 }
0x1ce8   :  { %v1421_v48 = vadd.f32 %v3577_v10, %v1420_v53 }
0x1cea   :  { %v2694_v45 = vpack.c.bf16 %v1421_v48, %v1419_v40 }
0x1cec   :  { %v2727_v19 = vunpack.c.l.bf16 %v2694_v45  ;;  %v2728_v1 = vunpack.c.h.bf16 %v2694_v45 }
0x1d30   :  { %v2107_v42 = vpop.f32.mrf.mxu1 }
0x1d31   :  { %v2112_v50 = vadd.f32 %v2727_v19, %v2107_v42 }
0x1d33   :  { %v2545_v55 = vmul.f32 -1.442695, %v2112_v50 }
0x1d35   :  { %2973 = vpow2.f32 %v2545_v55 }
0x1d38   :  { %v2109_v63 = vpop.f32.mrf.mxu1 }
0x1d39   :  { %v2113_v13 = vadd.f32 %v2728_v1, %v2109_v63 }
0x1d3b   :  { %v2974_v58 = vpop.eup %2973  ;;  %v2546_v59 = vmul.f32 -1.442695, %v2113_v13 }
0x1d3c   :  { %v2122_v51 = vadd.f32 1.0, %v2974_v58 }
0x1d3d   :  { %2975 = vpow2.f32 %v2546_v59 }
0x1d3e   :  { %2977 = vrcp.f32 %v2122_v51  ;;  %v2135_v11 = vand.u32 2147483648, %v2122_v51  ;;  %v2133_v5 = vand.u32 2147483647, %v2122_v51  ;;  %vm2129_vm14 = vweird.f32 %v2122_v51 }
0x1d40   :  { %v2136_v41 = vor.u32 1.1754944e-38, %v2135_v11  ;;  %vm2134_vm1 = vcmp.eq.f32.partialorder %v2133_v5, 8.507059e+37 }
0x1d43   :  { %v2976_v61 = vpop.eup %2975 }
0x1d44   :  { %v2978_v20 = vpop.eup %2977  ;;  %v2123_v6 = vadd.f32 1.0, %v2976_v61 }
0x1d45   :  { %v2125_v54 = vmul.f32 %v2978_v20, %v2122_v51  ;;  %vm2130_vm11 = vweird.f32 %v2978_v20 }
0x1d46   :  { %2979 = vrcp.f32 %v2123_v6  ;;  %vm2131_vm15 = vmor %vm2129_vm14, %vm2130_vm11  ;;  %v2150_v39 = vand.u32 2147483648, %v2123_v6  ;;  %v2148_v9 = vand.u32 2147483647, %v2123_v6  ;;  %vm2144_vm3 = vweird.f32 %v2123_v6 }
0x1d47   :  { %v2126_v60 = vsub.f32 1.0, %v2125_v54  ;;  %2981 = vtanh.f32 %v2112_v50 }
0x1d48   :  { %2983 = vtanh.f32 %v2113_v13  ;;  %v2151_v31 = vor.u32 1.1754944e-38, %v2150_v39  ;;  %vm2149_vm5 = vcmp.eq.f32.partialorder %v2148_v9, 8.507059e+37 }
0x1d49   :  { %v2127_v7 = vmul.f32 %v2978_v20, %v2126_v60  ;;  %2985 = vtanh.f32 %v1252_v24 }
0x1d4b   :  { %v2128_v37 = vadd.f32 %v2978_v20, %v2127_v7 }
0x1d4c   :  { %v2980_v8 = vpop.eup %2979 }
0x1d4d   :  { %v2132_v14 = vsel %vm2131_vm15, %v2978_v20, %v2128_v37  ;;  %v2140_v15 = vmul.f32 %v2980_v8, %v2123_v6  ;;  %v2982_v17 = vpop.eup %2981  ;;  %vm2145_vm2 = vweird.f32 %v2980_v8 }
0x1d4e   :  { %v2137_v23 = vsel %vm2134_vm1, %v2136_v41, %v2132_v14  ;;  %vm2146_vm0 = vmor %vm2144_vm3, %vm2145_vm2  ;;  %v2984_v62 = vpop.eup %2983 }
0x1d4f   :  { %v2154_v2 = vsel %vm3085_vm4, %v2982_v17, %v2137_v23  ;;  %v2141_v22 = vsub.f32 1.0, %v2140_v15  ;;  %v2986_v25 = vpop.eup %2985 }
0x1d50   :  { %2160 = vrot.lane.b32.xlu2 %v2154_v2, %s3012_s18  ;;  %v2156_v53 = vmul.f32 %v2154_v2, %v3610_v26 }
0x1d51   :  { %v2142_v16 = vmul.f32 %v2980_v8, %v2141_v22 }
0x1d53   :  { %v2143_v57 = vadd.f32 %v2980_v8, %v2142_v16 }
0x1d55   :  { %v2147_v32 = vsel %vm2146_vm0, %v2980_v8, %v2143_v57 }
0x1d56   :  { %v2152_v46 = vsel %vm2149_vm5, %v2151_v31, %v2147_v32 }
0x1d57   :  { %v2155_v27 = vsel %vm3085_vm4, %v2984_v62, %v2152_v46 }
0x1d58   :  { %1248 = vrot.lane.b32.xlu2 %v1243_v18, %s3013_s19  ;;  %2162 = vrot.lane.b32.xlu0 %v2155_v27, %s3012_s18  ;;  %v2157_v50 = vmul.f32 %v2155_v27, %v3625_v38 }
0x1d60   :  { %1258 = vrot.lane.b32.xlu2 %v2986_v25, %s3012_s18 }
0x1daa   :  { %v2161_v43 = vpop.permute.xlu2 %2160 }
0x1dab   :  { %v2166_v56 = vmul.f32 %v2161_v43, %v2154_v2 }
0x1dad   :  { %2170 = vrot.lane.b32.xlu0 %v2166_v56, %s3013_s19 }
0x1db2   :  { %v1249_v3 = vpop.permute.xlu2 %1248 }
0x1db3   :  { %v1253_v44 = vadd.f32 %v1249_v3, %v1233_v33 }
0x1db5   :  { %2987 = vtanh.f32 %v1253_v44 }
0x1dba   :  { %v1259_v47 = vpop.permute.xlu2 %1258 }
0x1dbb   :  { %v2988_v21 = vpop.eup %2987  ;;  %v1264_v49 = vmul.f32 %v1259_v47, %v3603_v12 }
0x1dbc   :  { %1260 = vrot.lane.b32.xlu0 %v2988_v21, %s3012_s18 }
0x1dbd   :  { %v1266_v36 = vpack.c.bf16 %v1264_v49, %v1264_v49 }
0x1dc4   :  { %1270 = vrot.lane.b32.xlu0 %v1266_v36, %s3013_s19 }
0x1dca   :  { %v2163_v28 = vpop.permute.xlu0 %2162 }
0x1dcb   :  { %v2167_v52 = vmul.f32 %v2163_v28, %v2155_v27 }
0x1dcd   :  { %2172 = vrot.lane.b32.xlu1 %v2167_v52, %s3013_s19 }
0x1e1f   :  { %v2171_v48 = vpop.permute.xlu0 %2170 }
0x1e20   :  { %v3659_v4 = vadd.f32 %v2171_v48, %v2156_v53 }
0x1e22   :  { %2989 = vtanh.f32 %v3659_v4 }
0x1e28   :  { %v2990_v40 = vpop.eup %2989 }
0x1e29   :  { %2182 = vrot.lane.b32.xlu1 %v2990_v40, %s3012_s18 }
0x1e2e   :  { %v1261_v45 = vpop.permute.xlu0 %1260 }
0x1e2f   :  { %v1265_v12 = vmul.f32 %v1261_v45, %v3619_v34 }
0x1e31   :  { %v1267_v19 = vpack.c.bf16 %v1265_v12, %v1265_v12 }
0x1e33   :  { %1272 = vrot.lane.b32.xlu1 %v1267_v19, %s3013_s19 }
0x1e36   :  { %v1271_v42 = vpop.permute.xlu0 %1270 }
0x1e37   :  { %1277 = vst.msk [vmem:[#allocation2 + $0x38] sm:$0xf] %vm338_vm13, %v1271_v42 }
0x1e3f   :  { %v2173_v26 = vpop.permute.xlu1 %2172 }
0x1e40   :  { %v3667_v55 = vadd.f32 %v2173_v26, %v2157_v50 }
0x1e42   :  { %2991 = vtanh.f32 %v3667_v55 }
0x1e48   :  { %v2992_v1 = vpop.eup %2991 }
0x1e49   :  { %2184 = vrot.lane.b32.xlu2 %v2992_v1, %s3012_s18  ;;  %v2296_v1 = vld [vmem:[%s3721_s7 + $0x18] sm:$0xff] }
0x1e4a   :  { %2323 = vmatpush.msrb.mxu1 %v2296_v1 }
0x1e9b   :  { %v2183_v63 = vpop.permute.xlu1 %2182 }
0x1e9c   :  { %v2188_v58 = vmul.f32 %v2183_v63, %v2154_v2  ;;  %v2294_v63 = vld [vmem:[%s3721_s7 + $0x8] sm:$0xff] }
0x1ea3   :  { %v2185_v13 = vpop.permute.xlu2 %2184 }
0x1ea4   :  { %v2189_v34 = vmul.f32 %v2185_v13, %v2155_v27 }
0x1ea5   :  { %v1273_v59 = vpop.permute.xlu1 %1272 }
0x1ea6   :  { %v2194_v51 = vpack.c.bf16 %v2189_v34, %v2188_v58  ;;  %1278 = vst.msk [vmem:[#allocation2 + $0x3c] sm:$0xf] %vm338_vm13, %v1273_v59 }
0x1ea8   :  { %2196 = vrot.lane.b32.xlu2 %v2194_v51, %s3013_s19 }
0x1ead   :  { %v2584_v61 = vld [vmem:[#allocation2 + $0x38] sm:$0xff] }
0x1eae   :  { %2518 = vmatmul.msk.bf16.gmra.mxu3 %vm232_vm12, %v2584_v61 }
0x1f02   :  { %v2197_v38 = vpop.permute.xlu2 %2196 }
0x1f03   :  { %2547 = vmatmul.msk.bf16.vlgmr.msrb.gmra.mxu2 %vm232_vm12, %v2197_v38  ;;  %v2752_v38 = vld [vmem:[%s3722_s8] ss:$0 sm:$0xff] }
0x1f31   :  { %v1423_v20 = vpop.f32.mrf.mxu3 }
0x1f32   :  { %v1424_v60 = vadd.f32 %v3577_v10, %v1423_v20 }
0x1f39   :  { %v1425_v6 = vpop.f32.mrf.mxu3 }
0x1f3a   :  { %v1426_v54 = vadd.f32 %v3577_v10, %v1425_v6 }
0x1f3c   :  { %v2699_v11 = vpack.c.bf16 %v1426_v54, %v1424_v60 }
0x1f3e   :  { %v2731_v7 = vunpack.c.l.bf16 %v2699_v11  ;;  %v2732_v8 = vunpack.c.h.bf16 %v2699_v11 }
0x1f86   :  { %v2210_v5 = vpop.f32.mrf.mxu2 }
0x1f87   :  { %v2215_v0 = vadd.f32 %v2731_v7, %v2210_v5 }
0x1f89   :  { %v2548_v37 = vmul.f32 -1.442695, %v2215_v0 }
0x1f8b   :  { %2993 = vpow2.f32 %v2548_v37 }
0x1f8e   :  { %v2212_v41 = vpop.f32.mrf.mxu2 }
0x1f8f   :  { %v2216_v14 = vadd.f32 %v2732_v8, %v2212_v41 }
0x1f91   :  { %v2994_v15 = vpop.eup %2993  ;;  %v2549_v17 = vmul.f32 -1.442695, %v2216_v14 }
0x1f92   :  { %v2225_v23 = vadd.f32 1.0, %v2994_v15 }
0x1f93   :  { %2995 = vpow2.f32 %v2549_v17 }
0x1f94   :  { %2997 = vrcp.f32 %v2225_v23  ;;  %v2238_v9 = vand.u32 2147483648, %v2225_v23  ;;  %v2236_v30 = vand.u32 2147483647, %v2225_v23  ;;  %vm2232_vm6 = vweird.f32 %v2225_v23 }
0x1f96   :  { %v2239_v24 = vor.u32 1.1754944e-38, %v2238_v9  ;;  %vm2237_vm8 = vcmp.eq.f32.partialorder %v2236_v30, 8.507059e+37 }
0x1f99   :  { %v2996_v2 = vpop.eup %2995 }
0x1f9a   :  { %v2998_v22 = vpop.eup %2997  ;;  %v2226_v39 = vadd.f32 1.0, %v2996_v2 }
0x1f9b   :  { %v2228_v16 = vmul.f32 %v2998_v22, %v2225_v23  ;;  %vm2233_vm13 = vweird.f32 %v2998_v22 }
0x1f9c   :  { %2999 = vrcp.f32 %v2226_v39  ;;  %vm2234_vm7 = vmor %vm2232_vm6, %vm2233_vm13  ;;  %v2253_v43 = vand.u32 2147483648, %v2226_v39  ;;  %v2251_v33 = vand.u32 2147483647, %v2226_v39  ;;  %vm2247_vm10 = vweird.f32 %v2226_v39 }
0x1f9d   :  { %v2229_v10 = vsub.f32 1.0, %v2228_v16  ;;  %3001 = vtanh.f32 %v2215_v0 }
0x1f9e   :  { %3003 = vtanh.f32 %v2216_v14  ;;  %v2254_v44 = vor.u32 1.1754944e-38, %v2253_v43  ;;  %vm2252_vm14 = vcmp.eq.f32.partialorder %v2251_v33, 8.507059e+37 }
0x1f9f   :  { %v2230_v29 = vmul.f32 %v2998_v22, %v2229_v10 }
0x1fa1   :  { %v2231_v57 = vadd.f32 %v2998_v22, %v2230_v29 }
0x1fa2   :  { %v3000_v31 = vpop.eup %2999 }
0x1fa3   :  { %v2235_v32 = vsel %vm2234_vm7, %v2998_v22, %v2231_v57  ;;  %v2243_v62 = vmul.f32 %v3000_v31, %v2226_v39  ;;  %v3002_v18 = vpop.eup %3001  ;;  %vm2248_vm9 = vweird.f32 %v3000_v31 }
0x1fa4   :  { %v2240_v46 = vsel %vm2237_vm8, %v2239_v24, %v2235_v32  ;;  %vm2249_vm11 = vmor %vm2247_vm10, %vm2248_vm9  ;;  %v3004_v47 = vpop.eup %3003 }
0x1fa5   :  { %v2257_v27 = vsel %vm3085_vm4, %v3002_v18, %v2240_v46  ;;  %v2244_v25 = vsub.f32 1.0, %v2243_v62 }
0x1fa6   :  { %2263 = vrot.lane.b32.xlu0 %v2257_v27, %s3012_s18  ;;  %v2259_v40 = vmul.f32 %v2257_v27, %v3659_v4  ;;  %v2295_v4 = vld [vmem:[%s3721_s7 + $0x10] sm:$0xff] }
0x1fa7   :  { %v2245_v56 = vmul.f32 %v3000_v31, %v2244_v25  ;;  %2324 = vmatpush.msrb.mxu1 %v2295_v4 }
0x1fa9   :  { %v2246_v3 = vadd.f32 %v3000_v31, %v2245_v56  ;;  %2325 = vmatpush.msrb.mxu1 %v2294_v63 }
0x1fab   :  { %v2250_v21 = vsel %vm2249_vm11, %v3000_v31, %v2246_v3 }
0x1fac   :  { %v2255_v49 = vsel %vm2252_vm14, %v2254_v44, %v2250_v21 }
0x1fad   :  { %v2258_v36 = vsel %vm3085_vm4, %v3004_v47, %v2255_v49 }
0x1fae   :  { %2265 = vrot.lane.b32.xlu1 %v2258_v36, %s3012_s18  ;;  %v2260_v35 = vmul.f32 %v2258_v36, %v3667_v55  ;;  %v2293_v55 = vld [vmem:[%s3721_s7] sm:$0xff] }
0x1faf   :  { %2326 = vmatpush.msrb.mxu1 %v2293_v55 }
0x2018   :  { %v2264_v28 = vpop.permute.xlu0 %2263 }
0x2019   :  { %v2269_v52 = vmul.f32 %v2264_v28, %v2257_v27 }
0x201b   :  { %2273 = vrot.lane.b32.xlu2 %v2269_v52, %s3013_s19 }
0x2020   :  { %v2266_v53 = vpop.permute.xlu1 %2265 }
0x2021   :  { %v2270_v48 = vmul.f32 %v2266_v53, %v2258_v36 }
0x2023   :  { %2275 = vrot.lane.b32.xlu0 %v2270_v48, %s3013_s19 }
0x2075   :  { %v2274_v45 = vpop.permute.xlu2 %2273 }
0x2076   :  { %v2279_v12 = vadd.f32 %v2274_v45, %v2259_v40 }
0x2078   :  { %3005 = vtanh.f32 %v2279_v12 }
0x207e   :  { %v3006_v19 = vpop.eup %3005 }
0x207f   :  { %2285 = vrot.lane.b32.xlu1 %v3006_v19, %s3012_s18 }
0x2095   :  { %v2276_v42 = vpop.permute.xlu0 %2275 }
0x2096   :  { %v2280_v50 = vadd.f32 %v2276_v42, %v2260_v35 }
0x2098   :  { %3007 = vtanh.f32 %v2280_v50 }
0x209e   :  { %v3008_v26 = vpop.eup %3007 }
0x209f   :  { %2287 = vrot.lane.b32.xlu2 %v3008_v26, %s3012_s18 }
0x20f1   :  { %v2286_v13 = vpop.permute.xlu1 %2285 }
0x20f2   :  { %v2291_v58 = vmul.f32 %v2286_v13, %v2257_v27 }
0x20f4   :  { %2303 = vrot.lane.b32.xlu0 %v2291_v58, %s3013_s19 }
0x20f9   :  { %v2288_v34 = vpop.permute.xlu2 %2287 }
0x20fa   :  { %v2292_v59 = vmul.f32 %v2288_v34, %v2258_v36 }
0x20fc   :  { %2305 = vrot.lane.b32.xlu1 %v2292_v59, %s3013_s19 }
0x2166   :  { %v2304_v51 = vpop.permute.xlu0 %2303 }
0x2167   :  { %2550 = vmatmul.msk.f32.vlgmr.msrb.gmra.mxu1 %vm232_vm12, %v2304_v51 }
0x216e   :  { %v2306_v61 = vpop.permute.xlu1 %2305 }
0x216f   :  { %2551 = vmatmul.msk.f32.gmra.mxu1 %vm232_vm12, %v2306_v61 }
0x21e4   :  { %v2328_v20 = vpop.f32.mrf.mxu1 }
0x21e5   :  { %v2329_v6 = vadd.f32 %v2752_v38, %v2328_v20 }
0x21e7   :  { %2334 = vst [vmem:[%s3723_s9] sm:$0xff] %v2329_v6 }
0x21ec   :  { %v2331_v54 = vpop.f32.mrf.mxu1 }
0x21ed   :  { %v2332_v60 = vadd.f32 %v2752_v38, %v2331_v54 }
0x21ef   :  { %2335 = vst [vmem:[%s3723_s9 + $0x8] sm:$0xff] %v2332_v60 }

</bundles_post_ra>
